<compile_context>
chip_gen: v7x
topology: tpu7x:2x2x1
jax: 0.10.0
libtpu: 0.0.40
codegen_flags: <defaults>
</compile_context>

<pallas_src>
import functools

import jax
import jax.numpy as jnp
from jax.experimental import pallas as pl
from jax.experimental.pallas import tpu as pltpu


# ------------------------------ Pallas kernel --------------------------------
def _cbam_kernel(x_ref, wfc_ref, bfc_ref, wsa_ref, rc_ref, o_ref, *,
                 height, width, kernel_size):
    """Fused CBAM for one image, lane-dense layout.

    x_ref  : (1, C, H*W)  input image (flattened spatial, lane-dense)
    wfc_ref: (C, C)       channel-attention 1x1 conv weight (C_out, C_in)
    bfc_ref: (C, 1)       channel-attention bias
    wsa_ref: (2*K*K,)     spatial-attention conv taps, SMEM, idx = c*K*K+dy*K+dx
    rc_ref : (2, H*W)     int32 [row; col] index of each flat position
    o_ref  : (1, C, H*W)  output
    """
    _, C, HW = x_ref.shape
    H, W, K = height, width, kernel_size
    P = (K - 1) // 2
    inv_hw = 1.0 / float(HW)
    inv_c = 1.0 / float(C)

    x2d = x_ref[0].astype(jnp.float32)                          # (C, HW)

    # ---------------- channel attention: avg pool -> MXU FC -> sigmoid -------
    pooled = jnp.sum(x2d, axis=-1, keepdims=True) * inv_hw      # (C, 1)
    z = jnp.dot(wfc_ref[...].astype(jnp.float32), pooled,
                preferred_element_type=jnp.float32)             # (C, 1) on MXU
    z = z + bfc_ref[...].astype(jnp.float32)
    ca = jax.nn.sigmoid(z)                                      # (C, 1)

    # channel-gated feature map (the only resident copy; x2d dies here)
    y2d = x2d * ca                                              # (C, HW)

    # --------------- spatial attention: [mean;max] -> KxK conv -> sigmoid ----
    s_mean = jnp.sum(y2d, axis=0, keepdims=True) * inv_c        # (1, HW)
    s_max = jnp.max(y2d, axis=0, keepdims=True)                 # (1, HW)

    # Border-validity masks (hoisted: K row masks + K col masks, reused for
    # every tap).  rc_ref holds precomputed row/col of each flat position.
    row = rc_ref[0:1, :]                                        # (1, HW) int32
    col = rc_ref[1:2, :]
    row_ok = [(row >= (P - dy)) & (row < (H + P - dy)) for dy in range(K)]
    col_ok = [(col >= (P - dx)) & (col < (W + P - dx)) for dx in range(K)]

    # Zero-padded KxK conv done as static lane rolls (XLU) + masked FMAs; taps
    # are SMEM scalars so no (1,1)->(H,W) broadcasts are emitted.
    acc = jnp.zeros((1, HW), jnp.float32)
    for ci, base in enumerate((s_mean, s_max)):
        for dy in range(K):
            for dx in range(K):
                delta = (dy - P) * W + (dx - P)
                shift = (-delta) % HW
                shifted = base if shift == 0 else pltpu.roll(base, shift, axis=1)
                tap = wsa_ref[ci * K * K + dy * K + dx]         # SMEM scalar
                ok = row_ok[dy] & col_ok[dx]
                acc = acc + jnp.where(ok, shifted, 0.0) * tap
    sa = jax.nn.sigmoid(acc)                                    # (1, HW)

    # ---------------- apply spatial attention: single lane-dense store -------
    o_ref[0] = (y2d * sa).astype(o_ref.dtype)


# -------------------------------- wrapper -------------------------------------
def cbam_forward(x_nchw, params, *, kernel_size=7):
    """CBAM forward. x_nchw: (N, C, H, W). Returns (N, C, H, W)."""
    n, c, h, w = x_nchw.shape
    k = kernel_size
    hw = h * w

    w_fc = params["w_fc"].reshape(c, c).astype(jnp.float32)        # (C_out, C_in)
    b_fc = params["b_fc"].reshape(c, 1).astype(jnp.float32)
    w_sa = params["w_sa"].reshape(2 * k * k).astype(jnp.float32)   # from (1,2,k,k)

    # Lane-dense view of the activations (free reshape of contiguous NCHW).
    x2d = x_nchw.reshape(n, c, hw)

    # Precomputed [row; col] of each flat spatial position (tiny, constant
    # across the grid so it is fetched once).
    pos = jnp.arange(hw, dtype=jnp.int32)
    rc = jnp.stack([pos // w, pos % w], axis=0)                    # (2, HW)

    kernel = functools.partial(_cbam_kernel, height=h, width=w, kernel_size=k)

    # Advisory cost estimate: mostly memory-bound elementwise work + tiny conv.
    flops_per_img = (c * hw                 # global pool
                     + 2 * c * c            # 1x1 FC
                     + c * hw               # channel gate
                     + 2 * c * hw           # channel mean/max
                     + 4 * 2 * k * k * hw   # spatial conv (roll+mask+fma)
                     + c * hw)              # spatial gate
    cost = pl.CostEstimate(
        flops=int(n * flops_per_img),
        transcendentals=int(n * (c + hw)),
        bytes_accessed=int(4 * (2 * n * c * hw + c * c + c + 2 * k * k + 2 * hw)))

    # VMEM budget derived from actual block sizes (in+out, double-buffered)
    # plus params and headroom; capped so it stays safe on v7x's 64 MiB VMEM.
    itemsize = jnp.dtype(x_nchw.dtype).itemsize
    block_bytes = c * hw * itemsize
    vmem_needed = 4 * block_bytes + 4 * (c * c + c + 2 * k * k + 2 * hw) + (2 << 20)
    vmem_limit = int(min(max(vmem_needed, 8 << 20), 64 << 20))

    out2d = pl.pallas_call(
        kernel,
        out_shape=jax.ShapeDtypeStruct((n, c, hw), x_nchw.dtype),
        grid_spec=pltpu.PrefetchScalarGridSpec(
            num_scalar_prefetch=0,
            grid=(n,),
            in_specs=[
                pl.BlockSpec((1, c, hw), lambda i: (i, 0, 0)),
                pl.BlockSpec((c, c), lambda i: (0, 0)),
                pl.BlockSpec((c, 1), lambda i: (0, 0)),
                pl.BlockSpec(memory_space=pltpu.MemorySpace.SMEM),   # conv taps
                pl.BlockSpec((2, hw), lambda i: (0, 0)),
            ],
            out_specs=pl.BlockSpec((1, c, hw), lambda i: (i, 0, 0)),
        ),
        compiler_params=pltpu.CompilerParams(
            dimension_semantics=("parallel",),
            vmem_limit_bytes=vmem_limit,
        ),
        cost_estimate=cost,
    )(x2d, w_fc, b_fc, w_sa, rc)

    return out2d.reshape(n, c, h, w)


def make_cbam_params(key, channels, kernel_size=7):
    k1, k2, k3 = jax.random.split(key, 3)
    # ChannelAttention.fc: Conv2d(C, C, 1, bias=True) -> weight (C, C), bias (C,)
    w_fc = jax.random.normal(k1, (channels, channels), jnp.float32) / (channels ** 0.5)
    b_fc = 0.1 * jax.random.normal(k2, (channels,), jnp.float32)
    # SpatialAttention.cv1: Conv2d(2, 1, k, padding=k//2, bias=False) -> (1, 2, k, k)
    w_sa = 0.2 * jax.random.normal(k3, (1, 2, kernel_size, kernel_size), jnp.float32)
    return dict(w_fc=w_fc, b_fc=b_fc, w_sa=w_sa)


# ------------------------------- reference ------------------------------------
def _ref_cbam(x, params, kernel_size=7):
    p = (kernel_size - 1) // 2
    # channel attention
    pooled = jnp.mean(x, axis=(2, 3))                           # (N, C)
    z = pooled @ params["w_fc"].T + params["b_fc"]              # (N, C)
    ca = jax.nn.sigmoid(z)[:, :, None, None]
    y = x * ca
    # spatial attention
    s = jnp.concatenate([jnp.mean(y, axis=1, keepdims=True),
                         jnp.max(y, axis=1, keepdims=True)], axis=1)
    conv = jax.lax.conv_general_dilated(
        s, params["w_sa"], window_strides=(1, 1),
        padding=[(p, p), (p, p)],
        dimension_numbers=("NCHW", "OIHW", "NCHW"))             # (N, 1, H, W)
    sa = jax.nn.sigmoid(conv)
    return y * sa


# ---------------------------------- main ---------------------------------------
if __name__ == "__main__":
    key = jax.random.PRNGKey(0)
    kx, kp = jax.random.split(key)

    N, C, H, W = 2, 8, 16, 16
    K = 7
    x = jax.random.normal(kx, (N, C, H, W), jnp.float32)
    params = make_cbam_params(kp, C, K)

    out = cbam_forward(x, params, kernel_size=K)
    out = jax.block_until_ready(out)

    ref = _ref_cbam(x, params, kernel_size=K)
    assert out.shape == (N, C, H, W)
    err = float(jnp.max(jnp.abs(out - ref)))
    assert jnp.allclose(out, ref, atol=1e-4, rtol=1e-4), err

    print("KERNEL_OK")
</pallas_src>

<mosaic_0001>
module attributes {stable_mosaic.version = 11 : i64} {
  func.func @_cbam_kernel(%arg0: i32, %arg1: memref<1x8x256xf32, #tpu.memory_space<vmem>>, %arg2: memref<8x8xf32, #tpu.memory_space<vmem>>, %arg3: memref<8x1xf32, #tpu.memory_space<vmem>>, %arg4: memref<98xf32, #tpu.memory_space<smem>>, %arg5: memref<2x256xi32, #tpu.memory_space<vmem>>, %arg6: memref<1x8x256xf32, #tpu.memory_space<vmem>>) attributes {dimension_semantics = [#tpu.dimension_semantics<parallel>], iteration_bounds = array<i64: 2>, scalar_prefetch = 0 : i64, scratch_operands = 0 : i64, tpu.core_type = #tpu.core_type<tc>, window_params = [{transform_indices = @transform_0, window_bounds = array<i64: 1, 8, 256>}, {pipeline_mode = #tpu.pipeline_mode<synchronous>, transform_indices = @transform_1, window_bounds = array<i64: 8, 8>}, {pipeline_mode = #tpu.pipeline_mode<synchronous>, transform_indices = @transform_2, window_bounds = array<i64: 8, 1>}, {transform_indices = @transform_3, window_bounds = array<i64: 98>}, {pipeline_mode = #tpu.pipeline_mode<synchronous>, transform_indices = @transform_4, window_bounds = array<i64: 2, 256>}, {transform_indices = @transform_5, window_bounds = array<i64: 1, 8, 256>}]} {
    %c0 = arith.constant 0 : index
    %c0_0 = arith.constant 0 : index
    %c0_1 = arith.constant 0 : index
    %0 = vector.load %arg1[%c0, %c0_0, %c0_1] : memref<1x8x256xf32, #tpu.memory_space<vmem>>, vector<1x8x256xf32>
    %1 = vector.shape_cast %0 : vector<1x8x256xf32> to vector<8x256xf32>
    %cst = arith.constant dense<0.000000e+00> : vector<8xf32>
    %2 = vector.multi_reduction <add>, %1, %cst [1] : vector<8x256xf32> to vector<8xf32>
    %3 = vector.shape_cast %2 : vector<8xf32> to vector<8x1xf32>
    %cst_2 = arith.constant 3.906250e-03 : f32
    %4 = vector.broadcast %cst_2 : f32 to vector<8x1xf32>
    %5 = arith.mulf %3, %4 : vector<8x1xf32>
    %c0_3 = arith.constant 0 : index
    %c0_4 = arith.constant 0 : index
    %6 = vector.load %arg2[%c0_3, %c0_4] : memref<8x8xf32, #tpu.memory_space<vmem>>, vector<8x8xf32>
    %cst_5 = arith.constant dense<0.000000e+00> : vector<8x1xf32>
    %7 = tpu.matmul %6, %5, %cst_5 {dimension_numbers = #tpu.dot_dimension_numbers<[1], [0], [0], [1], [0, 0, 1, 1], [], []>} : vector<8x8xf32>, vector<8x1xf32>, vector<8x1xf32> -> vector<8x1xf32>
    %c0_6 = arith.constant 0 : index
    %c0_7 = arith.constant 0 : index
    %8 = vector.load %arg3[%c0_6, %c0_7] : memref<8x1xf32, #tpu.memory_space<vmem>>, vector<8x1xf32>
    %9 = arith.addf %7, %8 : vector<8x1xf32>
    %10 = arith.negf %9 : vector<8x1xf32>
    %11 = math.exp %10 : vector<8x1xf32>
    %cst_8 = arith.constant 1.000000e+00 : f32
    %12 = vector.broadcast %cst_8 : f32 to vector<8x1xf32>
    %13 = arith.addf %12, %11 : vector<8x1xf32>
    %14 = arith.divf %12, %13 : vector<8x1xf32>
    %15 = vector.broadcast %14 : vector<8x1xf32> to vector<8x256xf32>
    %16 = arith.mulf %1, %15 : vector<8x256xf32>
    %cst_9 = arith.constant dense<0.000000e+00> : vector<256xf32>
    %17 = vector.multi_reduction <add>, %16, %cst_9 [0] : vector<8x256xf32> to vector<256xf32>
    %18 = vector.shape_cast %17 : vector<256xf32> to vector<1x256xf32>
    %cst_10 = arith.constant 1.250000e-01 : f32
    %19 = vector.broadcast %cst_10 : f32 to vector<1x256xf32>
    %20 = arith.mulf %18, %19 : vector<1x256xf32>
    %cst_11 = arith.constant dense<0xFF800000> : vector<256xf32>
    %21 = vector.multi_reduction <maximumf>, %16, %cst_11 [0] : vector<8x256xf32> to vector<256xf32>
    %22 = vector.shape_cast %21 : vector<256xf32> to vector<1x256xf32>
    %c0_12 = arith.constant 0 : index
    %c0_13 = arith.constant 0 : index
    %23 = vector.load %arg5[%c0_12, %c0_13] : memref<2x256xi32, #tpu.memory_space<vmem>>, vector<1x256xi32>
    %c1 = arith.constant 1 : index
    %c0_14 = arith.constant 0 : index
    %24 = vector.load %arg5[%c1, %c0_14] : memref<2x256xi32, #tpu.memory_space<vmem>>, vector<1x256xi32>
    %c3_i32 = arith.constant 3 : i32
    %25 = vector.broadcast %c3_i32 : i32 to vector<1x256xi32>
    %26 = arith.cmpi sge, %23, %25 : vector<1x256xi32>
    %c19_i32 = arith.constant 19 : i32
    %27 = vector.broadcast %c19_i32 : i32 to vector<1x256xi32>
    %28 = arith.cmpi slt, %23, %27 : vector<1x256xi32>
    %29 = arith.andi %26, %28 : vector<1x256xi1>
    %c2_i32 = arith.constant 2 : i32
    %30 = vector.broadcast %c2_i32 : i32 to vector<1x256xi32>
    %31 = arith.cmpi sge, %23, %30 : vector<1x256xi32>
    %c18_i32 = arith.constant 18 : i32
    %32 = vector.broadcast %c18_i32 : i32 to vector<1x256xi32>
    %33 = arith.cmpi slt, %23, %32 : vector<1x256xi32>
    %34 = arith.andi %31, %33 : vector<1x256xi1>
    %c1_i32 = arith.constant 1 : i32
    %35 = vector.broadcast %c1_i32 : i32 to vector<1x256xi32>
    %36 = arith.cmpi sge, %23, %35 : vector<1x256xi32>
    %c17_i32 = arith.constant 17 : i32
    %37 = vector.broadcast %c17_i32 : i32 to vector<1x256xi32>
    %38 = arith.cmpi slt, %23, %37 : vector<1x256xi32>
    %39 = arith.andi %36, %38 : vector<1x256xi1>
    %c0_i32 = arith.constant 0 : i32
    %40 = vector.broadcast %c0_i32 : i32 to vector<1x256xi32>
    %41 = arith.cmpi sge, %23, %40 : vector<1x256xi32>
    %c16_i32 = arith.constant 16 : i32
    %42 = vector.broadcast %c16_i32 : i32 to vector<1x256xi32>
    %43 = arith.cmpi slt, %23, %42 : vector<1x256xi32>
    %44 = arith.andi %41, %43 : vector<1x256xi1>
    %c-1_i32 = arith.constant -1 : i32
    %45 = vector.broadcast %c-1_i32 : i32 to vector<1x256xi32>
    %46 = arith.cmpi sge, %23, %45 : vector<1x256xi32>
    %c15_i32 = arith.constant 15 : i32
    %47 = vector.broadcast %c15_i32 : i32 to vector<1x256xi32>
    %48 = arith.cmpi slt, %23, %47 : vector<1x256xi32>
    %49 = arith.andi %46, %48 : vector<1x256xi1>
    %c-2_i32 = arith.constant -2 : i32
    %50 = vector.broadcast %c-2_i32 : i32 to vector<1x256xi32>
    %51 = arith.cmpi sge, %23, %50 : vector<1x256xi32>
    %c14_i32 = arith.constant 14 : i32
    %52 = vector.broadcast %c14_i32 : i32 to vector<1x256xi32>
    %53 = arith.cmpi slt, %23, %52 : vector<1x256xi32>
    %54 = arith.andi %51, %53 : vector<1x256xi1>
    %c-3_i32 = arith.constant -3 : i32
    %55 = vector.broadcast %c-3_i32 : i32 to vector<1x256xi32>
    %56 = arith.cmpi sge, %23, %55 : vector<1x256xi32>
    %c13_i32 = arith.constant 13 : i32
    %57 = vector.broadcast %c13_i32 : i32 to vector<1x256xi32>
    %58 = arith.cmpi slt, %23, %57 : vector<1x256xi32>
    %59 = arith.andi %56, %58 : vector<1x256xi1>
    %c3_i32_15 = arith.constant 3 : i32
    %60 = vector.broadcast %c3_i32_15 : i32 to vector<1x256xi32>
    %61 = arith.cmpi sge, %24, %60 : vector<1x256xi32>
    %c19_i32_16 = arith.constant 19 : i32
    %62 = vector.broadcast %c19_i32_16 : i32 to vector<1x256xi32>
    %63 = arith.cmpi slt, %24, %62 : vector<1x256xi32>
    %64 = arith.andi %61, %63 : vector<1x256xi1>
    %c2_i32_17 = arith.constant 2 : i32
    %65 = vector.broadcast %c2_i32_17 : i32 to vector<1x256xi32>
    %66 = arith.cmpi sge, %24, %65 : vector<1x256xi32>
    %c18_i32_18 = arith.constant 18 : i32
    %67 = vector.broadcast %c18_i32_18 : i32 to vector<1x256xi32>
    %68 = arith.cmpi slt, %24, %67 : vector<1x256xi32>
    %69 = arith.andi %66, %68 : vector<1x256xi1>
    %c1_i32_19 = arith.constant 1 : i32
    %70 = vector.broadcast %c1_i32_19 : i32 to vector<1x256xi32>
    %71 = arith.cmpi sge, %24, %70 : vector<1x256xi32>
    %c17_i32_20 = arith.constant 17 : i32
    %72 = vector.broadcast %c17_i32_20 : i32 to vector<1x256xi32>
    %73 = arith.cmpi slt, %24, %72 : vector<1x256xi32>
    %74 = arith.andi %71, %73 : vector<1x256xi1>
    %c0_i32_21 = arith.constant 0 : i32
    %75 = vector.broadcast %c0_i32_21 : i32 to vector<1x256xi32>
    %76 = arith.cmpi sge, %24, %75 : vector<1x256xi32>
    %c16_i32_22 = arith.constant 16 : i32
    %77 = vector.broadcast %c16_i32_22 : i32 to vector<1x256xi32>
    %78 = arith.cmpi slt, %24, %77 : vector<1x256xi32>
    %79 = arith.andi %76, %78 : vector<1x256xi1>
    %c-1_i32_23 = arith.constant -1 : i32
    %80 = vector.broadcast %c-1_i32_23 : i32 to vector<1x256xi32>
    %81 = arith.cmpi sge, %24, %80 : vector<1x256xi32>
    %c15_i32_24 = arith.constant 15 : i32
    %82 = vector.broadcast %c15_i32_24 : i32 to vector<1x256xi32>
    %83 = arith.cmpi slt, %24, %82 : vector<1x256xi32>
    %84 = arith.andi %81, %83 : vector<1x256xi1>
    %c-2_i32_25 = arith.constant -2 : i32
    %85 = vector.broadcast %c-2_i32_25 : i32 to vector<1x256xi32>
    %86 = arith.cmpi sge, %24, %85 : vector<1x256xi32>
    %c14_i32_26 = arith.constant 14 : i32
    %87 = vector.broadcast %c14_i32_26 : i32 to vector<1x256xi32>
    %88 = arith.cmpi slt, %24, %87 : vector<1x256xi32>
    %89 = arith.andi %86, %88 : vector<1x256xi1>
    %c-3_i32_27 = arith.constant -3 : i32
    %90 = vector.broadcast %c-3_i32_27 : i32 to vector<1x256xi32>
    %91 = arith.cmpi sge, %24, %90 : vector<1x256xi32>
    %c13_i32_28 = arith.constant 13 : i32
    %92 = vector.broadcast %c13_i32_28 : i32 to vector<1x256xi32>
    %93 = arith.cmpi slt, %24, %92 : vector<1x256xi32>
    %94 = arith.andi %91, %93 : vector<1x256xi1>
    %cst_29 = arith.constant 0.000000e+00 : f32
    %95 = vector.broadcast %cst_29 : f32 to vector<1x256xf32>
    %c51_i32 = arith.constant 51 : i32
    %96 = tpu.dynamic_rotate %20 by %c51_i32 dim 1 : vector<1x256xf32>, i32 -> vector<1x256xf32>
    %c0_30 = arith.constant 0 : index
    %97 = memref.load %arg4[%c0_30] : memref<98xf32, #tpu.memory_space<smem>>
    %98 = arith.andi %29, %64 : vector<1x256xi1>
    %cst_31 = arith.constant 0.000000e+00 : f32
    %99 = vector.broadcast %cst_31 : f32 to vector<1x256xf32>
    %100 = arith.select %98, %96, %99 : vector<1x256xi1>, vector<1x256xf32>
    %101 = vector.broadcast %97 : f32 to vector<1x256xf32>
    %102 = arith.mulf %100, %101 : vector<1x256xf32>
    %103 = arith.addf %95, %102 : vector<1x256xf32>
    %c50_i32 = arith.constant 50 : i32
    %104 = tpu.dynamic_rotate %20 by %c50_i32 dim 1 : vector<1x256xf32>, i32 -> vector<1x256xf32>
    %c1_32 = arith.constant 1 : index
    %105 = memref.load %arg4[%c1_32] : memref<98xf32, #tpu.memory_space<smem>>
    %106 = arith.andi %29, %69 : vector<1x256xi1>
    %cst_33 = arith.constant 0.000000e+00 : f32
    %107 = vector.broadcast %cst_33 : f32 to vector<1x256xf32>
    %108 = arith.select %106, %104, %107 : vector<1x256xi1>, vector<1x256xf32>
    %109 = vector.broadcast %105 : f32 to vector<1x256xf32>
    %110 = arith.mulf %108, %109 : vector<1x256xf32>
    %111 = arith.addf %103, %110 : vector<1x256xf32>
    %c49_i32 = arith.constant 49 : i32
    %112 = tpu.dynamic_rotate %20 by %c49_i32 dim 1 : vector<1x256xf32>, i32 -> vector<1x256xf32>
    %c2 = arith.constant 2 : index
    %113 = memref.load %arg4[%c2] : memref<98xf32, #tpu.memory_space<smem>>
    %114 = arith.andi %29, %74 : vector<1x256xi1>
    %cst_34 = arith.constant 0.000000e+00 : f32
    %115 = vector.broadcast %cst_34 : f32 to vector<1x256xf32>
    %116 = arith.select %114, %112, %115 : vector<1x256xi1>, vector<1x256xf32>
    %117 = vector.broadcast %113 : f32 to vector<1x256xf32>
    %118 = arith.mulf %116, %117 : vector<1x256xf32>
    %119 = arith.addf %111, %118 : vector<1x256xf32>
    %c48_i32 = arith.constant 48 : i32
    %120 = tpu.dynamic_rotate %20 by %c48_i32 dim 1 : vector<1x256xf32>, i32 -> vector<1x256xf32>
    %c3 = arith.constant 3 : index
    %121 = memref.load %arg4[%c3] : memref<98xf32, #tpu.memory_space<smem>>
    %122 = arith.andi %29, %79 : vector<1x256xi1>
    %cst_35 = arith.constant 0.000000e+00 : f32
    %123 = vector.broadcast %cst_35 : f32 to vector<1x256xf32>
    %124 = arith.select %122, %120, %123 : vector<1x256xi1>, vector<1x256xf32>
    %125 = vector.broadcast %121 : f32 to vector<1x256xf32>
    %126 = arith.mulf %124, %125 : vector<1x256xf32>
    %127 = arith.addf %119, %126 : vector<1x256xf32>
    %c47_i32 = arith.constant 47 : i32
    %128 = tpu.dynamic_rotate %20 by %c47_i32 dim 1 : vector<1x256xf32>, i32 -> vector<1x256xf32>
    %c4 = arith.constant 4 : index
    %129 = memref.load %arg4[%c4] : memref<98xf32, #tpu.memory_space<smem>>
    %130 = arith.andi %29, %84 : vector<1x256xi1>
    %cst_36 = arith.constant 0.000000e+00 : f32
    %131 = vector.broadcast %cst_36 : f32 to vector<1x256xf32>
    %132 = arith.select %130, %128, %131 : vector<1x256xi1>, vector<1x256xf32>
    %133 = vector.broadcast %129 : f32 to vector<1x256xf32>
    %134 = arith.mulf %132, %133 : vector<1x256xf32>
    %135 = arith.addf %127, %134 : vector<1x256xf32>
    %c46_i32 = arith.constant 46 : i32
    %136 = tpu.dynamic_rotate %20 by %c46_i32 dim 1 : vector<1x256xf32>, i32 -> vector<1x256xf32>
    %c5 = arith.constant 5 : index
    %137 = memref.load %arg4[%c5] : memref<98xf32, #tpu.memory_space<smem>>
    %138 = arith.andi %29, %89 : vector<1x256xi1>
    %cst_37 = arith.constant 0.000000e+00 : f32
    %139 = vector.broadcast %cst_37 : f32 to vector<1x256xf32>
    %140 = arith.select %138, %136, %139 : vector<1x256xi1>, vector<1x256xf32>
    %141 = vector.broadcast %137 : f32 to vector<1x256xf32>
    %142 = arith.mulf %140, %141 : vector<1x256xf32>
    %143 = arith.addf %135, %142 : vector<1x256xf32>
    %c45_i32 = arith.constant 45 : i32
    %144 = tpu.dynamic_rotate %20 by %c45_i32 dim 1 : vector<1x256xf32>, i32 -> vector<1x256xf32>
    %c6 = arith.constant 6 : index
    %145 = memref.load %arg4[%c6] : memref<98xf32, #tpu.memory_space<smem>>
    %146 = arith.andi %29, %94 : vector<1x256xi1>
    %cst_38 = arith.constant 0.000000e+00 : f32
    %147 = vector.broadcast %cst_38 : f32 to vector<1x256xf32>
    %148 = arith.select %146, %144, %147 : vector<1x256xi1>, vector<1x256xf32>
    %149 = vector.broadcast %145 : f32 to vector<1x256xf32>
    %150 = arith.mulf %148, %149 : vector<1x256xf32>
    %151 = arith.addf %143, %150 : vector<1x256xf32>
    %c35_i32 = arith.constant 35 : i32
    %152 = tpu.dynamic_rotate %20 by %c35_i32 dim 1 : vector<1x256xf32>, i32 -> vector<1x256xf32>
    %c7 = arith.constant 7 : index
    %153 = memref.load %arg4[%c7] : memref<98xf32, #tpu.memory_space<smem>>
    %154 = arith.andi %34, %64 : vector<1x256xi1>
    %cst_39 = arith.constant 0.000000e+00 : f32
    %155 = vector.broadcast %cst_39 : f32 to vector<1x256xf32>
    %156 = arith.select %154, %152, %155 : vector<1x256xi1>, vector<1x256xf32>
    %157 = vector.broadcast %153 : f32 to vector<1x256xf32>
    %158 = arith.mulf %156, %157 : vector<1x256xf32>
    %159 = arith.addf %151, %158 : vector<1x256xf32>
    %c34_i32 = arith.constant 34 : i32
    %160 = tpu.dynamic_rotate %20 by %c34_i32 dim 1 : vector<1x256xf32>, i32 -> vector<1x256xf32>
    %c8 = arith.constant 8 : index
    %161 = memref.load %arg4[%c8] : memref<98xf32, #tpu.memory_space<smem>>
    %162 = arith.andi %34, %69 : vector<1x256xi1>
    %cst_40 = arith.constant 0.000000e+00 : f32
    %163 = vector.broadcast %cst_40 : f32 to vector<1x256xf32>
    %164 = arith.select %162, %160, %163 : vector<1x256xi1>, vector<1x256xf32>
    %165 = vector.broadcast %161 : f32 to vector<1x256xf32>
    %166 = arith.mulf %164, %165 : vector<1x256xf32>
    %167 = arith.addf %159, %166 : vector<1x256xf32>
    %c33_i32 = arith.constant 33 : i32
    %168 = tpu.dynamic_rotate %20 by %c33_i32 dim 1 : vector<1x256xf32>, i32 -> vector<1x256xf32>
    %c9 = arith.constant 9 : index
    %169 = memref.load %arg4[%c9] : memref<98xf32, #tpu.memory_space<smem>>
    %170 = arith.andi %34, %74 : vector<1x256xi1>
    %cst_41 = arith.constant 0.000000e+00 : f32
    %171 = vector.broadcast %cst_41 : f32 to vector<1x256xf32>
    %172 = arith.select %170, %168, %171 : vector<1x256xi1>, vector<1x256xf32>
    %173 = vector.broadcast %169 : f32 to vector<1x256xf32>
    %174 = arith.mulf %172, %173 : vector<1x256xf32>
    %175 = arith.addf %167, %174 : vector<1x256xf32>
    %c32_i32 = arith.constant 32 : i32
    %176 = tpu.dynamic_rotate %20 by %c32_i32 dim 1 : vector<1x256xf32>, i32 -> vector<1x256xf32>
    %c10 = arith.constant 10 : index
    %177 = memref.load %arg4[%c10] : memref<98xf32, #tpu.memory_space<smem>>
    %178 = arith.andi %34, %79 : vector<1x256xi1>
    %cst_42 = arith.constant 0.000000e+00 : f32
    %179 = vector.broadcast %cst_42 : f32 to vector<1x256xf32>
    %180 = arith.select %178, %176, %179 : vector<1x256xi1>, vector<1x256xf32>
    %181 = vector.broadcast %177 : f32 to vector<1x256xf32>
    %182 = arith.mulf %180, %181 : vector<1x256xf32>
    %183 = arith.addf %175, %182 : vector<1x256xf32>
    %c31_i32 = arith.constant 31 : i32
    %184 = tpu.dynamic_rotate %20 by %c31_i32 dim 1 : vector<1x256xf32>, i32 -> vector<1x256xf32>
    %c11 = arith.constant 11 : index
    %185 = memref.load %arg4[%c11] : memref<98xf32, #tpu.memory_space<smem>>
    %186 = arith.andi %34, %84 : vector<1x256xi1>
    %cst_43 = arith.constant 0.000000e+00 : f32
    %187 = vector.broadcast %cst_43 : f32 to vector<1x256xf32>
    %188 = arith.select %186, %184, %187 : vector<1x256xi1>, vector<1x256xf32>
    %189 = vector.broadcast %185 : f32 to vector<1x256xf32>
    %190 = arith.mulf %188, %189 : vector<1x256xf32>
    %191 = arith.addf %183, %190 : vector<1x256xf32>
    %c30_i32 = arith.constant 30 : i32
    %192 = tpu.dynamic_rotate %20 by %c30_i32 dim 1 : vector<1x256xf32>, i32 -> vector<1x256xf32>
    %c12 = arith.constant 12 : index
    %193 = memref.load %arg4[%c12] : memref<98xf32, #tpu.memory_space<smem>>
    %194 = arith.andi %34, %89 : vector<1x256xi1>
    %cst_44 = arith.constant 0.000000e+00 : f32
    %195 = vector.broadcast %cst_44 : f32 to vector<1x256xf32>
    %196 = arith.select %194, %192, %195 : vector<1x256xi1>, vector<1x256xf32>
    %197 = vector.broadcast %193 : f32 to vector<1x256xf32>
    %198 = arith.mulf %196, %197 : vector<1x256xf32>
    %199 = arith.addf %191, %198 : vector<1x256xf32>
    %c29_i32 = arith.constant 29 : i32
    %200 = tpu.dynamic_rotate %20 by %c29_i32 dim 1 : vector<1x256xf32>, i32 -> vector<1x256xf32>
    %c13 = arith.constant 13 : index
    %201 = memref.load %arg4[%c13] : memref<98xf32, #tpu.memory_space<smem>>
    %202 = arith.andi %34, %94 : vector<1x256xi1>
    %cst_45 = arith.constant 0.000000e+00 : f32
    %203 = vector.broadcast %cst_45 : f32 to vector<1x256xf32>
    %204 = arith.select %202, %200, %203 : vector<1x256xi1>, vector<1x256xf32>
    %205 = vector.broadcast %201 : f32 to vector<1x256xf32>
    %206 = arith.mulf %204, %205 : vector<1x256xf32>
    %207 = arith.addf %199, %206 : vector<1x256xf32>
    %c19_i32_46 = arith.constant 19 : i32
    %208 = tpu.dynamic_rotate %20 by %c19_i32_46 dim 1 : vector<1x256xf32>, i32 -> vector<1x256xf32>
    %c14 = arith.constant 14 : index
    %209 = memref.load %arg4[%c14] : memref<98xf32, #tpu.memory_space<smem>>
    %210 = arith.andi %39, %64 : vector<1x256xi1>
    %cst_47 = arith.constant 0.000000e+00 : f32
    %211 = vector.broadcast %cst_47 : f32 to vector<1x256xf32>
    %212 = arith.select %210, %208, %211 : vector<1x256xi1>, vector<1x256xf32>
    %213 = vector.broadcast %209 : f32 to vector<1x256xf32>
    %214 = arith.mulf %212, %213 : vector<1x256xf32>
    %215 = arith.addf %207, %214 : vector<1x256xf32>
    %c18_i32_48 = arith.constant 18 : i32
    %216 = tpu.dynamic_rotate %20 by %c18_i32_48 dim 1 : vector<1x256xf32>, i32 -> vector<1x256xf32>
    %c15 = arith.constant 15 : index
    %217 = memref.load %arg4[%c15] : memref<98xf32, #tpu.memory_space<smem>>
    %218 = arith.andi %39, %69 : vector<1x256xi1>
    %cst_49 = arith.constant 0.000000e+00 : f32
    %219 = vector.broadcast %cst_49 : f32 to vector<1x256xf32>
    %220 = arith.select %218, %216, %219 : vector<1x256xi1>, vector<1x256xf32>
    %221 = vector.broadcast %217 : f32 to vector<1x256xf32>
    %222 = arith.mulf %220, %221 : vector<1x256xf32>
    %223 = arith.addf %215, %222 : vector<1x256xf32>
    %c17_i32_50 = arith.constant 17 : i32
    %224 = tpu.dynamic_rotate %20 by %c17_i32_50 dim 1 : vector<1x256xf32>, i32 -> vector<1x256xf32>
    %c16 = arith.constant 16 : index
    %225 = memref.load %arg4[%c16] : memref<98xf32, #tpu.memory_space<smem>>
    %226 = arith.andi %39, %74 : vector<1x256xi1>
    %cst_51 = arith.constant 0.000000e+00 : f32
    %227 = vector.broadcast %cst_51 : f32 to vector<1x256xf32>
    %228 = arith.select %226, %224, %227 : vector<1x256xi1>, vector<1x256xf32>
    %229 = vector.broadcast %225 : f32 to vector<1x256xf32>
    %230 = arith.mulf %228, %229 : vector<1x256xf32>
    %231 = arith.addf %223, %230 : vector<1x256xf32>
    %c16_i32_52 = arith.constant 16 : i32
    %232 = tpu.dynamic_rotate %20 by %c16_i32_52 dim 1 : vector<1x256xf32>, i32 -> vector<1x256xf32>
    %c17 = arith.constant 17 : index
    %233 = memref.load %arg4[%c17] : memref<98xf32, #tpu.memory_space<smem>>
    %234 = arith.andi %39, %79 : vector<1x256xi1>
    %cst_53 = arith.constant 0.000000e+00 : f32
    %235 = vector.broadcast %cst_53 : f32 to vector<1x256xf32>
    %236 = arith.select %234, %232, %235 : vector<1x256xi1>, vector<1x256xf32>
    %237 = vector.broadcast %233 : f32 to vector<1x256xf32>
    %238 = arith.mulf %236, %237 : vector<1x256xf32>
    %239 = arith.addf %231, %238 : vector<1x256xf32>
    %c15_i32_54 = arith.constant 15 : i32
    %240 = tpu.dynamic_rotate %20 by %c15_i32_54 dim 1 : vector<1x256xf32>, i32 -> vector<1x256xf32>
    %c18 = arith.constant 18 : index
    %241 = memref.load %arg4[%c18] : memref<98xf32, #tpu.memory_space<smem>>
    %242 = arith.andi %39, %84 : vector<1x256xi1>
    %cst_55 = arith.constant 0.000000e+00 : f32
    %243 = vector.broadcast %cst_55 : f32 to vector<1x256xf32>
    %244 = arith.select %242, %240, %243 : vector<1x256xi1>, vector<1x256xf32>
    %245 = vector.broadcast %241 : f32 to vector<1x256xf32>
    %246 = arith.mulf %244, %245 : vector<1x256xf32>
    %247 = arith.addf %239, %246 : vector<1x256xf32>
    %c14_i32_56 = arith.constant 14 : i32
    %248 = tpu.dynamic_rotate %20 by %c14_i32_56 dim 1 : vector<1x256xf32>, i32 -> vector<1x256xf32>
    %c19 = arith.constant 19 : index
    %249 = memref.load %arg4[%c19] : memref<98xf32, #tpu.memory_space<smem>>
    %250 = arith.andi %39, %89 : vector<1x256xi1>
    %cst_57 = arith.constant 0.000000e+00 : f32
    %251 = vector.broadcast %cst_57 : f32 to vector<1x256xf32>
    %252 = arith.select %250, %248, %251 : vector<1x256xi1>, vector<1x256xf32>
    %253 = vector.broadcast %249 : f32 to vector<1x256xf32>
    %254 = arith.mulf %252, %253 : vector<1x256xf32>
    %255 = arith.addf %247, %254 : vector<1x256xf32>
    %c13_i32_58 = arith.constant 13 : i32
    %256 = tpu.dynamic_rotate %20 by %c13_i32_58 dim 1 : vector<1x256xf32>, i32 -> vector<1x256xf32>
    %c20 = arith.constant 20 : index
    %257 = memref.load %arg4[%c20] : memref<98xf32, #tpu.memory_space<smem>>
    %258 = arith.andi %39, %94 : vector<1x256xi1>
    %cst_59 = arith.constant 0.000000e+00 : f32
    %259 = vector.broadcast %cst_59 : f32 to vector<1x256xf32>
    %260 = arith.select %258, %256, %259 : vector<1x256xi1>, vector<1x256xf32>
    %261 = vector.broadcast %257 : f32 to vector<1x256xf32>
    %262 = arith.mulf %260, %261 : vector<1x256xf32>
    %263 = arith.addf %255, %262 : vector<1x256xf32>
    %c3_i32_60 = arith.constant 3 : i32
    %264 = tpu.dynamic_rotate %20 by %c3_i32_60 dim 1 : vector<1x256xf32>, i32 -> vector<1x256xf32>
    %c21 = arith.constant 21 : index
    %265 = memref.load %arg4[%c21] : memref<98xf32, #tpu.memory_space<smem>>
    %266 = arith.andi %44, %64 : vector<1x256xi1>
    %cst_61 = arith.constant 0.000000e+00 : f32
    %267 = vector.broadcast %cst_61 : f32 to vector<1x256xf32>
    %268 = arith.select %266, %264, %267 : vector<1x256xi1>, vector<1x256xf32>
    %269 = vector.broadcast %265 : f32 to vector<1x256xf32>
    %270 = arith.mulf %268, %269 : vector<1x256xf32>
    %271 = arith.addf %263, %270 : vector<1x256xf32>
    %c2_i32_62 = arith.constant 2 : i32
    %272 = tpu.dynamic_rotate %20 by %c2_i32_62 dim 1 : vector<1x256xf32>, i32 -> vector<1x256xf32>
    %c22 = arith.constant 22 : index
    %273 = memref.load %arg4[%c22] : memref<98xf32, #tpu.memory_space<smem>>
    %274 = arith.andi %44, %69 : vector<1x256xi1>
    %cst_63 = arith.constant 0.000000e+00 : f32
    %275 = vector.broadcast %cst_63 : f32 to vector<1x256xf32>
    %276 = arith.select %274, %272, %275 : vector<1x256xi1>, vector<1x256xf32>
    %277 = vector.broadcast %273 : f32 to vector<1x256xf32>
    %278 = arith.mulf %276, %277 : vector<1x256xf32>
    %279 = arith.addf %271, %278 : vector<1x256xf32>
    %c1_i32_64 = arith.constant 1 : i32
    %280 = tpu.dynamic_rotate %20 by %c1_i32_64 dim 1 : vector<1x256xf32>, i32 -> vector<1x256xf32>
    %c23 = arith.constant 23 : index
    %281 = memref.load %arg4[%c23] : memref<98xf32, #tpu.memory_space<smem>>
    %282 = arith.andi %44, %74 : vector<1x256xi1>
    %cst_65 = arith.constant 0.000000e+00 : f32
    %283 = vector.broadcast %cst_65 : f32 to vector<1x256xf32>
    %284 = arith.select %282, %280, %283 : vector<1x256xi1>, vector<1x256xf32>
    %285 = vector.broadcast %281 : f32 to vector<1x256xf32>
    %286 = arith.mulf %284, %285 : vector<1x256xf32>
    %287 = arith.addf %279, %286 : vector<1x256xf32>
    %c24 = arith.constant 24 : index
    %288 = memref.load %arg4[%c24] : memref<98xf32, #tpu.memory_space<smem>>
    %289 = arith.andi %44, %79 : vector<1x256xi1>
    %cst_66 = arith.constant 0.000000e+00 : f32
    %290 = vector.broadcast %cst_66 : f32 to vector<1x256xf32>
    %291 = arith.select %289, %20, %290 : vector<1x256xi1>, vector<1x256xf32>
    %292 = vector.broadcast %288 : f32 to vector<1x256xf32>
    %293 = arith.mulf %291, %292 : vector<1x256xf32>
    %294 = arith.addf %287, %293 : vector<1x256xf32>
    %c255_i32 = arith.constant 255 : i32
    %295 = tpu.dynamic_rotate %20 by %c255_i32 dim 1 : vector<1x256xf32>, i32 -> vector<1x256xf32>
    %c25 = arith.constant 25 : index
    %296 = memref.load %arg4[%c25] : memref<98xf32, #tpu.memory_space<smem>>
    %297 = arith.andi %44, %84 : vector<1x256xi1>
    %cst_67 = arith.constant 0.000000e+00 : f32
    %298 = vector.broadcast %cst_67 : f32 to vector<1x256xf32>
    %299 = arith.select %297, %295, %298 : vector<1x256xi1>, vector<1x256xf32>
    %300 = vector.broadcast %296 : f32 to vector<1x256xf32>
    %301 = arith.mulf %299, %300 : vector<1x256xf32>
    %302 = arith.addf %294, %301 : vector<1x256xf32>
    %c254_i32 = arith.constant 254 : i32
    %303 = tpu.dynamic_rotate %20 by %c254_i32 dim 1 : vector<1x256xf32>, i32 -> vector<1x256xf32>
    %c26 = arith.constant 26 : index
    %304 = memref.load %arg4[%c26] : memref<98xf32, #tpu.memory_space<smem>>
    %305 = arith.andi %44, %89 : vector<1x256xi1>
    %cst_68 = arith.constant 0.000000e+00 : f32
    %306 = vector.broadcast %cst_68 : f32 to vector<1x256xf32>
    %307 = arith.select %305, %303, %306 : vector<1x256xi1>, vector<1x256xf32>
    %308 = vector.broadcast %304 : f32 to vector<1x256xf32>
    %309 = arith.mulf %307, %308 : vector<1x256xf32>
    %310 = arith.addf %302, %309 : vector<1x256xf32>
    %c253_i32 = arith.constant 253 : i32
    %311 = tpu.dynamic_rotate %20 by %c253_i32 dim 1 : vector<1x256xf32>, i32 -> vector<1x256xf32>
    %c27 = arith.constant 27 : index
    %312 = memref.load %arg4[%c27] : memref<98xf32, #tpu.memory_space<smem>>
    %313 = arith.andi %44, %94 : vector<1x256xi1>
    %cst_69 = arith.constant 0.000000e+00 : f32
    %314 = vector.broadcast %cst_69 : f32 to vector<1x256xf32>
    %315 = arith.select %313, %311, %314 : vector<1x256xi1>, vector<1x256xf32>
    %316 = vector.broadcast %312 : f32 to vector<1x256xf32>
    %317 = arith.mulf %315, %316 : vector<1x256xf32>
    %318 = arith.addf %310, %317 : vector<1x256xf32>
    %c243_i32 = arith.constant 243 : i32
    %319 = tpu.dynamic_rotate %20 by %c243_i32 dim 1 : vector<1x256xf32>, i32 -> vector<1x256xf32>
    %c28 = arith.constant 28 : index
    %320 = memref.load %arg4[%c28] : memref<98xf32, #tpu.memory_space<smem>>
    %321 = arith.andi %49, %64 : vector<1x256xi1>
    %cst_70 = arith.constant 0.000000e+00 : f32
    %322 = vector.broadcast %cst_70 : f32 to vector<1x256xf32>
    %323 = arith.select %321, %319, %322 : vector<1x256xi1>, vector<1x256xf32>
    %324 = vector.broadcast %320 : f32 to vector<1x256xf32>
    %325 = arith.mulf %323, %324 : vector<1x256xf32>
    %326 = arith.addf %318, %325 : vector<1x256xf32>
    %c242_i32 = arith.constant 242 : i32
    %327 = tpu.dynamic_rotate %20 by %c242_i32 dim 1 : vector<1x256xf32>, i32 -> vector<1x256xf32>
    %c29 = arith.constant 29 : index
    %328 = memref.load %arg4[%c29] : memref<98xf32, #tpu.memory_space<smem>>
    %329 = arith.andi %49, %69 : vector<1x256xi1>
    %cst_71 = arith.constant 0.000000e+00 : f32
    %330 = vector.broadcast %cst_71 : f32 to vector<1x256xf32>
    %331 = arith.select %329, %327, %330 : vector<1x256xi1>, vector<1x256xf32>
    %332 = vector.broadcast %328 : f32 to vector<1x256xf32>
    %333 = arith.mulf %331, %332 : vector<1x256xf32>
    %334 = arith.addf %326, %333 : vector<1x256xf32>
    %c241_i32 = arith.constant 241 : i32
    %335 = tpu.dynamic_rotate %20 by %c241_i32 dim 1 : vector<1x256xf32>, i32 -> vector<1x256xf32>
    %c30 = arith.constant 30 : index
    %336 = memref.load %arg4[%c30] : memref<98xf32, #tpu.memory_space<smem>>
    %337 = arith.andi %49, %74 : vector<1x256xi1>
    %cst_72 = arith.constant 0.000000e+00 : f32
    %338 = vector.broadcast %cst_72 : f32 to vector<1x256xf32>
    %339 = arith.select %337, %335, %338 : vector<1x256xi1>, vector<1x256xf32>
    %340 = vector.broadcast %336 : f32 to vector<1x256xf32>
    %341 = arith.mulf %339, %340 : vector<1x256xf32>
    %342 = arith.addf %334, %341 : vector<1x256xf32>
    %c240_i32 = arith.constant 240 : i32
    %343 = tpu.dynamic_rotate %20 by %c240_i32 dim 1 : vector<1x256xf32>, i32 -> vector<1x256xf32>
    %c31 = arith.constant 31 : index
    %344 = memref.load %arg4[%c31] : memref<98xf32, #tpu.memory_space<smem>>
    %345 = arith.andi %49, %79 : vector<1x256xi1>
    %cst_73 = arith.constant 0.000000e+00 : f32
    %346 = vector.broadcast %cst_73 : f32 to vector<1x256xf32>
    %347 = arith.select %345, %343, %346 : vector<1x256xi1>, vector<1x256xf32>
    %348 = vector.broadcast %344 : f32 to vector<1x256xf32>
    %349 = arith.mulf %347, %348 : vector<1x256xf32>
    %350 = arith.addf %342, %349 : vector<1x256xf32>
    %c239_i32 = arith.constant 239 : i32
    %351 = tpu.dynamic_rotate %20 by %c239_i32 dim 1 : vector<1x256xf32>, i32 -> vector<1x256xf32>
    %c32 = arith.constant 32 : index
    %352 = memref.load %arg4[%c32] : memref<98xf32, #tpu.memory_space<smem>>
    %353 = arith.andi %49, %84 : vector<1x256xi1>
    %cst_74 = arith.constant 0.000000e+00 : f32
    %354 = vector.broadcast %cst_74 : f32 to vector<1x256xf32>
    %355 = arith.select %353, %351, %354 : vector<1x256xi1>, vector<1x256xf32>
    %356 = vector.broadcast %352 : f32 to vector<1x256xf32>
    %357 = arith.mulf %355, %356 : vector<1x256xf32>
    %358 = arith.addf %350, %357 : vector<1x256xf32>
    %c238_i32 = arith.constant 238 : i32
    %359 = tpu.dynamic_rotate %20 by %c238_i32 dim 1 : vector<1x256xf32>, i32 -> vector<1x256xf32>
    %c33 = arith.constant 33 : index
    %360 = memref.load %arg4[%c33] : memref<98xf32, #tpu.memory_space<smem>>
    %361 = arith.andi %49, %89 : vector<1x256xi1>
    %cst_75 = arith.constant 0.000000e+00 : f32
    %362 = vector.broadcast %cst_75 : f32 to vector<1x256xf32>
    %363 = arith.select %361, %359, %362 : vector<1x256xi1>, vector<1x256xf32>
    %364 = vector.broadcast %360 : f32 to vector<1x256xf32>
    %365 = arith.mulf %363, %364 : vector<1x256xf32>
    %366 = arith.addf %358, %365 : vector<1x256xf32>
    %c237_i32 = arith.constant 237 : i32
    %367 = tpu.dynamic_rotate %20 by %c237_i32 dim 1 : vector<1x256xf32>, i32 -> vector<1x256xf32>
    %c34 = arith.constant 34 : index
    %368 = memref.load %arg4[%c34] : memref<98xf32, #tpu.memory_space<smem>>
    %369 = arith.andi %49, %94 : vector<1x256xi1>
    %cst_76 = arith.constant 0.000000e+00 : f32
    %370 = vector.broadcast %cst_76 : f32 to vector<1x256xf32>
    %371 = arith.select %369, %367, %370 : vector<1x256xi1>, vector<1x256xf32>
    %372 = vector.broadcast %368 : f32 to vector<1x256xf32>
    %373 = arith.mulf %371, %372 : vector<1x256xf32>
    %374 = arith.addf %366, %373 : vector<1x256xf32>
    %c227_i32 = arith.constant 227 : i32
    %375 = tpu.dynamic_rotate %20 by %c227_i32 dim 1 : vector<1x256xf32>, i32 -> vector<1x256xf32>
    %c35 = arith.constant 35 : index
    %376 = memref.load %arg4[%c35] : memref<98xf32, #tpu.memory_space<smem>>
    %377 = arith.andi %54, %64 : vector<1x256xi1>
    %cst_77 = arith.constant 0.000000e+00 : f32
    %378 = vector.broadcast %cst_77 : f32 to vector<1x256xf32>
    %379 = arith.select %377, %375, %378 : vector<1x256xi1>, vector<1x256xf32>
    %380 = vector.broadcast %376 : f32 to vector<1x256xf32>
    %381 = arith.mulf %379, %380 : vector<1x256xf32>
    %382 = arith.addf %374, %381 : vector<1x256xf32>
    %c226_i32 = arith.constant 226 : i32
    %383 = tpu.dynamic_rotate %20 by %c226_i32 dim 1 : vector<1x256xf32>, i32 -> vector<1x256xf32>
    %c36 = arith.constant 36 : index
    %384 = memref.load %arg4[%c36] : memref<98xf32, #tpu.memory_space<smem>>
    %385 = arith.andi %54, %69 : vector<1x256xi1>
    %cst_78 = arith.constant 0.000000e+00 : f32
    %386 = vector.broadcast %cst_78 : f32 to vector<1x256xf32>
    %387 = arith.select %385, %383, %386 : vector<1x256xi1>, vector<1x256xf32>
    %388 = vector.broadcast %384 : f32 to vector<1x256xf32>
    %389 = arith.mulf %387, %388 : vector<1x256xf32>
    %390 = arith.addf %382, %389 : vector<1x256xf32>
    %c225_i32 = arith.constant 225 : i32
    %391 = tpu.dynamic_rotate %20 by %c225_i32 dim 1 : vector<1x256xf32>, i32 -> vector<1x256xf32>
    %c37 = arith.constant 37 : index
    %392 = memref.load %arg4[%c37] : memref<98xf32, #tpu.memory_space<smem>>
    %393 = arith.andi %54, %74 : vector<1x256xi1>
    %cst_79 = arith.constant 0.000000e+00 : f32
    %394 = vector.broadcast %cst_79 : f32 to vector<1x256xf32>
    %395 = arith.select %393, %391, %394 : vector<1x256xi1>, vector<1x256xf32>
    %396 = vector.broadcast %392 : f32 to vector<1x256xf32>
    %397 = arith.mulf %395, %396 : vector<1x256xf32>
    %398 = arith.addf %390, %397 : vector<1x256xf32>
    %c224_i32 = arith.constant 224 : i32
    %399 = tpu.dynamic_rotate %20 by %c224_i32 dim 1 : vector<1x256xf32>, i32 -> vector<1x256xf32>
    %c38 = arith.constant 38 : index
    %400 = memref.load %arg4[%c38] : memref<98xf32, #tpu.memory_space<smem>>
    %401 = arith.andi %54, %79 : vector<1x256xi1>
    %cst_80 = arith.constant 0.000000e+00 : f32
    %402 = vector.broadcast %cst_80 : f32 to vector<1x256xf32>
    %403 = arith.select %401, %399, %402 : vector<1x256xi1>, vector<1x256xf32>
    %404 = vector.broadcast %400 : f32 to vector<1x256xf32>
    %405 = arith.mulf %403, %404 : vector<1x256xf32>
    %406 = arith.addf %398, %405 : vector<1x256xf32>
    %c223_i32 = arith.constant 223 : i32
    %407 = tpu.dynamic_rotate %20 by %c223_i32 dim 1 : vector<1x256xf32>, i32 -> vector<1x256xf32>
    %c39 = arith.constant 39 : index
    %408 = memref.load %arg4[%c39] : memref<98xf32, #tpu.memory_space<smem>>
    %409 = arith.andi %54, %84 : vector<1x256xi1>
    %cst_81 = arith.constant 0.000000e+00 : f32
    %410 = vector.broadcast %cst_81 : f32 to vector<1x256xf32>
    %411 = arith.select %409, %407, %410 : vector<1x256xi1>, vector<1x256xf32>
    %412 = vector.broadcast %408 : f32 to vector<1x256xf32>
    %413 = arith.mulf %411, %412 : vector<1x256xf32>
    %414 = arith.addf %406, %413 : vector<1x256xf32>
    %c222_i32 = arith.constant 222 : i32
    %415 = tpu.dynamic_rotate %20 by %c222_i32 dim 1 : vector<1x256xf32>, i32 -> vector<1x256xf32>
    %c40 = arith.constant 40 : index
    %416 = memref.load %arg4[%c40] : memref<98xf32, #tpu.memory_space<smem>>
    %417 = arith.andi %54, %89 : vector<1x256xi1>
    %cst_82 = arith.constant 0.000000e+00 : f32
    %418 = vector.broadcast %cst_82 : f32 to vector<1x256xf32>
    %419 = arith.select %417, %415, %418 : vector<1x256xi1>, vector<1x256xf32>
    %420 = vector.broadcast %416 : f32 to vector<1x256xf32>
    %421 = arith.mulf %419, %420 : vector<1x256xf32>
    %422 = arith.addf %414, %421 : vector<1x256xf32>
    %c221_i32 = arith.constant 221 : i32
    %423 = tpu.dynamic_rotate %20 by %c221_i32 dim 1 : vector<1x256xf32>, i32 -> vector<1x256xf32>
    %c41 = arith.constant 41 : index
    %424 = memref.load %arg4[%c41] : memref<98xf32, #tpu.memory_space<smem>>
    %425 = arith.andi %54, %94 : vector<1x256xi1>
    %cst_83 = arith.constant 0.000000e+00 : f32
    %426 = vector.broadcast %cst_83 : f32 to vector<1x256xf32>
    %427 = arith.select %425, %423, %426 : vector<1x256xi1>, vector<1x256xf32>
    %428 = vector.broadcast %424 : f32 to vector<1x256xf32>
    %429 = arith.mulf %427, %428 : vector<1x256xf32>
    %430 = arith.addf %422, %429 : vector<1x256xf32>
    %c211_i32 = arith.constant 211 : i32
    %431 = tpu.dynamic_rotate %20 by %c211_i32 dim 1 : vector<1x256xf32>, i32 -> vector<1x256xf32>
    %c42 = arith.constant 42 : index
    %432 = memref.load %arg4[%c42] : memref<98xf32, #tpu.memory_space<smem>>
    %433 = arith.andi %59, %64 : vector<1x256xi1>
    %cst_84 = arith.constant 0.000000e+00 : f32
    %434 = vector.broadcast %cst_84 : f32 to vector<1x256xf32>
    %435 = arith.select %433, %431, %434 : vector<1x256xi1>, vector<1x256xf32>
    %436 = vector.broadcast %432 : f32 to vector<1x256xf32>
    %437 = arith.mulf %435, %436 : vector<1x256xf32>
    %438 = arith.addf %430, %437 : vector<1x256xf32>
    %c210_i32 = arith.constant 210 : i32
    %439 = tpu.dynamic_rotate %20 by %c210_i32 dim 1 : vector<1x256xf32>, i32 -> vector<1x256xf32>
    %c43 = arith.constant 43 : index
    %440 = memref.load %arg4[%c43] : memref<98xf32, #tpu.memory_space<smem>>
    %441 = arith.andi %59, %69 : vector<1x256xi1>
    %cst_85 = arith.constant 0.000000e+00 : f32
    %442 = vector.broadcast %cst_85 : f32 to vector<1x256xf32>
    %443 = arith.select %441, %439, %442 : vector<1x256xi1>, vector<1x256xf32>
    %444 = vector.broadcast %440 : f32 to vector<1x256xf32>
    %445 = arith.mulf %443, %444 : vector<1x256xf32>
    %446 = arith.addf %438, %445 : vector<1x256xf32>
    %c209_i32 = arith.constant 209 : i32
    %447 = tpu.dynamic_rotate %20 by %c209_i32 dim 1 : vector<1x256xf32>, i32 -> vector<1x256xf32>
    %c44 = arith.constant 44 : index
    %448 = memref.load %arg4[%c44] : memref<98xf32, #tpu.memory_space<smem>>
    %449 = arith.andi %59, %74 : vector<1x256xi1>
    %cst_86 = arith.constant 0.000000e+00 : f32
    %450 = vector.broadcast %cst_86 : f32 to vector<1x256xf32>
    %451 = arith.select %449, %447, %450 : vector<1x256xi1>, vector<1x256xf32>
    %452 = vector.broadcast %448 : f32 to vector<1x256xf32>
    %453 = arith.mulf %451, %452 : vector<1x256xf32>
    %454 = arith.addf %446, %453 : vector<1x256xf32>
    %c208_i32 = arith.constant 208 : i32
    %455 = tpu.dynamic_rotate %20 by %c208_i32 dim 1 : vector<1x256xf32>, i32 -> vector<1x256xf32>
    %c45 = arith.constant 45 : index
    %456 = memref.load %arg4[%c45] : memref<98xf32, #tpu.memory_space<smem>>
    %457 = arith.andi %59, %79 : vector<1x256xi1>
    %cst_87 = arith.constant 0.000000e+00 : f32
    %458 = vector.broadcast %cst_87 : f32 to vector<1x256xf32>
    %459 = arith.select %457, %455, %458 : vector<1x256xi1>, vector<1x256xf32>
    %460 = vector.broadcast %456 : f32 to vector<1x256xf32>
    %461 = arith.mulf %459, %460 : vector<1x256xf32>
    %462 = arith.addf %454, %461 : vector<1x256xf32>
    %c207_i32 = arith.constant 207 : i32
    %463 = tpu.dynamic_rotate %20 by %c207_i32 dim 1 : vector<1x256xf32>, i32 -> vector<1x256xf32>
    %c46 = arith.constant 46 : index
    %464 = memref.load %arg4[%c46] : memref<98xf32, #tpu.memory_space<smem>>
    %465 = arith.andi %59, %84 : vector<1x256xi1>
    %cst_88 = arith.constant 0.000000e+00 : f32
    %466 = vector.broadcast %cst_88 : f32 to vector<1x256xf32>
    %467 = arith.select %465, %463, %466 : vector<1x256xi1>, vector<1x256xf32>
    %468 = vector.broadcast %464 : f32 to vector<1x256xf32>
    %469 = arith.mulf %467, %468 : vector<1x256xf32>
    %470 = arith.addf %462, %469 : vector<1x256xf32>
    %c206_i32 = arith.constant 206 : i32
    %471 = tpu.dynamic_rotate %20 by %c206_i32 dim 1 : vector<1x256xf32>, i32 -> vector<1x256xf32>
    %c47 = arith.constant 47 : index
    %472 = memref.load %arg4[%c47] : memref<98xf32, #tpu.memory_space<smem>>
    %473 = arith.andi %59, %89 : vector<1x256xi1>
    %cst_89 = arith.constant 0.000000e+00 : f32
    %474 = vector.broadcast %cst_89 : f32 to vector<1x256xf32>
    %475 = arith.select %473, %471, %474 : vector<1x256xi1>, vector<1x256xf32>
    %476 = vector.broadcast %472 : f32 to vector<1x256xf32>
    %477 = arith.mulf %475, %476 : vector<1x256xf32>
    %478 = arith.addf %470, %477 : vector<1x256xf32>
    %c205_i32 = arith.constant 205 : i32
    %479 = tpu.dynamic_rotate %20 by %c205_i32 dim 1 : vector<1x256xf32>, i32 -> vector<1x256xf32>
    %c48 = arith.constant 48 : index
    %480 = memref.load %arg4[%c48] : memref<98xf32, #tpu.memory_space<smem>>
    %481 = arith.andi %59, %94 : vector<1x256xi1>
    %cst_90 = arith.constant 0.000000e+00 : f32
    %482 = vector.broadcast %cst_90 : f32 to vector<1x256xf32>
    %483 = arith.select %481, %479, %482 : vector<1x256xi1>, vector<1x256xf32>
    %484 = vector.broadcast %480 : f32 to vector<1x256xf32>
    %485 = arith.mulf %483, %484 : vector<1x256xf32>
    %486 = arith.addf %478, %485 : vector<1x256xf32>
    %c51_i32_91 = arith.constant 51 : i32
    %487 = tpu.dynamic_rotate %22 by %c51_i32_91 dim 1 : vector<1x256xf32>, i32 -> vector<1x256xf32>
    %c49 = arith.constant 49 : index
    %488 = memref.load %arg4[%c49] : memref<98xf32, #tpu.memory_space<smem>>
    %489 = arith.andi %29, %64 : vector<1x256xi1>
    %cst_92 = arith.constant 0.000000e+00 : f32
    %490 = vector.broadcast %cst_92 : f32 to vector<1x256xf32>
    %491 = arith.select %489, %487, %490 : vector<1x256xi1>, vector<1x256xf32>
    %492 = vector.broadcast %488 : f32 to vector<1x256xf32>
    %493 = arith.mulf %491, %492 : vector<1x256xf32>
    %494 = arith.addf %486, %493 : vector<1x256xf32>
    %c50_i32_93 = arith.constant 50 : i32
    %495 = tpu.dynamic_rotate %22 by %c50_i32_93 dim 1 : vector<1x256xf32>, i32 -> vector<1x256xf32>
    %c50 = arith.constant 50 : index
    %496 = memref.load %arg4[%c50] : memref<98xf32, #tpu.memory_space<smem>>
    %497 = arith.andi %29, %69 : vector<1x256xi1>
    %cst_94 = arith.constant 0.000000e+00 : f32
    %498 = vector.broadcast %cst_94 : f32 to vector<1x256xf32>
    %499 = arith.select %497, %495, %498 : vector<1x256xi1>, vector<1x256xf32>
    %500 = vector.broadcast %496 : f32 to vector<1x256xf32>
    %501 = arith.mulf %499, %500 : vector<1x256xf32>
    %502 = arith.addf %494, %501 : vector<1x256xf32>
    %c49_i32_95 = arith.constant 49 : i32
    %503 = tpu.dynamic_rotate %22 by %c49_i32_95 dim 1 : vector<1x256xf32>, i32 -> vector<1x256xf32>
    %c51 = arith.constant 51 : index
    %504 = memref.load %arg4[%c51] : memref<98xf32, #tpu.memory_space<smem>>
    %505 = arith.andi %29, %74 : vector<1x256xi1>
    %cst_96 = arith.constant 0.000000e+00 : f32
    %506 = vector.broadcast %cst_96 : f32 to vector<1x256xf32>
    %507 = arith.select %505, %503, %506 : vector<1x256xi1>, vector<1x256xf32>
    %508 = vector.broadcast %504 : f32 to vector<1x256xf32>
    %509 = arith.mulf %507, %508 : vector<1x256xf32>
    %510 = arith.addf %502, %509 : vector<1x256xf32>
    %c48_i32_97 = arith.constant 48 : i32
    %511 = tpu.dynamic_rotate %22 by %c48_i32_97 dim 1 : vector<1x256xf32>, i32 -> vector<1x256xf32>
    %c52 = arith.constant 52 : index
    %512 = memref.load %arg4[%c52] : memref<98xf32, #tpu.memory_space<smem>>
    %513 = arith.andi %29, %79 : vector<1x256xi1>
    %cst_98 = arith.constant 0.000000e+00 : f32
    %514 = vector.broadcast %cst_98 : f32 to vector<1x256xf32>
    %515 = arith.select %513, %511, %514 : vector<1x256xi1>, vector<1x256xf32>
    %516 = vector.broadcast %512 : f32 to vector<1x256xf32>
    %517 = arith.mulf %515, %516 : vector<1x256xf32>
    %518 = arith.addf %510, %517 : vector<1x256xf32>
    %c47_i32_99 = arith.constant 47 : i32
    %519 = tpu.dynamic_rotate %22 by %c47_i32_99 dim 1 : vector<1x256xf32>, i32 -> vector<1x256xf32>
    %c53 = arith.constant 53 : index
    %520 = memref.load %arg4[%c53] : memref<98xf32, #tpu.memory_space<smem>>
    %521 = arith.andi %29, %84 : vector<1x256xi1>
    %cst_100 = arith.constant 0.000000e+00 : f32
    %522 = vector.broadcast %cst_100 : f32 to vector<1x256xf32>
    %523 = arith.select %521, %519, %522 : vector<1x256xi1>, vector<1x256xf32>
    %524 = vector.broadcast %520 : f32 to vector<1x256xf32>
    %525 = arith.mulf %523, %524 : vector<1x256xf32>
    %526 = arith.addf %518, %525 : vector<1x256xf32>
    %c46_i32_101 = arith.constant 46 : i32
    %527 = tpu.dynamic_rotate %22 by %c46_i32_101 dim 1 : vector<1x256xf32>, i32 -> vector<1x256xf32>
    %c54 = arith.constant 54 : index
    %528 = memref.load %arg4[%c54] : memref<98xf32, #tpu.memory_space<smem>>
    %529 = arith.andi %29, %89 : vector<1x256xi1>
    %cst_102 = arith.constant 0.000000e+00 : f32
    %530 = vector.broadcast %cst_102 : f32 to vector<1x256xf32>
    %531 = arith.select %529, %527, %530 : vector<1x256xi1>, vector<1x256xf32>
    %532 = vector.broadcast %528 : f32 to vector<1x256xf32>
    %533 = arith.mulf %531, %532 : vector<1x256xf32>
    %534 = arith.addf %526, %533 : vector<1x256xf32>
    %c45_i32_103 = arith.constant 45 : i32
    %535 = tpu.dynamic_rotate %22 by %c45_i32_103 dim 1 : vector<1x256xf32>, i32 -> vector<1x256xf32>
    %c55 = arith.constant 55 : index
    %536 = memref.load %arg4[%c55] : memref<98xf32, #tpu.memory_space<smem>>
    %537 = arith.andi %29, %94 : vector<1x256xi1>
    %cst_104 = arith.constant 0.000000e+00 : f32
    %538 = vector.broadcast %cst_104 : f32 to vector<1x256xf32>
    %539 = arith.select %537, %535, %538 : vector<1x256xi1>, vector<1x256xf32>
    %540 = vector.broadcast %536 : f32 to vector<1x256xf32>
    %541 = arith.mulf %539, %540 : vector<1x256xf32>
    %542 = arith.addf %534, %541 : vector<1x256xf32>
    %c35_i32_105 = arith.constant 35 : i32
    %543 = tpu.dynamic_rotate %22 by %c35_i32_105 dim 1 : vector<1x256xf32>, i32 -> vector<1x256xf32>
    %c56 = arith.constant 56 : index
    %544 = memref.load %arg4[%c56] : memref<98xf32, #tpu.memory_space<smem>>
    %545 = arith.andi %34, %64 : vector<1x256xi1>
    %cst_106 = arith.constant 0.000000e+00 : f32
    %546 = vector.broadcast %cst_106 : f32 to vector<1x256xf32>
    %547 = arith.select %545, %543, %546 : vector<1x256xi1>, vector<1x256xf32>
    %548 = vector.broadcast %544 : f32 to vector<1x256xf32>
    %549 = arith.mulf %547, %548 : vector<1x256xf32>
    %550 = arith.addf %542, %549 : vector<1x256xf32>
    %c34_i32_107 = arith.constant 34 : i32
    %551 = tpu.dynamic_rotate %22 by %c34_i32_107 dim 1 : vector<1x256xf32>, i32 -> vector<1x256xf32>
    %c57 = arith.constant 57 : index
    %552 = memref.load %arg4[%c57] : memref<98xf32, #tpu.memory_space<smem>>
    %553 = arith.andi %34, %69 : vector<1x256xi1>
    %cst_108 = arith.constant 0.000000e+00 : f32
    %554 = vector.broadcast %cst_108 : f32 to vector<1x256xf32>
    %555 = arith.select %553, %551, %554 : vector<1x256xi1>, vector<1x256xf32>
    %556 = vector.broadcast %552 : f32 to vector<1x256xf32>
    %557 = arith.mulf %555, %556 : vector<1x256xf32>
    %558 = arith.addf %550, %557 : vector<1x256xf32>
    %c33_i32_109 = arith.constant 33 : i32
    %559 = tpu.dynamic_rotate %22 by %c33_i32_109 dim 1 : vector<1x256xf32>, i32 -> vector<1x256xf32>
    %c58 = arith.constant 58 : index
    %560 = memref.load %arg4[%c58] : memref<98xf32, #tpu.memory_space<smem>>
    %561 = arith.andi %34, %74 : vector<1x256xi1>
    %cst_110 = arith.constant 0.000000e+00 : f32
    %562 = vector.broadcast %cst_110 : f32 to vector<1x256xf32>
    %563 = arith.select %561, %559, %562 : vector<1x256xi1>, vector<1x256xf32>
    %564 = vector.broadcast %560 : f32 to vector<1x256xf32>
    %565 = arith.mulf %563, %564 : vector<1x256xf32>
    %566 = arith.addf %558, %565 : vector<1x256xf32>
    %c32_i32_111 = arith.constant 32 : i32
    %567 = tpu.dynamic_rotate %22 by %c32_i32_111 dim 1 : vector<1x256xf32>, i32 -> vector<1x256xf32>
    %c59 = arith.constant 59 : index
    %568 = memref.load %arg4[%c59] : memref<98xf32, #tpu.memory_space<smem>>
    %569 = arith.andi %34, %79 : vector<1x256xi1>
    %cst_112 = arith.constant 0.000000e+00 : f32
    %570 = vector.broadcast %cst_112 : f32 to vector<1x256xf32>
    %571 = arith.select %569, %567, %570 : vector<1x256xi1>, vector<1x256xf32>
    %572 = vector.broadcast %568 : f32 to vector<1x256xf32>
    %573 = arith.mulf %571, %572 : vector<1x256xf32>
    %574 = arith.addf %566, %573 : vector<1x256xf32>
    %c31_i32_113 = arith.constant 31 : i32
    %575 = tpu.dynamic_rotate %22 by %c31_i32_113 dim 1 : vector<1x256xf32>, i32 -> vector<1x256xf32>
    %c60 = arith.constant 60 : index
    %576 = memref.load %arg4[%c60] : memref<98xf32, #tpu.memory_space<smem>>
    %577 = arith.andi %34, %84 : vector<1x256xi1>
    %cst_114 = arith.constant 0.000000e+00 : f32
    %578 = vector.broadcast %cst_114 : f32 to vector<1x256xf32>
    %579 = arith.select %577, %575, %578 : vector<1x256xi1>, vector<1x256xf32>
    %580 = vector.broadcast %576 : f32 to vector<1x256xf32>
    %581 = arith.mulf %579, %580 : vector<1x256xf32>
    %582 = arith.addf %574, %581 : vector<1x256xf32>
    %c30_i32_115 = arith.constant 30 : i32
    %583 = tpu.dynamic_rotate %22 by %c30_i32_115 dim 1 : vector<1x256xf32>, i32 -> vector<1x256xf32>
    %c61 = arith.constant 61 : index
    %584 = memref.load %arg4[%c61] : memref<98xf32, #tpu.memory_space<smem>>
    %585 = arith.andi %34, %89 : vector<1x256xi1>
    %cst_116 = arith.constant 0.000000e+00 : f32
    %586 = vector.broadcast %cst_116 : f32 to vector<1x256xf32>
    %587 = arith.select %585, %583, %586 : vector<1x256xi1>, vector<1x256xf32>
    %588 = vector.broadcast %584 : f32 to vector<1x256xf32>
    %589 = arith.mulf %587, %588 : vector<1x256xf32>
    %590 = arith.addf %582, %589 : vector<1x256xf32>
    %c29_i32_117 = arith.constant 29 : i32
    %591 = tpu.dynamic_rotate %22 by %c29_i32_117 dim 1 : vector<1x256xf32>, i32 -> vector<1x256xf32>
    %c62 = arith.constant 62 : index
    %592 = memref.load %arg4[%c62] : memref<98xf32, #tpu.memory_space<smem>>
    %593 = arith.andi %34, %94 : vector<1x256xi1>
    %cst_118 = arith.constant 0.000000e+00 : f32
    %594 = vector.broadcast %cst_118 : f32 to vector<1x256xf32>
    %595 = arith.select %593, %591, %594 : vector<1x256xi1>, vector<1x256xf32>
    %596 = vector.broadcast %592 : f32 to vector<1x256xf32>
    %597 = arith.mulf %595, %596 : vector<1x256xf32>
    %598 = arith.addf %590, %597 : vector<1x256xf32>
    %c19_i32_119 = arith.constant 19 : i32
    %599 = tpu.dynamic_rotate %22 by %c19_i32_119 dim 1 : vector<1x256xf32>, i32 -> vector<1x256xf32>
    %c63 = arith.constant 63 : index
    %600 = memref.load %arg4[%c63] : memref<98xf32, #tpu.memory_space<smem>>
    %601 = arith.andi %39, %64 : vector<1x256xi1>
    %cst_120 = arith.constant 0.000000e+00 : f32
    %602 = vector.broadcast %cst_120 : f32 to vector<1x256xf32>
    %603 = arith.select %601, %599, %602 : vector<1x256xi1>, vector<1x256xf32>
    %604 = vector.broadcast %600 : f32 to vector<1x256xf32>
    %605 = arith.mulf %603, %604 : vector<1x256xf32>
    %606 = arith.addf %598, %605 : vector<1x256xf32>
    %c18_i32_121 = arith.constant 18 : i32
    %607 = tpu.dynamic_rotate %22 by %c18_i32_121 dim 1 : vector<1x256xf32>, i32 -> vector<1x256xf32>
    %c64 = arith.constant 64 : index
    %608 = memref.load %arg4[%c64] : memref<98xf32, #tpu.memory_space<smem>>
    %609 = arith.andi %39, %69 : vector<1x256xi1>
    %cst_122 = arith.constant 0.000000e+00 : f32
    %610 = vector.broadcast %cst_122 : f32 to vector<1x256xf32>
    %611 = arith.select %609, %607, %610 : vector<1x256xi1>, vector<1x256xf32>
    %612 = vector.broadcast %608 : f32 to vector<1x256xf32>
    %613 = arith.mulf %611, %612 : vector<1x256xf32>
    %614 = arith.addf %606, %613 : vector<1x256xf32>
    %c17_i32_123 = arith.constant 17 : i32
    %615 = tpu.dynamic_rotate %22 by %c17_i32_123 dim 1 : vector<1x256xf32>, i32 -> vector<1x256xf32>
    %c65 = arith.constant 65 : index
    %616 = memref.load %arg4[%c65] : memref<98xf32, #tpu.memory_space<smem>>
    %617 = arith.andi %39, %74 : vector<1x256xi1>
    %cst_124 = arith.constant 0.000000e+00 : f32
    %618 = vector.broadcast %cst_124 : f32 to vector<1x256xf32>
    %619 = arith.select %617, %615, %618 : vector<1x256xi1>, vector<1x256xf32>
    %620 = vector.broadcast %616 : f32 to vector<1x256xf32>
    %621 = arith.mulf %619, %620 : vector<1x256xf32>
    %622 = arith.addf %614, %621 : vector<1x256xf32>
    %c16_i32_125 = arith.constant 16 : i32
    %623 = tpu.dynamic_rotate %22 by %c16_i32_125 dim 1 : vector<1x256xf32>, i32 -> vector<1x256xf32>
    %c66 = arith.constant 66 : index
    %624 = memref.load %arg4[%c66] : memref<98xf32, #tpu.memory_space<smem>>
    %625 = arith.andi %39, %79 : vector<1x256xi1>
    %cst_126 = arith.constant 0.000000e+00 : f32
    %626 = vector.broadcast %cst_126 : f32 to vector<1x256xf32>
    %627 = arith.select %625, %623, %626 : vector<1x256xi1>, vector<1x256xf32>
    %628 = vector.broadcast %624 : f32 to vector<1x256xf32>
    %629 = arith.mulf %627, %628 : vector<1x256xf32>
    %630 = arith.addf %622, %629 : vector<1x256xf32>
    %c15_i32_127 = arith.constant 15 : i32
    %631 = tpu.dynamic_rotate %22 by %c15_i32_127 dim 1 : vector<1x256xf32>, i32 -> vector<1x256xf32>
    %c67 = arith.constant 67 : index
    %632 = memref.load %arg4[%c67] : memref<98xf32, #tpu.memory_space<smem>>
    %633 = arith.andi %39, %84 : vector<1x256xi1>
    %cst_128 = arith.constant 0.000000e+00 : f32
    %634 = vector.broadcast %cst_128 : f32 to vector<1x256xf32>
    %635 = arith.select %633, %631, %634 : vector<1x256xi1>, vector<1x256xf32>
    %636 = vector.broadcast %632 : f32 to vector<1x256xf32>
    %637 = arith.mulf %635, %636 : vector<1x256xf32>
    %638 = arith.addf %630, %637 : vector<1x256xf32>
    %c14_i32_129 = arith.constant 14 : i32
    %639 = tpu.dynamic_rotate %22 by %c14_i32_129 dim 1 : vector<1x256xf32>, i32 -> vector<1x256xf32>
    %c68 = arith.constant 68 : index
    %640 = memref.load %arg4[%c68] : memref<98xf32, #tpu.memory_space<smem>>
    %641 = arith.andi %39, %89 : vector<1x256xi1>
    %cst_130 = arith.constant 0.000000e+00 : f32
    %642 = vector.broadcast %cst_130 : f32 to vector<1x256xf32>
    %643 = arith.select %641, %639, %642 : vector<1x256xi1>, vector<1x256xf32>
    %644 = vector.broadcast %640 : f32 to vector<1x256xf32>
    %645 = arith.mulf %643, %644 : vector<1x256xf32>
    %646 = arith.addf %638, %645 : vector<1x256xf32>
    %c13_i32_131 = arith.constant 13 : i32
    %647 = tpu.dynamic_rotate %22 by %c13_i32_131 dim 1 : vector<1x256xf32>, i32 -> vector<1x256xf32>
    %c69 = arith.constant 69 : index
    %648 = memref.load %arg4[%c69] : memref<98xf32, #tpu.memory_space<smem>>
    %649 = arith.andi %39, %94 : vector<1x256xi1>
    %cst_132 = arith.constant 0.000000e+00 : f32
    %650 = vector.broadcast %cst_132 : f32 to vector<1x256xf32>
    %651 = arith.select %649, %647, %650 : vector<1x256xi1>, vector<1x256xf32>
    %652 = vector.broadcast %648 : f32 to vector<1x256xf32>
    %653 = arith.mulf %651, %652 : vector<1x256xf32>
    %654 = arith.addf %646, %653 : vector<1x256xf32>
    %c3_i32_133 = arith.constant 3 : i32
    %655 = tpu.dynamic_rotate %22 by %c3_i32_133 dim 1 : vector<1x256xf32>, i32 -> vector<1x256xf32>
    %c70 = arith.constant 70 : index
    %656 = memref.load %arg4[%c70] : memref<98xf32, #tpu.memory_space<smem>>
    %657 = arith.andi %44, %64 : vector<1x256xi1>
    %cst_134 = arith.constant 0.000000e+00 : f32
    %658 = vector.broadcast %cst_134 : f32 to vector<1x256xf32>
    %659 = arith.select %657, %655, %658 : vector<1x256xi1>, vector<1x256xf32>
    %660 = vector.broadcast %656 : f32 to vector<1x256xf32>
    %661 = arith.mulf %659, %660 : vector<1x256xf32>
    %662 = arith.addf %654, %661 : vector<1x256xf32>
    %c2_i32_135 = arith.constant 2 : i32
    %663 = tpu.dynamic_rotate %22 by %c2_i32_135 dim 1 : vector<1x256xf32>, i32 -> vector<1x256xf32>
    %c71 = arith.constant 71 : index
    %664 = memref.load %arg4[%c71] : memref<98xf32, #tpu.memory_space<smem>>
    %665 = arith.andi %44, %69 : vector<1x256xi1>
    %cst_136 = arith.constant 0.000000e+00 : f32
    %666 = vector.broadcast %cst_136 : f32 to vector<1x256xf32>
    %667 = arith.select %665, %663, %666 : vector<1x256xi1>, vector<1x256xf32>
    %668 = vector.broadcast %664 : f32 to vector<1x256xf32>
    %669 = arith.mulf %667, %668 : vector<1x256xf32>
    %670 = arith.addf %662, %669 : vector<1x256xf32>
    %c1_i32_137 = arith.constant 1 : i32
    %671 = tpu.dynamic_rotate %22 by %c1_i32_137 dim 1 : vector<1x256xf32>, i32 -> vector<1x256xf32>
    %c72 = arith.constant 72 : index
    %672 = memref.load %arg4[%c72] : memref<98xf32, #tpu.memory_space<smem>>
    %673 = arith.andi %44, %74 : vector<1x256xi1>
    %cst_138 = arith.constant 0.000000e+00 : f32
    %674 = vector.broadcast %cst_138 : f32 to vector<1x256xf32>
    %675 = arith.select %673, %671, %674 : vector<1x256xi1>, vector<1x256xf32>
    %676 = vector.broadcast %672 : f32 to vector<1x256xf32>
    %677 = arith.mulf %675, %676 : vector<1x256xf32>
    %678 = arith.addf %670, %677 : vector<1x256xf32>
    %c73 = arith.constant 73 : index
    %679 = memref.load %arg4[%c73] : memref<98xf32, #tpu.memory_space<smem>>
    %680 = arith.andi %44, %79 : vector<1x256xi1>
    %cst_139 = arith.constant 0.000000e+00 : f32
    %681 = vector.broadcast %cst_139 : f32 to vector<1x256xf32>
    %682 = arith.select %680, %22, %681 : vector<1x256xi1>, vector<1x256xf32>
    %683 = vector.broadcast %679 : f32 to vector<1x256xf32>
    %684 = arith.mulf %682, %683 : vector<1x256xf32>
    %685 = arith.addf %678, %684 : vector<1x256xf32>
    %c255_i32_140 = arith.constant 255 : i32
    %686 = tpu.dynamic_rotate %22 by %c255_i32_140 dim 1 : vector<1x256xf32>, i32 -> vector<1x256xf32>
    %c74 = arith.constant 74 : index
    %687 = memref.load %arg4[%c74] : memref<98xf32, #tpu.memory_space<smem>>
    %688 = arith.andi %44, %84 : vector<1x256xi1>
    %cst_141 = arith.constant 0.000000e+00 : f32
    %689 = vector.broadcast %cst_141 : f32 to vector<1x256xf32>
    %690 = arith.select %688, %686, %689 : vector<1x256xi1>, vector<1x256xf32>
    %691 = vector.broadcast %687 : f32 to vector<1x256xf32>
    %692 = arith.mulf %690, %691 : vector<1x256xf32>
    %693 = arith.addf %685, %692 : vector<1x256xf32>
    %c254_i32_142 = arith.constant 254 : i32
    %694 = tpu.dynamic_rotate %22 by %c254_i32_142 dim 1 : vector<1x256xf32>, i32 -> vector<1x256xf32>
    %c75 = arith.constant 75 : index
    %695 = memref.load %arg4[%c75] : memref<98xf32, #tpu.memory_space<smem>>
    %696 = arith.andi %44, %89 : vector<1x256xi1>
    %cst_143 = arith.constant 0.000000e+00 : f32
    %697 = vector.broadcast %cst_143 : f32 to vector<1x256xf32>
    %698 = arith.select %696, %694, %697 : vector<1x256xi1>, vector<1x256xf32>
    %699 = vector.broadcast %695 : f32 to vector<1x256xf32>
    %700 = arith.mulf %698, %699 : vector<1x256xf32>
    %701 = arith.addf %693, %700 : vector<1x256xf32>
    %c253_i32_144 = arith.constant 253 : i32
    %702 = tpu.dynamic_rotate %22 by %c253_i32_144 dim 1 : vector<1x256xf32>, i32 -> vector<1x256xf32>
    %c76 = arith.constant 76 : index
    %703 = memref.load %arg4[%c76] : memref<98xf32, #tpu.memory_space<smem>>
    %704 = arith.andi %44, %94 : vector<1x256xi1>
    %cst_145 = arith.constant 0.000000e+00 : f32
    %705 = vector.broadcast %cst_145 : f32 to vector<1x256xf32>
    %706 = arith.select %704, %702, %705 : vector<1x256xi1>, vector<1x256xf32>
    %707 = vector.broadcast %703 : f32 to vector<1x256xf32>
    %708 = arith.mulf %706, %707 : vector<1x256xf32>
    %709 = arith.addf %701, %708 : vector<1x256xf32>
    %c243_i32_146 = arith.constant 243 : i32
    %710 = tpu.dynamic_rotate %22 by %c243_i32_146 dim 1 : vector<1x256xf32>, i32 -> vector<1x256xf32>
    %c77 = arith.constant 77 : index
    %711 = memref.load %arg4[%c77] : memref<98xf32, #tpu.memory_space<smem>>
    %712 = arith.andi %49, %64 : vector<1x256xi1>
    %cst_147 = arith.constant 0.000000e+00 : f32
    %713 = vector.broadcast %cst_147 : f32 to vector<1x256xf32>
    %714 = arith.select %712, %710, %713 : vector<1x256xi1>, vector<1x256xf32>
    %715 = vector.broadcast %711 : f32 to vector<1x256xf32>
    %716 = arith.mulf %714, %715 : vector<1x256xf32>
    %717 = arith.addf %709, %716 : vector<1x256xf32>
    %c242_i32_148 = arith.constant 242 : i32
    %718 = tpu.dynamic_rotate %22 by %c242_i32_148 dim 1 : vector<1x256xf32>, i32 -> vector<1x256xf32>
    %c78 = arith.constant 78 : index
    %719 = memref.load %arg4[%c78] : memref<98xf32, #tpu.memory_space<smem>>
    %720 = arith.andi %49, %69 : vector<1x256xi1>
    %cst_149 = arith.constant 0.000000e+00 : f32
    %721 = vector.broadcast %cst_149 : f32 to vector<1x256xf32>
    %722 = arith.select %720, %718, %721 : vector<1x256xi1>, vector<1x256xf32>
    %723 = vector.broadcast %719 : f32 to vector<1x256xf32>
    %724 = arith.mulf %722, %723 : vector<1x256xf32>
    %725 = arith.addf %717, %724 : vector<1x256xf32>
    %c241_i32_150 = arith.constant 241 : i32
    %726 = tpu.dynamic_rotate %22 by %c241_i32_150 dim 1 : vector<1x256xf32>, i32 -> vector<1x256xf32>
    %c79 = arith.constant 79 : index
    %727 = memref.load %arg4[%c79] : memref<98xf32, #tpu.memory_space<smem>>
    %728 = arith.andi %49, %74 : vector<1x256xi1>
    %cst_151 = arith.constant 0.000000e+00 : f32
    %729 = vector.broadcast %cst_151 : f32 to vector<1x256xf32>
    %730 = arith.select %728, %726, %729 : vector<1x256xi1>, vector<1x256xf32>
    %731 = vector.broadcast %727 : f32 to vector<1x256xf32>
    %732 = arith.mulf %730, %731 : vector<1x256xf32>
    %733 = arith.addf %725, %732 : vector<1x256xf32>
    %c240_i32_152 = arith.constant 240 : i32
    %734 = tpu.dynamic_rotate %22 by %c240_i32_152 dim 1 : vector<1x256xf32>, i32 -> vector<1x256xf32>
    %c80 = arith.constant 80 : index
    %735 = memref.load %arg4[%c80] : memref<98xf32, #tpu.memory_space<smem>>
    %736 = arith.andi %49, %79 : vector<1x256xi1>
    %cst_153 = arith.constant 0.000000e+00 : f32
    %737 = vector.broadcast %cst_153 : f32 to vector<1x256xf32>
    %738 = arith.select %736, %734, %737 : vector<1x256xi1>, vector<1x256xf32>
    %739 = vector.broadcast %735 : f32 to vector<1x256xf32>
    %740 = arith.mulf %738, %739 : vector<1x256xf32>
    %741 = arith.addf %733, %740 : vector<1x256xf32>
    %c239_i32_154 = arith.constant 239 : i32
    %742 = tpu.dynamic_rotate %22 by %c239_i32_154 dim 1 : vector<1x256xf32>, i32 -> vector<1x256xf32>
    %c81 = arith.constant 81 : index
    %743 = memref.load %arg4[%c81] : memref<98xf32, #tpu.memory_space<smem>>
    %744 = arith.andi %49, %84 : vector<1x256xi1>
    %cst_155 = arith.constant 0.000000e+00 : f32
    %745 = vector.broadcast %cst_155 : f32 to vector<1x256xf32>
    %746 = arith.select %744, %742, %745 : vector<1x256xi1>, vector<1x256xf32>
    %747 = vector.broadcast %743 : f32 to vector<1x256xf32>
    %748 = arith.mulf %746, %747 : vector<1x256xf32>
    %749 = arith.addf %741, %748 : vector<1x256xf32>
    %c238_i32_156 = arith.constant 238 : i32
    %750 = tpu.dynamic_rotate %22 by %c238_i32_156 dim 1 : vector<1x256xf32>, i32 -> vector<1x256xf32>
    %c82 = arith.constant 82 : index
    %751 = memref.load %arg4[%c82] : memref<98xf32, #tpu.memory_space<smem>>
    %752 = arith.andi %49, %89 : vector<1x256xi1>
    %cst_157 = arith.constant 0.000000e+00 : f32
    %753 = vector.broadcast %cst_157 : f32 to vector<1x256xf32>
    %754 = arith.select %752, %750, %753 : vector<1x256xi1>, vector<1x256xf32>
    %755 = vector.broadcast %751 : f32 to vector<1x256xf32>
    %756 = arith.mulf %754, %755 : vector<1x256xf32>
    %757 = arith.addf %749, %756 : vector<1x256xf32>
    %c237_i32_158 = arith.constant 237 : i32
    %758 = tpu.dynamic_rotate %22 by %c237_i32_158 dim 1 : vector<1x256xf32>, i32 -> vector<1x256xf32>
    %c83 = arith.constant 83 : index
    %759 = memref.load %arg4[%c83] : memref<98xf32, #tpu.memory_space<smem>>
    %760 = arith.andi %49, %94 : vector<1x256xi1>
    %cst_159 = arith.constant 0.000000e+00 : f32
    %761 = vector.broadcast %cst_159 : f32 to vector<1x256xf32>
    %762 = arith.select %760, %758, %761 : vector<1x256xi1>, vector<1x256xf32>
    %763 = vector.broadcast %759 : f32 to vector<1x256xf32>
    %764 = arith.mulf %762, %763 : vector<1x256xf32>
    %765 = arith.addf %757, %764 : vector<1x256xf32>
    %c227_i32_160 = arith.constant 227 : i32
    %766 = tpu.dynamic_rotate %22 by %c227_i32_160 dim 1 : vector<1x256xf32>, i32 -> vector<1x256xf32>
    %c84 = arith.constant 84 : index
    %767 = memref.load %arg4[%c84] : memref<98xf32, #tpu.memory_space<smem>>
    %768 = arith.andi %54, %64 : vector<1x256xi1>
    %cst_161 = arith.constant 0.000000e+00 : f32
    %769 = vector.broadcast %cst_161 : f32 to vector<1x256xf32>
    %770 = arith.select %768, %766, %769 : vector<1x256xi1>, vector<1x256xf32>
    %771 = vector.broadcast %767 : f32 to vector<1x256xf32>
    %772 = arith.mulf %770, %771 : vector<1x256xf32>
    %773 = arith.addf %765, %772 : vector<1x256xf32>
    %c226_i32_162 = arith.constant 226 : i32
    %774 = tpu.dynamic_rotate %22 by %c226_i32_162 dim 1 : vector<1x256xf32>, i32 -> vector<1x256xf32>
    %c85 = arith.constant 85 : index
    %775 = memref.load %arg4[%c85] : memref<98xf32, #tpu.memory_space<smem>>
    %776 = arith.andi %54, %69 : vector<1x256xi1>
    %cst_163 = arith.constant 0.000000e+00 : f32
    %777 = vector.broadcast %cst_163 : f32 to vector<1x256xf32>
    %778 = arith.select %776, %774, %777 : vector<1x256xi1>, vector<1x256xf32>
    %779 = vector.broadcast %775 : f32 to vector<1x256xf32>
    %780 = arith.mulf %778, %779 : vector<1x256xf32>
    %781 = arith.addf %773, %780 : vector<1x256xf32>
    %c225_i32_164 = arith.constant 225 : i32
    %782 = tpu.dynamic_rotate %22 by %c225_i32_164 dim 1 : vector<1x256xf32>, i32 -> vector<1x256xf32>
    %c86 = arith.constant 86 : index
    %783 = memref.load %arg4[%c86] : memref<98xf32, #tpu.memory_space<smem>>
    %784 = arith.andi %54, %74 : vector<1x256xi1>
    %cst_165 = arith.constant 0.000000e+00 : f32
    %785 = vector.broadcast %cst_165 : f32 to vector<1x256xf32>
    %786 = arith.select %784, %782, %785 : vector<1x256xi1>, vector<1x256xf32>
    %787 = vector.broadcast %783 : f32 to vector<1x256xf32>
    %788 = arith.mulf %786, %787 : vector<1x256xf32>
    %789 = arith.addf %781, %788 : vector<1x256xf32>
    %c224_i32_166 = arith.constant 224 : i32
    %790 = tpu.dynamic_rotate %22 by %c224_i32_166 dim 1 : vector<1x256xf32>, i32 -> vector<1x256xf32>
    %c87 = arith.constant 87 : index
    %791 = memref.load %arg4[%c87] : memref<98xf32, #tpu.memory_space<smem>>
    %792 = arith.andi %54, %79 : vector<1x256xi1>
    %cst_167 = arith.constant 0.000000e+00 : f32
    %793 = vector.broadcast %cst_167 : f32 to vector<1x256xf32>
    %794 = arith.select %792, %790, %793 : vector<1x256xi1>, vector<1x256xf32>
    %795 = vector.broadcast %791 : f32 to vector<1x256xf32>
    %796 = arith.mulf %794, %795 : vector<1x256xf32>
    %797 = arith.addf %789, %796 : vector<1x256xf32>
    %c223_i32_168 = arith.constant 223 : i32
    %798 = tpu.dynamic_rotate %22 by %c223_i32_168 dim 1 : vector<1x256xf32>, i32 -> vector<1x256xf32>
    %c88 = arith.constant 88 : index
    %799 = memref.load %arg4[%c88] : memref<98xf32, #tpu.memory_space<smem>>
    %800 = arith.andi %54, %84 : vector<1x256xi1>
    %cst_169 = arith.constant 0.000000e+00 : f32
    %801 = vector.broadcast %cst_169 : f32 to vector<1x256xf32>
    %802 = arith.select %800, %798, %801 : vector<1x256xi1>, vector<1x256xf32>
    %803 = vector.broadcast %799 : f32 to vector<1x256xf32>
    %804 = arith.mulf %802, %803 : vector<1x256xf32>
    %805 = arith.addf %797, %804 : vector<1x256xf32>
    %c222_i32_170 = arith.constant 222 : i32
    %806 = tpu.dynamic_rotate %22 by %c222_i32_170 dim 1 : vector<1x256xf32>, i32 -> vector<1x256xf32>
    %c89 = arith.constant 89 : index
    %807 = memref.load %arg4[%c89] : memref<98xf32, #tpu.memory_space<smem>>
    %808 = arith.andi %54, %89 : vector<1x256xi1>
    %cst_171 = arith.constant 0.000000e+00 : f32
    %809 = vector.broadcast %cst_171 : f32 to vector<1x256xf32>
    %810 = arith.select %808, %806, %809 : vector<1x256xi1>, vector<1x256xf32>
    %811 = vector.broadcast %807 : f32 to vector<1x256xf32>
    %812 = arith.mulf %810, %811 : vector<1x256xf32>
    %813 = arith.addf %805, %812 : vector<1x256xf32>
    %c221_i32_172 = arith.constant 221 : i32
    %814 = tpu.dynamic_rotate %22 by %c221_i32_172 dim 1 : vector<1x256xf32>, i32 -> vector<1x256xf32>
    %c90 = arith.constant 90 : index
    %815 = memref.load %arg4[%c90] : memref<98xf32, #tpu.memory_space<smem>>
    %816 = arith.andi %54, %94 : vector<1x256xi1>
    %cst_173 = arith.constant 0.000000e+00 : f32
    %817 = vector.broadcast %cst_173 : f32 to vector<1x256xf32>
    %818 = arith.select %816, %814, %817 : vector<1x256xi1>, vector<1x256xf32>
    %819 = vector.broadcast %815 : f32 to vector<1x256xf32>
    %820 = arith.mulf %818, %819 : vector<1x256xf32>
    %821 = arith.addf %813, %820 : vector<1x256xf32>
    %c211_i32_174 = arith.constant 211 : i32
    %822 = tpu.dynamic_rotate %22 by %c211_i32_174 dim 1 : vector<1x256xf32>, i32 -> vector<1x256xf32>
    %c91 = arith.constant 91 : index
    %823 = memref.load %arg4[%c91] : memref<98xf32, #tpu.memory_space<smem>>
    %824 = arith.andi %59, %64 : vector<1x256xi1>
    %cst_175 = arith.constant 0.000000e+00 : f32
    %825 = vector.broadcast %cst_175 : f32 to vector<1x256xf32>
    %826 = arith.select %824, %822, %825 : vector<1x256xi1>, vector<1x256xf32>
    %827 = vector.broadcast %823 : f32 to vector<1x256xf32>
    %828 = arith.mulf %826, %827 : vector<1x256xf32>
    %829 = arith.addf %821, %828 : vector<1x256xf32>
    %c210_i32_176 = arith.constant 210 : i32
    %830 = tpu.dynamic_rotate %22 by %c210_i32_176 dim 1 : vector<1x256xf32>, i32 -> vector<1x256xf32>
    %c92 = arith.constant 92 : index
    %831 = memref.load %arg4[%c92] : memref<98xf32, #tpu.memory_space<smem>>
    %832 = arith.andi %59, %69 : vector<1x256xi1>
    %cst_177 = arith.constant 0.000000e+00 : f32
    %833 = vector.broadcast %cst_177 : f32 to vector<1x256xf32>
    %834 = arith.select %832, %830, %833 : vector<1x256xi1>, vector<1x256xf32>
    %835 = vector.broadcast %831 : f32 to vector<1x256xf32>
    %836 = arith.mulf %834, %835 : vector<1x256xf32>
    %837 = arith.addf %829, %836 : vector<1x256xf32>
    %c209_i32_178 = arith.constant 209 : i32
    %838 = tpu.dynamic_rotate %22 by %c209_i32_178 dim 1 : vector<1x256xf32>, i32 -> vector<1x256xf32>
    %c93 = arith.constant 93 : index
    %839 = memref.load %arg4[%c93] : memref<98xf32, #tpu.memory_space<smem>>
    %840 = arith.andi %59, %74 : vector<1x256xi1>
    %cst_179 = arith.constant 0.000000e+00 : f32
    %841 = vector.broadcast %cst_179 : f32 to vector<1x256xf32>
    %842 = arith.select %840, %838, %841 : vector<1x256xi1>, vector<1x256xf32>
    %843 = vector.broadcast %839 : f32 to vector<1x256xf32>
    %844 = arith.mulf %842, %843 : vector<1x256xf32>
    %845 = arith.addf %837, %844 : vector<1x256xf32>
    %c208_i32_180 = arith.constant 208 : i32
    %846 = tpu.dynamic_rotate %22 by %c208_i32_180 dim 1 : vector<1x256xf32>, i32 -> vector<1x256xf32>
    %c94 = arith.constant 94 : index
    %847 = memref.load %arg4[%c94] : memref<98xf32, #tpu.memory_space<smem>>
    %848 = arith.andi %59, %79 : vector<1x256xi1>
    %cst_181 = arith.constant 0.000000e+00 : f32
    %849 = vector.broadcast %cst_181 : f32 to vector<1x256xf32>
    %850 = arith.select %848, %846, %849 : vector<1x256xi1>, vector<1x256xf32>
    %851 = vector.broadcast %847 : f32 to vector<1x256xf32>
    %852 = arith.mulf %850, %851 : vector<1x256xf32>
    %853 = arith.addf %845, %852 : vector<1x256xf32>
    %c207_i32_182 = arith.constant 207 : i32
    %854 = tpu.dynamic_rotate %22 by %c207_i32_182 dim 1 : vector<1x256xf32>, i32 -> vector<1x256xf32>
    %c95 = arith.constant 95 : index
    %855 = memref.load %arg4[%c95] : memref<98xf32, #tpu.memory_space<smem>>
    %856 = arith.andi %59, %84 : vector<1x256xi1>
    %cst_183 = arith.constant 0.000000e+00 : f32
    %857 = vector.broadcast %cst_183 : f32 to vector<1x256xf32>
    %858 = arith.select %856, %854, %857 : vector<1x256xi1>, vector<1x256xf32>
    %859 = vector.broadcast %855 : f32 to vector<1x256xf32>
    %860 = arith.mulf %858, %859 : vector<1x256xf32>
    %861 = arith.addf %853, %860 : vector<1x256xf32>
    %c206_i32_184 = arith.constant 206 : i32
    %862 = tpu.dynamic_rotate %22 by %c206_i32_184 dim 1 : vector<1x256xf32>, i32 -> vector<1x256xf32>
    %c96 = arith.constant 96 : index
    %863 = memref.load %arg4[%c96] : memref<98xf32, #tpu.memory_space<smem>>
    %864 = arith.andi %59, %89 : vector<1x256xi1>
    %cst_185 = arith.constant 0.000000e+00 : f32
    %865 = vector.broadcast %cst_185 : f32 to vector<1x256xf32>
    %866 = arith.select %864, %862, %865 : vector<1x256xi1>, vector<1x256xf32>
    %867 = vector.broadcast %863 : f32 to vector<1x256xf32>
    %868 = arith.mulf %866, %867 : vector<1x256xf32>
    %869 = arith.addf %861, %868 : vector<1x256xf32>
    %c205_i32_186 = arith.constant 205 : i32
    %870 = tpu.dynamic_rotate %22 by %c205_i32_186 dim 1 : vector<1x256xf32>, i32 -> vector<1x256xf32>
    %c97 = arith.constant 97 : index
    %871 = memref.load %arg4[%c97] : memref<98xf32, #tpu.memory_space<smem>>
    %872 = arith.andi %59, %94 : vector<1x256xi1>
    %cst_187 = arith.constant 0.000000e+00 : f32
    %873 = vector.broadcast %cst_187 : f32 to vector<1x256xf32>
    %874 = arith.select %872, %870, %873 : vector<1x256xi1>, vector<1x256xf32>
    %875 = vector.broadcast %871 : f32 to vector<1x256xf32>
    %876 = arith.mulf %874, %875 : vector<1x256xf32>
    %877 = arith.addf %869, %876 : vector<1x256xf32>
    %878 = arith.negf %877 : vector<1x256xf32>
    %879 = math.exp %878 : vector<1x256xf32>
    %cst_188 = arith.constant 1.000000e+00 : f32
    %880 = vector.broadcast %cst_188 : f32 to vector<1x256xf32>
    %881 = arith.addf %880, %879 : vector<1x256xf32>
    %882 = arith.divf %880, %881 : vector<1x256xf32>
    %883 = vector.broadcast %882 : vector<1x256xf32> to vector<8x256xf32>
    %884 = arith.mulf %16, %883 : vector<8x256xf32>
    %c0_189 = arith.constant 0 : index
    %c0_190 = arith.constant 0 : index
    %c0_191 = arith.constant 0 : index
    %885 = vector.load %arg6[%c0_189, %c0_190, %c0_191] : memref<1x8x256xf32, #tpu.memory_space<vmem>>, vector<1x8x256xf32>
    %886 = vector.shape_cast %885 : vector<1x8x256xf32> to vector<8x256xf32>
    %887 = vector.shape_cast %884 : vector<8x256xf32> to vector<1x8x256xf32>
    tpu.vector_store %arg6[%c0_189, %c0_190, %c0_191], %887 {strides = array<i32>} : memref<1x8x256xf32, #tpu.memory_space<vmem>>, vector<1x8x256xf32>,
    return
  }
  func.func @transform_0(%arg0: i32) -> (i32, i32, i32) {
    %c0_i32 = arith.constant 0 : i32
    %c0_i32_0 = arith.constant 0 : i32
    %c0_i32_1 = arith.constant 0 : i32
    return %arg0, %c0_i32, %c0_i32_0 : i32, i32, i32
  }
  func.func @transform_1(%arg0: i32) -> (i32, i32) {
    %c0_i32 = arith.constant 0 : i32
    %c0_i32_0 = arith.constant 0 : i32
    %c0_i32_1 = arith.constant 0 : i32
    return %c0_i32, %c0_i32_0 : i32, i32
  }
  func.func @transform_2(%arg0: i32) -> (i32, i32) {
    %c0_i32 = arith.constant 0 : i32
    %c0_i32_0 = arith.constant 0 : i32
    %c0_i32_1 = arith.constant 0 : i32
    return %c0_i32, %c0_i32_0 : i32, i32
  }
  func.func @transform_3(%arg0: i32) -> i32 {
    %c0_i32 = arith.constant 0 : i32
    %c0_i32_0 = arith.constant 0 : i32
    return %c0_i32 : i32
  }
  func.func @transform_4(%arg0: i32) -> (i32, i32) {
    %c0_i32 = arith.constant 0 : i32
    %c0_i32_0 = arith.constant 0 : i32
    %c0_i32_1 = arith.constant 0 : i32
    return %c0_i32, %c0_i32_0 : i32, i32
  }
  func.func @transform_5(%arg0: i32) -> (i32, i32, i32) {
    %c0_i32 = arith.constant 0 : i32
    %c0_i32_0 = arith.constant 0 : i32
    %c0_i32_1 = arith.constant 0 : i32
    return %arg0, %c0_i32, %c0_i32_0 : i32, i32, i32
  }
}

</mosaic_0001>

<bundles_post_ra>
// kernel: tpu_custom_call.1
= control target key start
LH: loop header
LB: loop body
LE: loop exit
PB: predicated region body
PF: predicated region fallthrough
CT: control target
= control target key end

     0   :  { %s6987_s0 = inlined_call_operand.hbm [shape: f32[2,8,256], index: 0, kind: input, shape index: {}]   ;;  %s6988_s1 = inlined_call_operand.vmem [shape: f32[8,8], index: 1, kind: input, shape index: {}]   ;;  %s6989_s2 = inlined_call_operand.vmem [shape: f32[8,1], index: 2, kind: input, shape index: {}]   ;;  %s6990_s3 = inlined_call_operand.vmem [shape: f32[98], index: 3, kind: input, shape index: {}]   ;;  %s6991_s4 = inlined_call_operand.vmem [shape: s32[2,256], index: 4, kind: input, shape index: {}]   ;;  %s6992_s5 = inlined_call_operand.hbm [shape: f32[2,8,256], index: 5, kind: output, shape index: {}]  }
   0x1   :  { %7213 = sst [smem:[#allocation75_spill]] %s6987_s0 }
   0x2   :  { %7214 = sst [smem:[#allocation76_spill]] %s6988_s1 }
   0x3   :  { %7215 = sst [smem:[#allocation77_spill]] %s6989_s2 }
   0x4   :  { %7216 = sst [smem:[#allocation78_spill]] %s6990_s3 }
   0x5   :  { %7217 = sst [smem:[#allocation79_spill]] %s6992_s5 }
   0x6   :  { %10 = vsyncpa [#allocation3], 0 }
   0x7   :  { %12 = vsyncpa [#allocation3 + $0x1], 0 }
   0x8   :  { %13 = vsyncpa [#allocation5], 0 }
   0x9   :  { %14 = vsyncpa [#allocation4], 0 }
   0xa   :  { %16 = vsyncpa [#allocation4 + $0x1], 0  ;;  %s3915_s18 = smov 0   ;;  %s3917_s19 = smov 0  }
   0xb   :  { %s3919_s20 = smov 0   ;;  %s3921_s21 = smov 0  }
   0xc LB: > { %7218 = sst [smem:[#allocation11_spill]] %s3816_s18  ;;  %s3936_s22 = sadd.s32 4294967295, %s3828_s21   ;;  %s3828_s21 = sphi %s3921_s21, %s7670_s21   ;;  %s3824_s20 = sphi %s3919_s20, %s7673_s20   ;;  %s3820_s19 = sphi %s3917_s19, %s7672_s19   ;;  %s3816_s18 = sphi %s3915_s18, %s7671_s18  }
   0xd   : > { %7219 = sst [smem:[#allocation12_spill]] %s3820_s19  ;;  %s3468_s23 = sadd.s32 4294967294, %s3828_s21  }
   0xe   : > { %7220 = sst [smem:[#allocation13_spill]] %s3824_s20  ;;  %p42_p0 = scmp.ne.s32.totalorder %s3820_s19, %s3816_s18 }
   0xf   : > { %7221 = sst [smem:[#allocation14_spill]] %s3828_s21  ;;  %p6993_p1 = scmp.eq.s32.totalorder %s3936_s22, 0 }
  0x10   : > { %7222 = sst [smem:[#allocation15_spill]] %s3936_s22  ;;  %p156_p3 = scmp.eq.s32.totalorder %s3468_s23, 1 }
  0x11   : > { %p3945_p4 = por %p6993_p1, %p42_p0  ;;  %p3469_p5 = scmp.ge.s32.totalorder %s3828_s21, 1 }
  0x12   : > { %p3950_p6 = por %p156_p3, %p42_p0  ;;  %p163_p7 = scmp.lt.s32.totalorder %s3828_s21, 3 }
  0x13   : > { %s7223_s24 = scalar_select %p3945_p4, 1, 0 }
  0x14   : > { %s7224_s25 = scalar_select %p3950_p6, 1, 0 }
  0x15   : > { %s7226_s3 = sld [smem:[#allocation78_spill]]  ;;  %p3958_p8 = pnand %p3469_p5, %p163_p7 }
  0x16   : > { %7225 = sst [smem:[#allocation16_spill]] %s7224_s25  ;;  %s3966_s30 = sadd.s32 1, %s3828_s21  }
  0x17   : > { %p3602_p10 = pneg %p3958_p8  ;;  %7228 = sst [smem:[#allocation17_spill]] %s3966_s30 }
  0x18   : > { %s26_s7 = ssub.s32 %s3828_s21, %s3966_s30  ;;  %s29_s9 = sadd.s32 1, %s3824_s20 }
  0x19   : > { %p3970_p11 = pnand %p3602_p10, %p6993_p1  ;;  %p3976_p12 = scmp.eq.s32.totalorder %s26_s7, 0 }
  0x1a   : > { %p36_p13 = scmp.ne.s32.totalorder %s3824_s20, %s3820_s19 }
  0x1b   : > { %s182_s28 = sshll.u32 %s7226_s3, 4  ;;  %p3715_p3 = pneg %p3970_p11  ;;  %s183_s28 = int_to_ptr.vmem [resolvable:$true] %s182_s28 }
  0x1c   : > { %s3713_s10 = scalar_lea.vmem %s183_s28, 16  ;;  %p3721_p9 = scmp.lt.s32.totalorder %s183_s28, %s183_s28 }
  0x1d   : > { %p3714_p0 = scmp.ne.s32.totalorder %s183_s28, %s3713_s10  ;;  %p3722_p2 = scmp.lt.s32.totalorder %s3713_s10, %s3713_s10 }
  0x1f   : > { %p3716_p5 = pnand %p3715_p3, %p3714_p0  ;;  %p3723_p10 = por %p3722_p2, %p3721_p9 }
  0x21   : > { %p3717_p7 = pneg %p3716_p5 }
  0x23   : > { %p3724_p1 = pnand %p3723_p10, %p3717_p7 }
  0x25   : > { %3727 = shalt.err (!%p3724_p1)
}
  0x26   : > { %s3830_s11 = smov [#allocation6]   ;;  %p37_p2 = scmp.eq.s32.totalorder %s3828_s21, 0 }
  0x27   : > { %3605 = dma.vmem_to_smem (!%p3970_p11), %s183_s28, 16, %s3830_s11, [#allocation5]  }
  0x28   : > { %s3990_s12 = scalar_select %p3976_p12, %s3824_s20, %s29_s9  }
  0x29   : > { %p7232_p1 = scmp.eq.s32.totalorder %s3936_s22, 1  ;;  %p3615_p0 = scmp.lt.s32.totalorder %s3828_s21, 2 }
  0x2a   : > { %7231 = sst [smem:[#allocation18_spill]] %s3990_s12  ;;  %s196_s14 = sand.u32 1, %s3824_s20  }
  0x2b   : > { %p3998_p9 = por %p7232_p1, %p36_p13  ;;  %p38_p3 = por %p37_p2, %p36_p13 }
  0x2c   : > { %s3472_s15 = sshll.u32 %s196_s14, 4  ;;  %s3585_s16 = sshll.u32 %s3828_s21, 8 }
  0x2d   : > { %s7233_s13 = scalar_select %p3998_p9, 1, 0 }
  0x2e   : > { %s7235_s0 = sld [smem:[#allocation75_spill]]  ;;  %s200_s27 = scalar_lea.vmem [#allocation2], %s3472_s15 }
  0x2f   : > { %7234 = sst [smem:[#allocation19_spill]] %s7233_s13  ;;  %s208_s28 = sshll.u32 %s200_s27, 4  ;;  %s4017_s28 = int_to_ptr.vmem [resolvable:$true] %s208_s28 }
  0x30   : > { %p4013_p11 = pnand %p3615_p0, %p38_p3  ;;  %s197_s7 = scalar_lea.sflag [#allocation3], %s196_s14 }
  0x32   : > { %p3730_p13 = pneg %p4013_p11 }
  0x34   : > { %s4011_s26 = scalar_lea.hbm %s7235_s0, %s3585_s16  ;;  %s3733_s11 = scalar_lea.hbm %s7235_s0, 512 }
  0x35   : > { %s3728_s8 = scalar_lea.hbm %s4011_s26, 256  ;;  %p3734_p10 = scmp.lt.u32.totalorder %s4011_s26, %s7235_s0 }
  0x36   : > { %p3729_p12 = scmp.ne.s32.totalorder %s4011_s26, %s3728_s8  ;;  %p3735_p2 = scmp.lt.u32.totalorder %s3733_s11, %s3728_s8 }
  0x37   : > { %p3737_p0 = scmp.lt.u32.totalorder %s3728_s8, %s4011_s26 }
  0x38   : > { %p3731_p5 = pnand %p3730_p13, %p3729_p12  ;;  %p3736_p1 = por %p3735_p2, %p3734_p10 }
  0x3a   : > { %p3732_p7 = pneg %p3731_p5  ;;  %p3738_p3 = por %p3737_p0, %p3736_p1 }
  0x3c   : > { %p3739_p6 = pnand %p3738_p3, %p3732_p7 }
  0x3e   : > { %3742 = shalt.err (!%p3739_p6)
}
  0x3f   : > { %s3743_s14 = scalar_lea.vmem %s4017_s28, 256  ;;  %s3831_s17 = smov [#allocation2]  }
  0x40   : > { %p3744_p12 = scmp.ne.s32.totalorder %s4017_s28, %s3743_s14  ;;  %s3748_s23 = sshll.u32 %s3831_s17, 4  ;;  %s3749_s23 = int_to_ptr.vmem [resolvable:$false] %s3748_s23 }
  0x41   : > { %s3750_s27 = scalar_lea.vmem %s3749_s23, 512  ;;  %p3751_p4 = scmp.lt.s32.totalorder %s4017_s28, %s3749_s23 }
  0x42   : > { %p3746_p5 = pnand %p3744_p12, %p3730_p13  ;;  %p3752_p10 = scmp.lt.s32.totalorder %s3750_s27, %s3743_s14 }
  0x44   : > { %p3747_p9 = pneg %p3746_p5  ;;  %p3753_p2 = por %p3752_p10, %p3751_p4 }
  0x46   : > { %p3754_p1 = pnand %p3753_p2, %p3747_p9 }
  0x48   : > { %3757 = shalt.err (!%p3754_p1)
}
  0x49   : > { %3609 = dma.hbm_to_vmem [thread:$0]  (!%p4013_p11), %s4011_s26, 256, %s4017_s28, %s197_s7  }
  0x4a   : > { %217 = sbr.rel (%p3958_p8) target bundleno = 1209 (0x4b9), region = 40 }
  0x51   : > { %s4047_s8 = sand.u32 1, %s3820_s19   ;;  %p7238_p4 = scmp.ne.s32.totalorder %s7223_s24, 0 }
  0x52   : > { %7237 = sst [smem:[#allocation20_spill]] %s4047_s8  ;;  %s6996_s9 = sshll.u32 %s4047_s8, 4 }
  0x53   : > { %s220_s10 = scalar_lea.sflag [#allocation3], %s4047_s8  ;;  %s223_s11 = scalar_lea.vmem [#allocation2], %s6996_s9 }
  0x54   : > { %3803 = dma.done.wait (%p7238_p4), %s220_s10, 256  }
  0x55   : > { %3805 = vsyncadd (%p7238_p4), %s220_s10, 4294967040  ;;  %p7239_p6 = scmp.eq.s32.totalorder %s3936_s22, 0 }
  0x57   : > { %3807 = dma.done.wait (%p7239_p6), [#allocation5], 16   ;;  %p7240_p8 = pmov %p7239_p6 }
  0x59   : > { %3809 = vsyncadd (%p7240_p8), [#allocation5], 4294967280 }
  0x5a   : > { %232 = sfence }
  0x5b   : > { %v255_v0 = vld [vmem:[%s223_s11] sm:$0xff]  ;;  %v256_v1 = vld [vmem:[%s223_s11 + $0x8] sm:$0xff]  ;;  %v3832_v3 = vmov 0.0   ;;  %vm3833_vm0 = vmmov 0   ;;  %s7241_s1 = sld [smem:[#allocation76_spill]]  ;;  %vm263_vm1 = vcmask 64512  }
  0x5c   : > { %v257_v2 = vadd.f32 %v256_v1, %v255_v0  ;;  %3589 = vmatprep.subr.mxu0 %v3832_v3  ;;  %3591 = vmatprep.mubr.msk.f32.mxu0 %vm3833_vm0, %v3832_v3  ;;  %v3834_v7 = vmov 0   ;;  %s7242_s2 = sld [smem:[#allocation77_spill]]  ;;  %s3835_s6 = smov 51  }
  0x5d   : > { %3703 = vset.pattern.permute.xlu0 %v3834_v7  ;;  %s3836_s7 = smov 50   ;;  %s3837_s15 = smov 49  }
  0x5e   : > { %258 = vadd.xlane.f32.xlu0 %v257_v2  ;;  %s3838_s16 = smov 48   ;;  %s6999_s14 = smov 47  }
  0x5f   : > { %s6997_s17 = smov 46   ;;  %s3841_s23 = smov 45  }
  0x60   : > { %s3842_s27 = smov 35   ;;  %s3843_s10 = smov 34  }
  0x61   : > { %v261_v6 = vld [vmem:[%s7241_s1] sm:$0xff]  ;;  %s3844_s11 = smov 33   ;;  %s3845_s29 = smov 32  }
  0x62   : > { %v262_v8 = vld [vmem:[%s7242_s2] sm:$0xff]  ;;  %s7014_s24 = smov 31   ;;  %s7013_s26 = smov 30  }
  0x63   : > { %s7001_s28 = smov 29   ;;  %s7003_s9 = smov 19  }
  0x64   : > { %s7331_s0 = smov 77   ;;  %s7332_s1 = smov 98  }
  0x65   : > { %s7334_s2 = smov 97   ;;  %s7336_s3 = smov 96  }
  0x66   : > { %s5058_s12 = sld [smem:[#allocation6 + $0x18]]  ;;  %s5062_s20 = sld [smem:[#allocation6 + $0x32]] }
  0x67   : > { %s5074_s19 = sld [smem:[#allocation6 + $0x34]]  ;;  %s5076_s30 = sld [smem:[#allocation6 + $0x35]] }
  0x68   : > { %s7346_s21 = smov 93   ;;  %s5096_s25 = sld [smem:[#allocation6 + $0x36]] }
  0x69   : > { %s5098_s18 = sld [smem:[#allocation6 + $0x37]]  ;;  %s5100_s5 = sld [smem:[#allocation6 + $0x38]] }
  0x6a   : > { %s5102_s13 = sld [smem:[#allocation6 + $0x39]]  ;;  %s5116_s8 = sld [smem:[#allocation6 + $0x3b]] }
  0x6b   : > { %s7353_s22 = smov 83  }
  0x70   : > { %7349 = sst [smem:[#allocation66_spill]] %s5102_s13  ;;  %s5526_s13 = sld [smem:[#allocation6 + $0x24]] }
  0x71   : > { %7352 = sst [smem:[#allocation69_spill]] %s5116_s8 }
  0x72   : > { %s5327_s8 = sld [smem:[#allocation6 + $0x1c]] }
  0xeb   : > { %v259_v4 = vpop.xlane.xlu0 %258 }
  0xec   : > { %v260_v5 = vmul.f32 0.00390625, %v259_v4 }
  0xee   : > { %3590 = vmatpush3.msra.mxu0 %v260_v5 }
  0xef   : > { %3592 = vmatmul.mubr.msk.f32.vlgmr.msra.gmra.mrb[0].mxu0 %vm263_vm1, %v261_v6 }
 0x1c2   : > { %v333_v9 = vpop.f32.mrb[0].mxu0 }
 0x1c3   : > { %v334_v10 = vadd.f32 %v333_v9, %v262_v8  ;;  %v3593_v11 = vpop.f32.mrb[1].mxu0 }
 0x1c5   : > { %v3480_v12 = vmul.f32 -1.442695, %v334_v10 }
 0x1c7   : > { %3704 = vpow2.f32 %v3480_v12 }
 0x1d1   : > { %v3705_v13 = vpop.eup %3704 }
 0x1d2   : > { %v340_v14 = vadd.f32 1.0, %v3705_v13 }
 0x1d4   : > { %3706 = vrcp.f32 %v340_v14 }
 0x1de   : > { %v3707_v15 = vpop.eup %3706 }
 0x1df   : > { %345 = vperm.xlu0 %3703, %v3707_v15  }
 0x25e   : > { %v346_v16 = vpop.permute.xlu0 %345 }
 0x25f   : > { %v4067_v17 = vmul.f32 %v346_v16, %v255_v0  ;;  %v4069_v18 = vmul.f32 %v346_v16, %v256_v1 }
 0x261   : > { %7243 = vst [vmem:[#allocation21_spill] sm:$0xff] %v4067_v17  ;;  %7244 = vst [vmem:[#allocation22_spill] sm:$0xff] %v4069_v18  ;;  %v350_v19 = vrot.slane %v4067_v17, 4  ;;  %v356_v20 = vrot.slane %v4069_v18, 4 }
 0x263   : > { %v365_v21 = vmax.f32 %v4067_v17, %v350_v19  ;;  %v371_v22 = vmax.f32 %v4069_v18, %v356_v20  ;;  %v351_v31 = vadd.f32 %v350_v19, %v4067_v17  ;;  %v357_v33 = vadd.f32 %v356_v20, %v4069_v18 }
 0x265   : > { %v366_v23 = vrot.slane %v365_v21, 2  ;;  %v372_v24 = vrot.slane %v371_v22, 2  ;;  %v352_v32 = vrot.slane %v351_v31, 2  ;;  %v358_v35 = vrot.slane %v357_v33, 2 }
 0x267   : > { %v367_v25 = vmax.f32 %v365_v21, %v366_v23  ;;  %v373_v26 = vmax.f32 %v371_v22, %v372_v24  ;;  %v353_v34 = vadd.f32 %v352_v32, %v351_v31  ;;  %v359_v37 = vadd.f32 %v358_v35, %v357_v33 }
 0x269   : > { %v368_v27 = vrot.slane %v367_v25, 1  ;;  %v374_v28 = vrot.slane %v373_v26, 1  ;;  %v354_v36 = vrot.slane %v353_v34, 1  ;;  %v360_v39 = vrot.slane %v359_v37, 1 }
 0x26b   : > { %v4079_v29 = vmax.f32 %v367_v25, %v368_v27  ;;  %v4081_v30 = vmax.f32 %v373_v26, %v374_v28  ;;  %v355_v38 = vadd.f32 %v354_v36, %v353_v34  ;;  %v361_v40 = vadd.f32 %v360_v39, %v359_v37 }
 0x26d   : > { %1937 = vrot.lane.b32.xlu1 %v4081_v30, %s3835_s6  ;;  %1935 = vrot.lane.b32.xlu0 %v4079_v29, %s3835_s6  ;;  %v4181_v41 = vmul.f32 0.125, %v355_v38  ;;  %v4187_v42 = vmul.f32 0.125, %v361_v40 }
 0x271   : > { %1966 = vrot.lane.b32.xlu1 %v4081_v30, %s3836_s7  ;;  %1964 = vrot.lane.b32.xlu0 %v4079_v29, %s3836_s7 }
 0x275   : > { %1995 = vrot.lane.b32.xlu1 %v4081_v30, %s3837_s15  ;;  %1993 = vrot.lane.b32.xlu0 %v4079_v29, %s3837_s15 }
 0x279   : > { %2024 = vrot.lane.b32.xlu1 %v4081_v30, %s3838_s16  ;;  %2022 = vrot.lane.b32.xlu0 %v4079_v29, %s3838_s16 }
 0x27d   : > { %2053 = vrot.lane.b32.xlu1 %v4081_v30, %s6999_s14  ;;  %2051 = vrot.lane.b32.xlu0 %v4079_v29, %s6999_s14  ;;  %s7005_s14 = smov 17  }
 0x281   : > { %2082 = vrot.lane.b32.xlu1 %v4081_v30, %s6997_s17  ;;  %2080 = vrot.lane.b32.xlu0 %v4079_v29, %s6997_s17  ;;  %s7015_s17 = smov 18  }
 0x285   : > { %2111 = vrot.lane.b32.xlu1 %v4081_v30, %s3841_s23  ;;  %2109 = vrot.lane.b32.xlu0 %v4079_v29, %s3841_s23 }
 0x289   : > { %2140 = vrot.lane.b32.xlu1 %v4081_v30, %s3842_s27  ;;  %2138 = vrot.lane.b32.xlu0 %v4079_v29, %s3842_s27 }
 0x28d   : > { %2169 = vrot.lane.b32.xlu1 %v4081_v30, %s3843_s10  ;;  %2167 = vrot.lane.b32.xlu0 %v4079_v29, %s3843_s10 }
 0x291   : > { %2198 = vrot.lane.b32.xlu1 %v4081_v30, %s3844_s11  ;;  %2196 = vrot.lane.b32.xlu0 %v4079_v29, %s3844_s11 }
 0x295   : > { %2227 = vrot.lane.b32.xlu1 %v4081_v30, %s3845_s29  ;;  %2225 = vrot.lane.b32.xlu0 %v4079_v29, %s3845_s29 }
 0x299   : > { %2256 = vrot.lane.b32.xlu1 %v4081_v30, %s7014_s24  ;;  %2254 = vrot.lane.b32.xlu0 %v4079_v29, %s7014_s24 }
 0x29d   : > { %2285 = vrot.lane.b32.xlu1 %v4081_v30, %s7013_s26  ;;  %2283 = vrot.lane.b32.xlu0 %v4079_v29, %s7013_s26 }
 0x2a1   : > { %2314 = vrot.lane.b32.xlu1 %v4081_v30, %s7001_s28  ;;  %2312 = vrot.lane.b32.xlu0 %v4079_v29, %s7001_s28  ;;  %s7007_s28 = smov 16  }
 0x2a5   : > { %2343 = vrot.lane.b32.xlu1 %v4081_v30, %s7003_s9  ;;  %2341 = vrot.lane.b32.xlu0 %v4079_v29, %s7003_s9  ;;  %s7009_s9 = smov 15  }
 0x2a9   : > { %2372 = vrot.lane.b32.xlu1 %v4081_v30, %s7015_s17  ;;  %2370 = vrot.lane.b32.xlu0 %v4079_v29, %s7015_s17 }
 0x2ad   : > { %2401 = vrot.lane.b32.xlu1 %v4081_v30, %s7005_s14  ;;  %2399 = vrot.lane.b32.xlu0 %v4079_v29, %s7005_s14  ;;  %s7011_s14 = smov 14  }
 0x2b1   : > { %2430 = vrot.lane.b32.xlu1 %v4081_v30, %s7007_s28  ;;  %2428 = vrot.lane.b32.xlu0 %v4079_v29, %s7007_s28  ;;  %s3855_s28 = smov 13  }
 0x2b5   : > { %2459 = vrot.lane.b32.xlu1 %v4081_v30, %s7009_s9  ;;  %2457 = vrot.lane.b32.xlu0 %v4079_v29, %s7009_s9  ;;  %s3856_s9 = smov 3  }
 0x2b9   : > { %2488 = vrot.lane.b32.xlu1 %v4081_v30, %s7011_s14  ;;  %2486 = vrot.lane.b32.xlu0 %v4079_v29, %s7011_s14  ;;  %s3857_s14 = smov 2  }
 0x2bd   : > { %2517 = vrot.lane.b32.xlu1 %v4081_v30, %s3855_s28  ;;  %2515 = vrot.lane.b32.xlu0 %v4079_v29, %s3855_s28 }
 0x2c1   : > { %2546 = vrot.lane.b32.xlu1 %v4081_v30, %s3856_s9  ;;  %2544 = vrot.lane.b32.xlu0 %v4079_v29, %s3856_s9 }
 0x2c5   : > { %2575 = vrot.lane.b32.xlu1 %v4081_v30, %s3857_s14  ;;  %2573 = vrot.lane.b32.xlu0 %v4079_v29, %s3857_s14 }
 0x2c9   : > { %609 = vrot.lane.b32.xlu0 %v4181_v41, %s3841_s23  ;;  %421 = vrot.lane.b32.xlu1 %v4181_v41, %s3835_s6 }
 0x2cd   : > { %640 = vrot.lane.b32.xlu0 %v4181_v41, %s3842_s27  ;;  %423 = vrot.lane.b32.xlu1 %v4187_v42, %s3835_s6  ;;  %s7245_s6 = smov 29  }
 0x2d1   : > { %671 = vrot.lane.b32.xlu0 %v4181_v41, %s3843_s10  ;;  %454 = vrot.lane.b32.xlu1 %v4181_v41, %s3836_s7 }
 0x2d5   : > { %702 = vrot.lane.b32.xlu0 %v4181_v41, %s3844_s11  ;;  %456 = vrot.lane.b32.xlu1 %v4187_v42, %s3836_s7  ;;  %s7246_s7 = smov 19  }
 0x2d9   : > { %733 = vrot.lane.b32.xlu0 %v4181_v41, %s3845_s29  ;;  %485 = vrot.lane.b32.xlu1 %v4181_v41, %s3837_s15 }
 0x2dd   : > { %764 = vrot.lane.b32.xlu0 %v4181_v41, %s7014_s24  ;;  %487 = vrot.lane.b32.xlu1 %v4187_v42, %s3837_s15  ;;  %s7247_s15 = smov 47   ;;  %s7252_s24 = smov 16  }
 0x2df   : > { %v4209_v43 = vpop.permute.xlu1 %1937  ;;  %v4211_v44 = vpop.permute.xlu0 %1935 }
 0x2e1   : > { %795 = vrot.lane.b32.xlu0 %v4181_v41, %s7013_s26  ;;  %516 = vrot.lane.b32.xlu1 %v4181_v41, %s3838_s16  ;;  %s7249_s26 = smov 46  }
 0x2e3   : > { %v4217_v45 = vpop.permute.xlu1 %1966  ;;  %v4219_v46 = vpop.permute.xlu0 %1964 }
 0x2e5   : > { %826 = vrot.lane.b32.xlu0 %v4181_v41, %s7245_s6  ;;  %518 = vrot.lane.b32.xlu1 %v4187_v42, %s3838_s16  ;;  %s7248_s16 = smov 17  }
 0x2e7   : > { %v4225_v47 = vpop.permute.xlu1 %1995  ;;  %v4227_v48 = vpop.permute.xlu0 %1993 }
 0x2e9   : > { %857 = vrot.lane.b32.xlu0 %v4181_v41, %s7246_s7  ;;  %547 = vrot.lane.b32.xlu1 %v4181_v41, %s7247_s15 }
 0x2eb   : > { %v4233_v49 = vpop.permute.xlu1 %2024  ;;  %v4235_v50 = vpop.permute.xlu0 %2022 }
 0x2ed   : > { %888 = vrot.lane.b32.xlu0 %v4181_v41, %s7015_s17  ;;  %549 = vrot.lane.b32.xlu1 %v4187_v42, %s7247_s15  ;;  %s7255_s15 = smov 15   ;;  %s7258_s17 = smov 14  }
 0x2ef   : > { %v4241_v51 = vpop.permute.xlu1 %2053  ;;  %v4243_v52 = vpop.permute.xlu0 %2051 }
 0x2f1   : > { %919 = vrot.lane.b32.xlu0 %v4181_v41, %s7248_s16  ;;  %578 = vrot.lane.b32.xlu1 %v4181_v41, %s7249_s26 }
 0x2f3   : > { %v4249_v53 = vpop.permute.xlu1 %2082  ;;  %v4251_v54 = vpop.permute.xlu0 %2080 }
 0x2f4   : > { %7250 = vst [vmem:[#allocation23_spill] sm:$0xff] %v4249_v53  ;;  %7251 = vst [vmem:[#allocation24_spill] sm:$0xff] %v4251_v54 }
 0x2f5   : > { %950 = vrot.lane.b32.xlu0 %v4181_v41, %s7252_s24  ;;  %580 = vrot.lane.b32.xlu1 %v4187_v42, %s7249_s26  ;;  %s7024_s26 = smov 125  }
 0x2f7   : > { %v4257_v55 = vpop.permute.xlu1 %2111  ;;  %v4259_v56 = vpop.permute.xlu0 %2109 }
 0x2f8   : > { %7253 = vst [vmem:[#allocation25_spill] sm:$0xff] %v4257_v55  ;;  %7254 = vst [vmem:[#allocation26_spill] sm:$0xff] %v4259_v56 }
 0x2f9   : > { %981 = vrot.lane.b32.xlu0 %v4181_v41, %s7255_s15  ;;  %611 = vrot.lane.b32.xlu1 %v4187_v42, %s3841_s23  ;;  %s7016_s23 = smov 1  }
 0x2fb   : > { %v4265_v57 = vpop.permute.xlu1 %2140  ;;  %v4267_v58 = vpop.permute.xlu0 %2138 }
 0x2fc   : > { %7256 = vst [vmem:[#allocation27_spill] sm:$0xff] %v4265_v57  ;;  %7257 = vst [vmem:[#allocation28_spill] sm:$0xff] %v4267_v58 }
 0x2fd   : > { %1012 = vrot.lane.b32.xlu0 %v4181_v41, %s7258_s17  ;;  %642 = vrot.lane.b32.xlu1 %v4187_v42, %s3842_s27  ;;  %s7267_s27 = smov 31  }
 0x2ff   : > { %v4273_v59 = vpop.permute.xlu1 %2169  ;;  %v4275_v60 = vpop.permute.xlu0 %2167 }
 0x300   : > { %7259 = vst [vmem:[#allocation29_spill] sm:$0xff] %v4273_v59  ;;  %7260 = vst [vmem:[#allocation30_spill] sm:$0xff] %v4275_v60 }
 0x301   : > { %1043 = vrot.lane.b32.xlu0 %v4181_v41, %s3855_s28  ;;  %673 = vrot.lane.b32.xlu1 %v4187_v42, %s3843_s10  ;;  %s7018_s10 = smov 127  }
 0x303   : > { %v4281_v61 = vpop.permute.xlu1 %2198  ;;  %v4283_v62 = vpop.permute.xlu0 %2196 }
 0x304   : > { %7261 = vst [vmem:[#allocation31_spill] sm:$0xff] %v4281_v61  ;;  %7262 = vst [vmem:[#allocation32_spill] sm:$0xff] %v4283_v62 }
 0x305   : > { %1074 = vrot.lane.b32.xlu0 %v4181_v41, %s3856_s9  ;;  %704 = vrot.lane.b32.xlu1 %v4187_v42, %s3844_s11  ;;  %s7270_s11 = smov 30  }
 0x307   : > { %v4289_v63 = vpop.permute.xlu1 %2227  ;;  %v4291_v0 = vpop.permute.xlu0 %2225 }
 0x308   : > { %7263 = vst [vmem:[#allocation33_spill] sm:$0xff] %v4289_v63  ;;  %7264 = vst [vmem:[#allocation34_spill] sm:$0xff] %v4291_v0 }
 0x309   : > { %1105 = vrot.lane.b32.xlu0 %v4181_v41, %s3857_s14  ;;  %735 = vrot.lane.b32.xlu1 %v4187_v42, %s3845_s29  ;;  %s7020_s29 = smov 126  }
 0x30b   : > { %v4297_v1 = vpop.permute.xlu1 %2256  ;;  %v4299_v2 = vpop.permute.xlu0 %2254 }
 0x30c   : > { %7265 = vst [vmem:[#allocation35_spill] sm:$0xff] %v4297_v1  ;;  %7266 = vst [vmem:[#allocation36_spill] sm:$0xff] %v4299_v2 }
 0x30d   : > { %1136 = vrot.lane.b32.xlu0 %v4181_v41, %s7016_s23  ;;  %766 = vrot.lane.b32.xlu1 %v4187_v42, %s7267_s27  ;;  %s7028_s27 = smov 115  }
 0x30f   : > { %v4305_v3 = vpop.permute.xlu1 %2285  ;;  %v4307_v4 = vpop.permute.xlu0 %2283 }
 0x310   : > { %7268 = vst [vmem:[#allocation37_spill] sm:$0xff] %v4305_v3  ;;  %7269 = vst [vmem:[#allocation38_spill] sm:$0xff] %v4307_v4 }
 0x311   : > { %1191 = vrot.lane.b32.xlu0 %v4181_v41, %s7018_s10  ;;  %797 = vrot.lane.b32.xlu1 %v4187_v42, %s7270_s11  ;;  %s7032_s11 = smov 114  }
 0x313   : > { %v4313_v5 = vpop.permute.xlu1 %2314  ;;  %v4315_v6 = vpop.permute.xlu0 %2312 }
 0x314   : > { %7271 = vst [vmem:[#allocation39_spill] sm:$0xff] %v4313_v5  ;;  %7272 = vst [vmem:[#allocation40_spill] sm:$0xff] %v4315_v6 }
 0x315   : > { %1222 = vrot.lane.b32.xlu0 %v4181_v41, %s7020_s29  ;;  %828 = vrot.lane.b32.xlu1 %v4187_v42, %s7245_s6  ;;  %s7277_s6 = smov 18  }
 0x317   : > { %v4321_v7 = vpop.permute.xlu1 %2343  ;;  %v4323_v8 = vpop.permute.xlu0 %2341 }
 0x318   : > { %7273 = vst [vmem:[#allocation41_spill] sm:$0xff] %v4321_v7  ;;  %7274 = vst [vmem:[#allocation42_spill] sm:$0xff] %v4323_v8 }
 0x319   : > { %1253 = vrot.lane.b32.xlu0 %v4181_v41, %s7024_s26  ;;  %859 = vrot.lane.b32.xlu1 %v4187_v42, %s7246_s7  ;;  %s7119_s7 = smov 113  }
 0x31b   : > { %v4329_v9 = vpop.permute.xlu1 %2372  ;;  %v4331_v10 = vpop.permute.xlu0 %2370 }
 0x31c   : > { %7275 = vst [vmem:[#allocation43_spill] sm:$0xff] %v4329_v9  ;;  %7276 = vst [vmem:[#allocation44_spill] sm:$0xff] %v4331_v10 }
 0x31d   : > { %1284 = vrot.lane.b32.xlu0 %v4181_v41, %s7028_s27  ;;  %890 = vrot.lane.b32.xlu1 %v4187_v42, %s7277_s6  ;;  %s7050_s6 = smov 112  }
 0x31f   : > { %v4337_v11 = vpop.permute.xlu1 %2401  ;;  %v4339_v12 = vpop.permute.xlu0 %2399 }
 0x320   : > { %7278 = vst [vmem:[#allocation45_spill] sm:$0xff] %v4337_v11  ;;  %7279 = vst [vmem:[#allocation46_spill] sm:$0xff] %v4339_v12 }
 0x321   : > { %1315 = vrot.lane.b32.xlu0 %v4181_v41, %s7032_s11  ;;  %921 = vrot.lane.b32.xlu1 %v4187_v42, %s7248_s16  ;;  %s7045_s16 = smov 111  }
 0x323   : > { %v4345_v13 = vpop.permute.xlu1 %2430  ;;  %v4347_v14 = vpop.permute.xlu0 %2428 }
 0x324   : > { %7280 = vst [vmem:[#allocation47_spill] sm:$0xff] %v4345_v13  ;;  %7281 = vst [vmem:[#allocation48_spill] sm:$0xff] %v4347_v14 }
 0x325   : > { %1346 = vrot.lane.b32.xlu0 %v4181_v41, %s7119_s7  ;;  %952 = vrot.lane.b32.xlu1 %v4187_v42, %s7252_s24  ;;  %s7085_s24 = smov 110  }
 0x327   : > { %v4353_v15 = vpop.permute.xlu1 %2459  ;;  %v4355_v16 = vpop.permute.xlu0 %2457 }
 0x328   : > { %7282 = vst [vmem:[#allocation49_spill] sm:$0xff] %v4353_v15  ;;  %7283 = vst [vmem:[#allocation50_spill] sm:$0xff] %v4355_v16 }
 0x329   : > { %1377 = vrot.lane.b32.xlu0 %v4181_v41, %s7050_s6  ;;  %983 = vrot.lane.b32.xlu1 %v4187_v42, %s7255_s15  ;;  %s7076_s15 = smov 109  }
 0x32b   : > { %v4361_v19 = vpop.permute.xlu1 %2488  ;;  %v4363_v20 = vpop.permute.xlu0 %2486 }
 0x32c   : > { %7284 = vst [vmem:[#allocation51_spill] sm:$0xff] %v4361_v19  ;;  %7285 = vst [vmem:[#allocation52_spill] sm:$0xff] %v4363_v20 }
 0x32d   : > { %1408 = vrot.lane.b32.xlu0 %v4181_v41, %s7045_s16  ;;  %1014 = vrot.lane.b32.xlu1 %v4187_v42, %s7258_s17  ;;  %s7063_s17 = smov 99  }
 0x32f   : > { %v4369_v21 = vpop.permute.xlu1 %2517  ;;  %v4371_v22 = vpop.permute.xlu0 %2515 }
 0x330   : > { %7286 = vst [vmem:[#allocation53_spill] sm:$0xff] %v4369_v21  ;;  %7287 = vst [vmem:[#allocation54_spill] sm:$0xff] %v4371_v22  ;;  %v425_v22 = vlaneseq  ;;  %v3879_v21 = vmov 1966171168  }
 0x331   : > { %1439 = vrot.lane.b32.xlu0 %v4181_v41, %s7085_s24  ;;  %1045 = vrot.lane.b32.xlu1 %v4187_v42, %s3855_s28  ;;  %s7070_s28 = smov 98   ;;  %v436_v20 = vunpack.c.l.s4 %v3879_v21  ;;  %v4466_v21 = vld [vmem:[%s6991_s4 + $0x1] ss:$2 sm:$0x3] }
 0x332   : > { %v4459_v14 = vshrl.u32 %v425_v22, 7  ;;  %v4468_v11 = vand.u32 127, %v425_v22  ;;  %vm409_vm3 = vcmp.ge.s32.totalorder %v4466_v21, 0  ;;  %v4484_v22 = vld [vmem:[%s6991_s4] ss:$2 sm:$0x3] }
 0x333   : > { %v4377_v23 = vpop.permute.xlu1 %2546  ;;  %v4379_v24 = vpop.permute.xlu0 %2544  ;;  %v437_v15 = vunpack.c.0.s8 %v436_v20  ;;  %vm410_vm5 = vcmp.lt.s32.totalorder %v4466_v21, 16  ;;  %vm379_vm6 = vcmp.ge.s32.totalorder %v4484_v22, 3  ;;  %vm380_vm8 = vcmp.lt.s32.totalorder %v4484_v22, 19 }
 0x334   : > { %7288 = vst [vmem:[#allocation55_spill] sm:$0xff] %v4377_v23  ;;  %7289 = vst [vmem:[#allocation56_spill] sm:$0xff] %v4379_v24  ;;  %vm7068_vm2 = vcmp.lt.s32.totalorder %v4468_v11, 50  ;;  %vm7069_vm4 = vcmp.lt.s32.totalorder %v4468_v11, 51  ;;  %vm7062_vm7 = vcmp.lt.s32.totalorder %v4468_v11, 49  ;;  %vm400_vm9 = vcmp.ge.s32.totalorder %v4466_v21, 3 }
 0x335   : > { %1470 = vrot.lane.b32.xlu0 %v4181_v41, %s7076_s15  ;;  %1076 = vrot.lane.b32.xlu1 %v4187_v42, %s3856_s9  ;;  %s7083_s9 = smov 97   ;;  %7292 = vst [vmem:[#allocation59_spill] sm:$0xff] %v4459_v14  ;;  %v4475_v20 = vsub.s32 %v437_v15, %v4459_v14  ;;  %vm401_vm10 = vcmp.lt.s32.totalorder %v4466_v21, 19  ;;  %vm403_vm11 = vcmp.ge.s32.totalorder %v4466_v21, 2  ;;  %vm7067_vm12 = vcmp.lt.s32.totalorder %v4468_v11, 48 }
 0x336   : > { %vm404_vm13 = vcmp.lt.s32.totalorder %v4466_v21, 18  ;;  %vm406_vm14 = vcmp.ge.s32.totalorder %v4466_v21, 1  ;;  %vm407_vm15 = vcmp.lt.s32.totalorder %v4466_v21, 17  ;;  %vm7072_vm0 = vcmp.lt.s32.totalorder %v4468_v11, 47 }
 0x337   : > { %v4385_v25 = vpop.permute.xlu1 %2575  ;;  %v4387_v26 = vpop.permute.xlu0 %2573  ;;  %vm7091_vm1 = vcmp.lt.s32.totalorder %v4468_v11, 35 }
 0x338   : > { %7290 = vst [vmem:[#allocation57_spill] sm:$0xff] %v4385_v25  ;;  %7291 = vst [vmem:[#allocation58_spill] sm:$0xff] %v4387_v26 }
 0x339   : > { %1501 = vrot.lane.b32.xlu0 %v4181_v41, %s7063_s17  ;;  %1107 = vrot.lane.b32.xlu1 %v4187_v42, %s3857_s14  ;;  %s7125_s14 = smov 96  }
 0x33b   : > { %v4393_v27 = vpop.permute.xlu0 %609  ;;  %v4395_v28 = vpop.permute.xlu1 %421 }
 0x33d   : > { %1532 = vrot.lane.b32.xlu0 %v4181_v41, %s7070_s28  ;;  %1138 = vrot.lane.b32.xlu1 %v4187_v42, %s7016_s23  ;;  %s7107_s23 = smov 95  }
 0x33f   : > { %v4401_v31 = vpop.permute.xlu0 %640  ;;  %v4403_v32 = vpop.permute.xlu1 %423 }
 0x340   : > { %v428_v8 = vsel %vm7069_vm4, %v4395_v28, %v4403_v32  ;;  %v429_v7 = vsel %vm7069_vm4, %v4403_v32, %v4395_v28  ;;  %vm416_vm4 = vcmp.lt.s32.totalorder %v4466_v21, 14 }
 0x341   : > { %1563 = vrot.lane.b32.xlu0 %v4181_v41, %s7083_s9  ;;  %1193 = vrot.lane.b32.xlu1 %v4187_v42, %s7018_s10  ;;  %s7101_s10 = smov 94   ;;  %v434_v5 = vcombine.low %v429_v7, %v428_v8 }
 0x343   : > { %v4409_v33 = vpop.permute.xlu0 %671  ;;  %v455_v34 = vpop.permute.xlu1 %454 }
 0x345   : > { %1594 = vrot.lane.b32.xlu0 %v4181_v41, %s7125_s14  ;;  %1224 = vrot.lane.b32.xlu1 %v4187_v42, %s7020_s29  ;;  %s7104_s29 = smov 93  }
 0x347   : > { %v4415_v35 = vpop.permute.xlu0 %702  ;;  %v457_v36 = vpop.permute.xlu1 %456 }
 0x348   : > { %v459_v15 = vsel %vm7068_vm2, %v455_v34, %v457_v36  ;;  %v460_v14 = vsel %vm7068_vm2, %v457_v36, %v455_v34  ;;  %vm7081_vm2 = vcmp.lt.s32.totalorder %v4468_v11, 45 }
 0x349   : > { %1625 = vrot.lane.b32.xlu0 %v4181_v41, %s7107_s23  ;;  %1255 = vrot.lane.b32.xlu1 %v4187_v42, %s7024_s26  ;;  %s7112_s26 = smov 83   ;;  %v465_v28 = vcombine.low %v460_v14, %v459_v15  ;;  %v441_v15 = vrot.slane %v434_v5, %v4475_v20 }
 0x34b   : > { %v4421_v37 = vpop.permute.xlu0 %733  ;;  %v486_v38 = vpop.permute.xlu1 %485  ;;  %v472_v8 = vrot.slane %v465_v28, %v4475_v20 }
 0x34d   : > { %1656 = vrot.lane.b32.xlu0 %v4181_v41, %s7101_s10  ;;  %1286 = vrot.lane.b32.xlu1 %v4187_v42, %s7028_s27  ;;  %s7039_s27 = smov 82   ;;  %v479_v28 = vrot.slane %v472_v8, %v4475_v20 }
 0x34f   : > { %v4427_v39 = vpop.permute.xlu0 %764  ;;  %v488_v40 = vpop.permute.xlu1 %487 }
 0x350   : > { %v490_v34 = vsel %vm7062_vm7, %v486_v38, %v488_v40  ;;  %v491_v36 = vsel %vm7062_vm7, %v488_v40, %v486_v38  ;;  %vm7075_vm7 = vcmp.lt.s32.totalorder %v4468_v11, 46 }
 0x351   : > { %1687 = vrot.lane.b32.xlu0 %v4181_v41, %s7104_s29  ;;  %1317 = vrot.lane.b32.xlu1 %v4187_v42, %s7032_s11  ;;  %s7047_s11 = smov 81   ;;  %v496_v38 = vcombine.low %v491_v36, %v490_v34 }
 0x353   : > { %v4433_v18 = vpop.permute.xlu0 %795  ;;  %v517_v17 = vpop.permute.xlu1 %516 }
 0x355   : > { %1718 = vrot.lane.b32.xlu0 %v4181_v41, %s7112_s26  ;;  %1348 = vrot.lane.b32.xlu1 %v4187_v42, %s7119_s7 }
 0x357   : > { %v4439_v26 = vpop.permute.xlu0 %826  ;;  %v519_v25 = vpop.permute.xlu1 %518 }
 0x358   : > { %v521_v4 = vsel %vm7067_vm12, %v517_v17, %v519_v25  ;;  %v522_v3 = vsel %vm7067_vm12, %v519_v25, %v517_v17  ;;  %vm413_vm12 = vcmp.lt.s32.totalorder %v4466_v21, 15 }
 0x359   : > { %1749 = vrot.lane.b32.xlu0 %v4181_v41, %s7039_s27  ;;  %1379 = vrot.lane.b32.xlu1 %v4187_v42, %s7050_s6  ;;  %s7123_s27 = smov 80   ;;  %s7078_s6 = smov 79   ;;  %v527_v14 = vcombine.low %v522_v3, %v521_v4  ;;  %v503_v4 = vrot.slane %v496_v38, %v4475_v20 }
 0x35b   : > { %v4445_v24 = vpop.permute.xlu0 %857  ;;  %v4447_v23 = vpop.permute.xlu1 %547  ;;  %v534_v38 = vrot.slane %v527_v14, %v4475_v20 }
 0x35d   : > { %1780 = vrot.lane.b32.xlu0 %v4181_v41, %s7047_s11  ;;  %1410 = vrot.lane.b32.xlu1 %v4187_v42, %s7045_s16  ;;  %s7065_s11 = smov 78   ;;  %s7073_s16 = smov 77  }
 0x35f   : > { %v4453_v19 = vpop.permute.xlu0 %888  ;;  %v550_v16 = vpop.permute.xlu1 %549 }
 0x360   : > { %v552_v17 = vsel %vm7072_vm0, %v4447_v23, %v550_v16  ;;  %v553_v7 = vsel %vm7072_vm0, %v550_v16, %v4447_v23  ;;  %vm4558_vm0 = vmand %vm409_vm3, %vm410_vm5  ;;  %vm418_vm5 = vcmp.ge.s32.totalorder %v4466_v21, 4294967293 }
 0x361   : > { %1811 = vrot.lane.b32.xlu0 %v4181_v41, %s7123_s27  ;;  %1441 = vrot.lane.b32.xlu1 %v4187_v42, %s7085_s24  ;;  %v558_v5 = vcombine.low %v553_v7, %v552_v17  ;;  %vm4573_vm3 = vmand %vm379_vm6, %vm380_vm8  ;;  %vm7090_vm8 = vcmp.lt.s32.totalorder %v4468_v11, 34  ;;  %s4640_s24 = sld [smem:[#allocation6 + $0x5]] }
 0x362   : > { %vm4593_vm6 = vmand %vm403_vm11, %vm404_vm13  ;;  %vm382_vm13 = vcmp.ge.s32.totalorder %v4484_v22, 2 }
 0x363   : > { %v4461_v13 = vpop.permute.xlu0 %919  ;;  %v579_v12 = vpop.permute.xlu1 %578  ;;  %vm4606_vm11 = vmand %vm400_vm9, %vm401_vm10  ;;  %vm7096_vm10 = vcmp.lt.s32.totalorder %v4468_v11, 33 }
 0x364   : > { %vm4623_vm9 = vmand %vm406_vm14, %vm407_vm15 }
 0x365   : > { %1842 = vrot.lane.b32.xlu0 %v4181_v41, %s7078_s6  ;;  %1472 = vrot.lane.b32.xlu1 %v4187_v42, %s7076_s15  ;;  %s4579_s15 = sld [smem:[#allocation6 + $0x3]]  ;;  %s4581_s6 = sld [smem:[#allocation6 + $0x4]]  ;;  %vm7092_vm14 = vmand %vm4573_vm3, %vm4593_vm6 }
 0x366   : > { %vm431_vm15 = vmand %vm4573_vm3, %vm4606_vm11 }
 0x367   : > { %v4479_v10 = vpop.permute.xlu0 %950  ;;  %v581_v9 = vpop.permute.xlu1 %580 }
 0x368   : > { %v583_v34 = vsel %vm7075_vm7, %v579_v12, %v581_v9  ;;  %v584_v16 = vsel %vm7075_vm7, %v581_v9, %v579_v12  ;;  %vm419_vm7 = vcmp.lt.s32.totalorder %v4466_v21, 13 }
 0x369   : > { %1873 = vrot.lane.b32.xlu0 %v4181_v41, %s7065_s11  ;;  %1503 = vrot.lane.b32.xlu1 %v4187_v42, %s7063_s17  ;;  %s4531_s17 = sld [smem:[#allocation6]]  ;;  %s4533_s11 = sld [smem:[#allocation6 + $0x1]]  ;;  %v589_v17 = vcombine.low %v584_v16, %v583_v34  ;;  %v565_v16 = vrot.slane %v558_v5, %v4475_v20 }
 0x36b   : > { %v4515_v32 = vpop.permute.xlu0 %981  ;;  %v612_v6 = vpop.permute.xlu1 %611  ;;  %v596_v0 = vrot.slane %v589_v17, %v4475_v20 }
 0x36c   : > { %v614_v12 = vsel %vm7081_vm2, %v4393_v27, %v612_v6  ;;  %v615_v23 = vsel %vm7081_vm2, %v612_v6, %v4393_v27  ;;  %vm383_vm2 = vcmp.lt.s32.totalorder %v4484_v22, 18  ;;  %v448_v27 = vrot.slane %v441_v15, %v4475_v20 }
 0x36d   : > { %1904 = vrot.lane.b32.xlu0 %v4181_v41, %s7073_s16  ;;  %1534 = vrot.lane.b32.xlu1 %v4187_v42, %s7070_s28  ;;  %s4548_s28 = sld [smem:[#allocation6 + $0x2]]  ;;  %s7295_s16 = smov 1   ;;  %v510_v15 = vrot.slane %v503_v4, %v4475_v20  ;;  %v620_v1 = vcombine.low %v615_v23, %v614_v12  ;;  %v481_v12 = vsel %vm7092_vm14, %v479_v28, 0.0  ;;  %v541_v23 = vrot.slane %v534_v38, %v4475_v20 }
 0x36f   : > { %v4544_v25 = vpop.permute.xlu0 %1012  ;;  %v643_v40 = vpop.permute.xlu1 %642  ;;  %v627_v61 = vrot.slane %v620_v1, %v4475_v20 }
 0x370   : > { %v645_v8 = vsel %vm7091_vm1, %v4401_v31, %v643_v40  ;;  %v646_v14 = vsel %vm7091_vm1, %v643_v40, %v4401_v31  ;;  %v451_v31 = vstv %s4531_s17  ;;  %v482_v40 = vstv %s4533_s11  ;;  %s4659_s17 = sld [smem:[#allocation6 + $0x6]]  ;;  %s4719_s11 = sld [smem:[#allocation6 + $0x7]] }
 0x371   : > { %2602 = vrot.lane.b32.xlu0 %v4079_v29, %s7295_s16  ;;  %1565 = vrot.lane.b32.xlu1 %v4187_v42, %s7083_s9  ;;  %s7304_s9 = smov 127   ;;  %v651_v63 = vcombine.low %v646_v14, %v645_v8  ;;  %vm7305_vm1 = vcmp.ge.s32.totalorder %v4466_v21, 4294967295  ;;  %v572_v14 = vrot.slane %v565_v16, %v4475_v20 }
 0x372   : > { %vm4683_vm14 = vmand %vm7305_vm1, %vm413_vm12  ;;  %vm7138_vm1 = vcmp.lt.s32.totalorder %v4468_v11, 32 }
 0x373   : > { %v4600_v7 = vpop.permute.xlu0 %1043  ;;  %v674_v2 = vpop.permute.xlu1 %673  ;;  %v513_v28 = vstv %s4548_s28  ;;  %s7308_s28 = smov 126   ;;  %vm7117_vm12 = vmand %vm4573_vm3, %vm4558_vm0 }
 0x374   : > { %v676_v4 = vsel %vm7090_vm8, %v4409_v33, %v674_v2  ;;  %v677_v5 = vsel %vm7090_vm8, %v674_v2, %v4409_v33  ;;  %vm7095_vm8 = vmand %vm4573_vm3, %vm4623_vm9  ;;  %v450_v33 = vsel %vm431_vm15, %v448_v27, 0.0  ;;  %v543_v16 = vsel %vm7117_vm12, %v541_v23, 0.0 }
 0x375   : > { %2654 = vrot.lane.b32.xlu0 %v4079_v29, %s7304_s9  ;;  %1596 = vrot.lane.b32.xlu1 %v4187_v42, %s7125_s14  ;;  %v512_v27 = vsel %vm7095_vm8, %v510_v15, 0.0  ;;  %v682_v60 = vcombine.low %v677_v5, %v676_v4  ;;  %v544_v15 = vstv %s4579_s15  ;;  %vm7309_vm8 = vcmp.ge.s32.totalorder %v4466_v21, 4294967294  ;;  %s7314_s15 = smov 125   ;;  %s7330_s14 = smov 99  }
 0x376   : > { %v603_v4 = vrot.slane %v596_v0, %v4475_v20  ;;  %v452_v58 = vmul.f32 %v451_v31, %v450_v33  ;;  %v514_v57 = vmul.f32 %v513_v28, %v512_v27  ;;  %v634_v33 = vrot.slane %v627_v61, %v4475_v20 }
 0x377   : > { %v4661_v62 = vpop.permute.xlu0 %1074  ;;  %v705_v2 = vpop.permute.xlu1 %704  ;;  %v545_v61 = vmul.f32 %v544_v15, %v543_v16  ;;  %v606_v28 = vstv %s4640_s24  ;;  %s4797_s24 = sld [smem:[#allocation6 + $0xa]]  ;;  %vm386_vm12 = vcmp.lt.s32.totalorder %v4484_v22, 17 }
 0x378   : > { %v707_v38 = vsel %vm7096_vm10, %v4415_v35, %v705_v2  ;;  %v708_v17 = vsel %vm7096_vm10, %v705_v2, %v4415_v35  ;;  %v483_v35 = vmul.f32 %v482_v40, %v481_v12  ;;  %v575_v2 = vstv %s4581_s6  ;;  %vm4709_vm10 = vmand %vm7309_vm8, %vm416_vm4  ;;  %s4748_s6 = sld [smem:[#allocation6 + $0x8]] }
 0x379   : > { %2683 = vrot.lane.b32.xlu0 %v4079_v29, %s7308_s28  ;;  %1627 = vrot.lane.b32.xlu1 %v4187_v42, %s7107_s23  ;;  %v658_v40 = vrot.slane %v651_v63, %v4475_v20  ;;  %v713_v5 = vcombine.low %v708_v17, %v707_v38  ;;  %vm7100_vm4 = vmand %vm4573_vm3, %vm4683_vm14  ;;  %v637_v17 = vstv %s4659_s17  ;;  %s7318_s17 = smov 115   ;;  %s7319_s23 = smov 114  }
 0x37a   : > { %vm4738_vm8 = vmand %vm418_vm5, %vm419_vm7  ;;  %v574_v31 = vsel %vm7100_vm4, %v572_v14, 0.0  ;;  %vm7118_vm5 = vcmp.lt.s32.totalorder %v4468_v11, 31  ;;  %v484_v21 = vadd.f32 %v483_v35, %v452_v58 }
 0x37b   : > { %v4722_v12 = vpop.permute.xlu0 %1105  ;;  %v736_v59 = vpop.permute.xlu1 %735  ;;  %vm7106_vm7 = vmand %vm4573_vm3, %vm4709_vm10  ;;  %v665_v27 = vrot.slane %v658_v40, %v4475_v20  ;;  %v720_v58 = vrot.slane %v713_v5, %v4475_v20  ;;  %v576_v16 = vmul.f32 %v575_v2, %v574_v31  ;;  %v668_v31 = vstv %s4719_s11  ;;  %s4838_s11 = sld [smem:[#allocation6 + $0xc]] }
 0x37c   : > { %v738_v0 = vsel %vm7138_vm1, %v4421_v37, %v736_v59  ;;  %v739_v63 = vsel %vm7138_vm1, %v736_v59, %v4421_v37  ;;  %v689_v59 = vrot.slane %v682_v60, %v4475_v20  ;;  %vm4765_vm4 = vmand %vm382_vm13, %vm383_vm2  ;;  %v7315_v60 = vmov 0 }
 0x37d   : > { %v744_v37 = vcombine.low %v739_v63, %v738_v0  ;;  %2712 = vrot.lane.b32.xlu0 %v4079_v29, %s7314_s15  ;;  %1658 = vrot.lane.b32.xlu1 %v4187_v42, %s7101_s10  ;;  %v7316_v60 = vsel %vm4765_vm4, 4294967295, %v7315_v60  ;;  %v605_v38 = vsel %vm7106_vm7, %v603_v4, 0.0  ;;  %s4776_s10 = sld [smem:[#allocation6 + $0x9]]  ;;  %vm7103_vm2 = vmand %vm4573_vm3, %vm4738_vm8  ;;  %v515_v15 = vadd.f32 %v514_v57, %v484_v21 }
 0x37e   : > { %7317 = vst [vmem:[#allocation60_spill] sm:$0xff] %v7316_v60  ;;  %v636_v5 = vsel %vm7103_vm2, %v634_v33, 0.0  ;;  %v696_v0 = vrot.slane %v689_v59, %v4475_v20  ;;  %vm7109_vm13 = vmand %vm4765_vm4, %vm4606_vm11  ;;  %vm7110_vm2 = vcmp.lt.s32.totalorder %v4468_v11, 30  ;;  %v607_v63 = vmul.f32 %v606_v28, %v605_v38 }
 0x37f   : > { %v4779_v14 = vpop.permute.xlu0 %1136  ;;  %v767_v35 = vpop.permute.xlu1 %766  ;;  %v751_v57 = vrot.slane %v744_v37, %v4475_v20  ;;  %v667_v33 = vsel %vm7109_vm13, %v665_v27, 0.0  ;;  %v727_v59 = vrot.slane %v720_v58, %v4475_v20  ;;  %vm7111_vm7 = vmand %vm4765_vm4, %vm4593_vm6  ;;  %v638_v28 = vmul.f32 %v637_v17, %v636_v5 }
 0x380   : > { %v769_v4 = vsel %vm7118_vm5, %v4427_v39, %v767_v35  ;;  %v770_v40 = vsel %vm7118_vm5, %v767_v35, %v4427_v39  ;;  %v546_v39 = vadd.f32 %v545_v61, %v515_v15  ;;  %v699_v58 = vstv %s4748_s6  ;;  %vm7114_vm13 = vmand %vm4765_vm4, %vm4623_vm9  ;;  %s4859_s6 = sld [smem:[#allocation6 + $0xd]] }
 0x381   : > { %v775_v2 = vcombine.low %v770_v40, %v769_v4  ;;  %2741 = vrot.lane.b32.xlu0 %v4079_v29, %s7318_s17  ;;  %1689 = vrot.lane.b32.xlu1 %v4187_v42, %s7104_s29  ;;  %s4816_s29 = sld [smem:[#allocation6 + $0xb]]  ;;  %v698_v15 = vsel %vm7111_vm7, %v696_v0, 0.0  ;;  %v758_v4 = vrot.slane %v751_v57, %v4475_v20  ;;  %v729_v5 = vsel %vm7114_vm13, %v727_v59, 0.0  ;;  %vm7116_vm7 = vmand %vm4765_vm4, %vm4558_vm0 }
 0x382   : > { %v577_v61 = vadd.f32 %v576_v16, %v546_v39  ;;  %v669_v16 = vmul.f32 %v668_v31, %v667_v33  ;;  %v700_v31 = vmul.f32 %v699_v58, %v698_v15  ;;  %vm7120_vm13 = vmand %vm4765_vm4, %vm4683_vm14 }
 0x383   : > { %v782_v37 = vrot.slane %v775_v2, %v4475_v20  ;;  %v4819_v21 = vpop.permute.xlu0 %1191  ;;  %v798_v35 = vpop.permute.xlu1 %797  ;;  %v730_v40 = vstv %s4776_s10  ;;  %s7320_s10 = smov 82   ;;  %vm7121_vm5 = vmand %vm4765_vm4, %vm4709_vm10 }
 0x384   : > { %v800_v38 = vsel %vm7110_vm2, %v4433_v18, %v798_v35  ;;  %v801_v27 = vsel %vm7110_vm2, %v798_v35, %v4433_v18  ;;  %vm7115_vm2 = vcmp.lt.s32.totalorder %v4468_v11, 29  ;;  %v608_v18 = vadd.f32 %v607_v63, %v577_v61 }
 0x385   : > { %v806_v17 = vcombine.low %v801_v27, %v800_v38  ;;  %2770 = vrot.lane.b32.xlu0 %v4079_v29, %s7319_s23  ;;  %1720 = vrot.lane.b32.xlu1 %v4187_v42, %s7112_s26  ;;  %v789_v0 = vrot.slane %v782_v37, %v4475_v20  ;;  %v761_v37 = vstv %s4797_s24  ;;  %v760_v35 = vsel %vm7116_vm7, %v758_v4, 0.0  ;;  %s4882_s26 = sld [smem:[#allocation6 + $0xe]]  ;;  %s7322_s24 = smov 81  }
 0x386   : > { %v639_v63 = vadd.f32 %v638_v28, %v608_v18  ;;  %vm7122_vm7 = vcmp.lt.s32.totalorder %v4468_v11, 19  ;;  %v731_v38 = vmul.f32 %v730_v40, %v729_v5 }
 0x387   : > { %v813_v57 = vrot.slane %v806_v17, %v4475_v20  ;;  %v4857_v2 = vpop.permute.xlu0 %1222  ;;  %v829_v39 = vpop.permute.xlu1 %828  ;;  %v792_v27 = vstv %s4816_s29  ;;  %v791_v58 = vsel %vm7120_vm13, %v789_v0, 0.0  ;;  %v823_v0 = vstv %s4838_s11  ;;  %s7321_s29 = smov 112   ;;  %vm7130_vm13 = vmand %vm4765_vm4, %vm4738_vm8  ;;  %s7325_s11 = smov 111  }
 0x388   : > { %v831_v33 = vsel %vm7115_vm2, %v4439_v26, %v829_v39  ;;  %v832_v59 = vsel %vm7115_vm2, %v829_v39, %v4439_v26  ;;  %vm385_vm2 = vcmp.ge.s32.totalorder %v4484_v22, 1  ;;  %v670_v26 = vadd.f32 %v669_v16, %v639_v63 }
 0x389   : > { %v820_v61 = vrot.slane %v813_v57, %v4475_v20  ;;  %v837_v28 = vcombine.low %v832_v59, %v831_v33  ;;  %2799 = vrot.lane.b32.xlu0 %v4079_v29, %s7119_s7  ;;  %1751 = vrot.lane.b32.xlu1 %v4187_v42, %s7320_s10  ;;  %v762_v16 = vmul.f32 %v761_v37, %v760_v35  ;;  %s4921_s7 = sld [smem:[#allocation6 + $0xf]]  ;;  %v7323_v33 = vmov 0 }
 0x38a   : > { %v701_v18 = vadd.f32 %v700_v31, %v670_v26  ;;  %v793_v31 = vmul.f32 %v792_v27, %v791_v58  ;;  %v854_v59 = vstv %s4859_s6  ;;  %s7327_s6 = smov 79  }
 0x38b   : > { %v844_v15 = vrot.slane %v837_v28, %v4475_v20  ;;  %v4898_v4 = vpop.permute.xlu0 %1253  ;;  %v860_v17 = vpop.permute.xlu1 %859  ;;  %v822_v57 = vsel %vm7121_vm5, %v820_v61, 0.0  ;;  %vm4931_vm5 = vmand %vm385_vm2, %vm386_vm12 }
 0x38c   : > { %v862_v40 = vsel %vm7122_vm7, %v4445_v24, %v860_v17  ;;  %v863_v5 = vsel %vm7122_vm7, %v860_v17, %v4445_v24  ;;  %v732_v24 = vadd.f32 %v731_v38, %v701_v18  ;;  %v7324_v33 = vsel %vm4931_vm5, 4294967295, %v7323_v33  ;;  %vm7128_vm12 = vmand %vm4931_vm5, %vm4606_vm11 }
 0x38d   : > { %v851_v39 = vrot.slane %v844_v15, %v4475_v20  ;;  %v868_v63 = vcombine.low %v863_v5, %v862_v40  ;;  %2828 = vrot.lane.b32.xlu0 %v4079_v29, %s7321_s29  ;;  %1782 = vrot.lane.b32.xlu1 %v4187_v42, %s7322_s24  ;;  %vm7133_vm7 = vcmp.lt.s32.totalorder %v4468_v11, 18  ;;  %v824_v38 = vmul.f32 %v823_v0, %v822_v57  ;;  %vm7127_vm2 = vmand %vm4931_vm5, %vm4593_vm6 }
 0x38e   : > { %v763_v26 = vadd.f32 %v762_v16, %v732_v24  ;;  %v885_v15 = vstv %s4882_s26  ;;  %s7326_s26 = smov 110  }
 0x38f   : > { %v853_v37 = vsel %vm7130_vm13, %v851_v39, 0.0  ;;  %v875_v35 = vrot.slane %v868_v63, %v4475_v20  ;;  %v4943_v61 = vpop.permute.xlu0 %1284  ;;  %v891_v28 = vpop.permute.xlu1 %890  ;;  %v916_v24 = vstv %s4921_s7  ;;  %s7328_s7 = smov 109   ;;  %vm7342_vm13 = vcmp.lt.s32.totalorder %v4468_v11, 51 }
 0x390   : > { %v893_v27 = vsel %vm7133_vm7, %v4453_v19, %v891_v28  ;;  %v894_v58 = vsel %vm7133_vm7, %v891_v28, %v4453_v19  ;;  %v794_v16 = vadd.f32 %v793_v31, %v763_v26  ;;  %v855_v40 = vmul.f32 %v854_v59, %v853_v37  ;;  %vm7343_vm7 = vmmov %vm7342_vm13 }
 0x391   : > { %v882_v17 = vrot.slane %v875_v35, %v4475_v20  ;;  %v899_v18 = vcombine.low %v894_v58, %v893_v27  ;;  %2857 = vrot.lane.b32.xlu0 %v4079_v29, %s7325_s11  ;;  %1813 = vrot.lane.b32.xlu1 %v4187_v42, %s7123_s27  ;;  %s7329_s27 = smov 78   ;;  %v1939_v60 = vsel %vm7342_vm13, %v4211_v44, %v4209_v43 }
 0x392   : > { %v825_v39 = vadd.f32 %v824_v38, %v794_v16  ;;  %v1940_v56 = vsel %vm7343_vm7, %v4209_v43, %v4211_v44  ;;  %vm7347_vm7 = vcmp.lt.s32.totalorder %v4468_v11, 50 }
 0x393   : > { %v884_v19 = vsel %vm7128_vm12, %v882_v17, 0.0  ;;  %v906_v5 = vrot.slane %v899_v18, %v4475_v20  ;;  %v4967_v0 = vpop.permute.xlu0 %1315  ;;  %v4969_v57 = vpop.permute.xlu1 %921  ;;  %vm389_vm12 = vcmp.lt.s32.totalorder %v4484_v22, 16  ;;  %v1968_v43 = vsel %vm7347_vm7, %v4219_v46, %v4217_v45  ;;  %vm7348_vm13 = vmmov %vm7347_vm7 }
 0x394   : > { %v886_v63 = vmul.f32 %v885_v15, %v884_v19  ;;  %v856_v31 = vadd.f32 %v855_v40, %v825_v39  ;;  %v1969_v44 = vsel %vm7348_vm13, %v4217_v45, %v4219_v46  ;;  %v1944_v45 = vcombine.low %v1940_v56, %v1939_v60 }
 0x395   : > { %v913_v35 = vrot.slane %v906_v5, %v4475_v20  ;;  %2886 = vrot.lane.b32.xlu0 %v4079_v29, %s7326_s26  ;;  %1844 = vrot.lane.b32.xlu1 %v4187_v42, %s7327_s6  ;;  %v1973_v46 = vcombine.low %v1969_v44, %v1968_v43  ;;  %vm7171_vm13 = vcmp.lt.s32.totalorder %v4468_v11, 17 }
 0x396   : > { %v887_v26 = vadd.f32 %v886_v63, %v856_v31  ;;  %v1171_v31 = vcombine.low %v4181_v41, %v4187_v42 }
 0x397   : > { %v915_v59 = vsel %vm7127_vm2, %v913_v35, 0.0  ;;  %v4986_v37 = vpop.permute.xlu0 %1346  ;;  %v4988_v28 = vpop.permute.xlu1 %952  ;;  %vm388_vm2 = vcmp.ge.s32.totalorder %v4484_v22, 0 }
 0x398   : > { %v917_v38 = vmul.f32 %v916_v24, %v915_v59  ;;  %v2634_v59 = vcombine.low %v4079_v29, %v4081_v30  ;;  %vm5080_vm1 = vmand %vm388_vm2, %vm389_vm12  ;;  %vm7358_vm2 = vcmp.lt.s32.totalorder %v4468_v11, 49 }
 0x399   : > { %2915 = vrot.lane.b32.xlu0 %v4079_v29, %s7328_s7  ;;  %1875 = vrot.lane.b32.xlu1 %v4187_v42, %s7329_s27  ;;  %vm1168_vm12 = vmand %vm5080_vm1, %vm4558_vm0 }
 0x39a   : > { %v4994_v27 = vadd.f32 %v917_v38, %v887_v26  ;;  %v2641_v38 = vrot.slane %v2634_v59, %v4475_v20  ;;  %vm7359_vm7 = vmmov %vm7358_vm2 }
 0x39b   : > { %v4996_v58 = vpop.permute.xlu0 %1377  ;;  %v4998_v15 = vpop.permute.xlu1 %983 }
 0x39c   : > { %v2648_v54 = vrot.slane %v2641_v38, %v4475_v20 }
 0x39d   : > { %2944 = vrot.lane.b32.xlu0 %v4079_v29, %s7330_s14  ;;  %1906 = vrot.lane.b32.xlu1 %v4187_v42, %s7331_s0  ;;  %v1178_v42 = vrot.slane %v1171_v31, %v4475_v20  ;;  %v7344_v31 = vmov 0 }
 0x39e   : > { %v7345_v31 = vsel %vm5080_vm1, 4294967295, %v7344_v31  ;;  %v2650_v43 = vsel %vm1168_vm12, %v2648_v54, 0.0  ;;  %v1998_v54 = vsel %vm7359_vm7, %v4225_v47, %v4227_v48 }
 0x39f   : > { %v5004_v17 = vpop.permute.xlu0 %1408  ;;  %v5006_v18 = vpop.permute.xlu1 %1014  ;;  %v1185_v55 = vrot.slane %v1178_v42, %v4475_v20  ;;  %v1188_v42 = vstv %s5058_s12  ;;  %s5191_s12 = sld [smem:[#allocation6 + $0x10]] }
 0x3a1   : > { %2973 = vrot.lane.b32.xlu0 %v4079_v29, %s7332_s1  ;;  %2604 = vrot.lane.b32.xlu1 %v4081_v30, %s7295_s16  ;;  %s7338_s16 = smov 95   ;;  %v1187_v38 = vsel %vm1168_vm12, %v1185_v55, 0.0  ;;  %vm7170_vm12 = vcmp.lt.s32.totalorder %v4468_v11, 16 }
 0x3a3   : > { %v5012_v16 = vpop.permute.xlu0 %1439  ;;  %v5014_v40 = vpop.permute.xlu1 %1045 }
 0x3a4   : > { %7333 = vst [vmem:[#allocation61_spill] sm:$0xff] %v5012_v16 }
 0x3a5   : > { %3002 = vrot.lane.b32.xlu0 %v4079_v29, %s7334_s2  ;;  %2656 = vrot.lane.b32.xlu1 %v4081_v30, %s7304_s9  ;;  %s7340_s9 = smov 94  }
 0x3a7   : > { %v5020_v19 = vpop.permute.xlu0 %1470  ;;  %v5022_v5 = vpop.permute.xlu1 %1076 }
 0x3a8   : > { %7335 = vst [vmem:[#allocation62_spill] sm:$0xff] %v5020_v19 }
 0x3a9   : > { %3031 = vrot.lane.b32.xlu0 %v4079_v29, %s7336_s3  ;;  %2685 = vrot.lane.b32.xlu1 %v4081_v30, %s7308_s28  ;;  %s5050_s28 = sld [smem:[#allocation6 + $0x49]] }
 0x3ab   : > { %v5028_v39 = vpop.permute.xlu0 %1501  ;;  %v5030_v63 = vpop.permute.xlu1 %1107 }
 0x3ac   : > { %7337 = vst [vmem:[#allocation63_spill] sm:$0xff] %v5028_v39  ;;  %v1980_v39 = vrot.slane %v1973_v46, %v4475_v20 }
 0x3ad   : > { %3060 = vrot.lane.b32.xlu0 %v4079_v29, %s7338_s16  ;;  %2714 = vrot.lane.b32.xlu1 %v4081_v30, %s7314_s15  ;;  %s5052_s15 = sld [smem:[#allocation6 + $0x31]]  ;;  %s5124_s16 = sld [smem:[#allocation6 + $0x3d]] }
 0x3af   : > { %v5036_v24 = vpop.permute.xlu0 %1532  ;;  %v5038_v35 = vpop.permute.xlu1 %1138  ;;  %v2651_v44 = vstv %s5050_s28  ;;  %s5234_s28 = sld [smem:[#allocation6 + $0x13]] }
 0x3b0   : > { %7339 = vst [vmem:[#allocation64_spill] sm:$0xff] %v5036_v24  ;;  %v5154_v24 = vmul.f32 %v1188_v42, %v1187_v38  ;;  %v924_v42 = vsel %vm7171_vm13, %v4461_v13, %v4969_v57  ;;  %v925_v38 = vsel %vm7171_vm13, %v4969_v57, %v4461_v13  ;;  %v955_v57 = vsel %vm7170_vm12, %v4479_v10, %v4988_v28 }
 0x3b1   : > { %3089 = vrot.lane.b32.xlu0 %v4079_v29, %s7340_s9  ;;  %2743 = vrot.lane.b32.xlu1 %v4081_v30, %s7318_s17  ;;  %s5064_s17 = sld [smem:[#allocation6 + $0x33]]  ;;  %s5122_s9 = sld [smem:[#allocation6 + $0x3c]] }
 0x3b3   : > { %v5054_v26 = vpop.permute.xlu0 %1563  ;;  %v5056_v41 = vpop.permute.xlu1 %1193  ;;  %7356 = sst [smem:[#allocation71_spill]] %s5124_s16  ;;  %v1961_v53 = vstv %s5052_s15  ;;  %s7364_s15 = smov 80  }
 0x3b4   : > { %7341 = vst [vmem:[#allocation65_spill] sm:$0xff] %v5054_v26  ;;  %v5156_v26 = vmul.f32 %v2651_v44, %v2650_v43  ;;  %v1987_v43 = vrot.slane %v1980_v39, %v4475_v20  ;;  %v956_v39 = vsel %vm7170_vm12, %v4988_v28, %v4479_v10  ;;  %s5250_s16 = sld [smem:[#allocation6 + $0x14]]  ;;  %vm7174_vm12 = vmand %vm4931_vm5, %vm4709_vm10 }
 0x3b5   : > { %3118 = vrot.lane.b32.xlu0 %v4079_v29, %s7346_s21  ;;  %2772 = vrot.lane.b32.xlu1 %v4081_v30, %s7319_s23  ;;  %s5114_s23 = sld [smem:[#allocation6 + $0x3a]]  ;;  %s7354_s21 = smov 113  }
 0x3b7   : > { %v5104_v22 = vpop.permute.xlu0 %1594  ;;  %v5106_v59 = vpop.permute.xlu1 %1224  ;;  %7355 = sst [smem:[#allocation70_spill]] %s5122_s9 }
 0x3b8   : > { %7350 = vst [vmem:[#allocation67_spill] sm:$0xff] %v5104_v22  ;;  %v1951_v22 = vrot.slane %v1944_v45, %v4475_v20  ;;  %s5252_s9 = sld [smem:[#allocation6 + $0x15]] }
 0x3b9   : > { %3147 = vrot.lane.b32.xlu0 %v4079_v29, %s7353_s22  ;;  %2801 = vrot.lane.b32.xlu1 %v4081_v30, %s7354_s21  ;;  %s5152_s21 = sld [smem:[#allocation6 + $0x3e]] }
 0x3ba   : > { %v1958_v45 = vrot.slane %v1951_v22, %v4475_v20 }
 0x3bb   : > { %7351 = sst [smem:[#allocation68_spill]] %s5114_s23  ;;  %v5126_v56 = vpop.permute.xlu0 %1625  ;;  %v5128_v60 = vpop.permute.xlu1 %1255  ;;  %s5423_s23 = sld [smem:[#allocation6 + $0x21]] }
 0x3bc   : > { %7357 = vst [vmem:[#allocation72_spill] sm:$0xff] %v5126_v56  ;;  %v1997_v56 = vsel %vm7358_vm2, %v4227_v48, %v4225_v47  ;;  %vm7361_vm2 = vcmp.lt.s32.totalorder %v4468_v11, 48  ;;  %v930_v47 = vcombine.low %v925_v38, %v924_v42  ;;  %v961_v42 = vcombine.low %v956_v39, %v955_v57 }
 0x3bd   : > { %3176 = vrot.lane.b32.xlu0 %v4079_v29, %s7320_s10  ;;  %2830 = vrot.lane.b32.xlu1 %v4081_v30, %s7321_s29  ;;  %v2002_v46 = vcombine.low %v1998_v54, %v1997_v56  ;;  %v2026_v22 = vsel %vm7361_vm2, %v4235_v50, %v4233_v49  ;;  %vm7362_vm7 = vmmov %vm7361_vm2  ;;  %vm7158_vm2 = vcmp.lt.s32.totalorder %v4468_v11, 15  ;;  %s5216_s29 = sld [smem:[#allocation6 + $0x11]] }
 0x3be   : > { %v2027_v13 = vsel %vm7362_vm7, %v4233_v49, %v4235_v50  ;;  %v1960_v50 = vsel %vm431_vm15, %v1958_v45, 0.0  ;;  %v986_v10 = vsel %vm7158_vm2, %v4515_v32, %v4998_v15  ;;  %v987_v28 = vsel %vm7158_vm2, %v4998_v15, %v4515_v32  ;;  %vm7363_vm15 = vmand %vm4573_vm3, %vm4593_vm6 }
 0x3bf   : > { %7360 = sst [smem:[#allocation73_spill]] %s5152_s21  ;;  %v5162_v48 = vpop.permute.xlu0 %1656  ;;  %v5164_v55 = vpop.permute.xlu1 %1286  ;;  %v5214_v16 = vrot.slane %v2002_v46, %v4475_v20  ;;  %v1989_v45 = vsel %vm7363_vm15, %v1987_v43, 0.0  ;;  %v2031_v46 = vcombine.low %v2027_v13, %v2026_v22  ;;  %vm7162_vm7 = vcmp.lt.s32.totalorder %v4468_v11, 14 }
 0x3c0   : > { %vm7163_vm2 = vcmp.lt.s32.totalorder %v4468_v11, 13  ;;  %v1017_v15 = vsel %vm7162_vm7, %v4544_v25, %v5006_v18  ;;  %v1018_v38 = vsel %vm7162_vm7, %v5006_v18, %v4544_v25  ;;  %v5254_v43 = vmul.f32 %v1961_v53, %v1960_v50  ;;  %s5278_s21 = sld [smem:[#allocation6 + $0x17]] }
 0x3c1   : > { %3205 = vrot.lane.b32.xlu0 %v4079_v29, %s7322_s24  ;;  %2859 = vrot.lane.b32.xlu1 %v4081_v30, %s7325_s11  ;;  %s5218_s11 = sld [smem:[#allocation6 + $0x12]]  ;;  %vm7168_vm15 = vcmp.lt.s32.totalorder %v4468_v11, 3  ;;  %v937_v22 = vrot.slane %v930_v47, %v4475_v20  ;;  %v992_v13 = vcombine.low %v987_v28, %v986_v10  ;;  %v7365_v32 = vstv %s5062_s20  ;;  %s5304_s20 = sld [smem:[#allocation6 + $0x19]] }
 0x3c2   : > { %v5264_v54 = vmul.f32 %v7365_v32, %v1989_v45  ;;  %v1048_v53 = vsel %vm7163_vm2, %v4600_v7, %v5014_v40  ;;  %v1049_v18 = vsel %vm7163_vm2, %v5014_v40, %v4600_v7  ;;  %v5281_v47 = vrot.slane %v2031_v46, %v4475_v20 }
 0x3c3   : > { %v5204_v44 = vpop.permute.xlu0 %1687  ;;  %v5206_v49 = vpop.permute.xlu1 %1317  ;;  %vm7165_vm7 = vcmp.lt.s32.totalorder %v4468_v11, 2  ;;  %v968_v50 = vrot.slane %v961_v42, %v4475_v20  ;;  %v1023_v10 = vcombine.low %v1018_v38, %v1017_v15  ;;  %vm7366_vm2 = vcmp.lt.s32.totalorder %v4468_v11, 47 }
 0x3c4   : > { %v5293_v7 = vsel %vm7366_vm2, %v4243_v52, %v4241_v51  ;;  %v947_v40 = vstv %s5191_s12  ;;  %v1079_v28 = vsel %vm7168_vm15, %v4661_v62, %v5022_v5  ;;  %v1080_v45 = vsel %vm7168_vm15, %v5022_v5, %v4661_v62  ;;  %s5325_s12 = sld [smem:[#allocation6 + $0x1b]] }
 0x3c5   : > { %3234 = vrot.lane.b32.xlu0 %v4079_v29, %s7364_s15  ;;  %2888 = vrot.lane.b32.xlu1 %v4081_v30, %s7326_s26  ;;  %s5276_s26 = sld [smem:[#allocation6 + $0x16]]  ;;  %v944_v46 = vrot.slane %v937_v22, %v4475_v20  ;;  %v999_v42 = vrot.slane %v992_v13, %v4475_v20  ;;  %v1054_v32 = vcombine.low %v1049_v18, %v1048_v53  ;;  %vm7166_vm2 = vcmp.lt.s32.totalorder %v4468_v11, 1 }
 0x3c6   : > { %v978_v56 = vstv %s5216_s29  ;;  %v1110_v5 = vsel %vm7165_vm7, %v4722_v12, %v5030_v63  ;;  %v1111_v22 = vsel %vm7165_vm7, %v5030_v63, %v4722_v12  ;;  %v975_v13 = vrot.slane %v968_v50, %v4475_v20  ;;  %s5332_s29 = sld [smem:[#allocation6 + $0x1d]]  ;;  %vm7167_vm7 = vmand %vm4931_vm5, %vm4623_vm9 }
 0x3c7   : > { %v5258_v57 = vpop.permute.xlu0 %1718  ;;  %v5260_v39 = vpop.permute.xlu1 %1348  ;;  %v1009_v62 = vstv %s5218_s11  ;;  %v1030_v18 = vrot.slane %v1023_v10, %v4475_v20  ;;  %v1085_v19 = vcombine.low %v1080_v45, %v1079_v28  ;;  %v1141_v50 = vsel %vm7166_vm2, %v4779_v14, %v5038_v35  ;;  %s5380_s11 = sld [smem:[#allocation6 + $0x1f]] }
 0x3c8   : > { %v1142_v10 = vsel %vm7166_vm2, %v5038_v35, %v4779_v14  ;;  %v946_v28 = vsel %vm7167_vm7, %v944_v46, 0.0  ;;  %v1006_v45 = vrot.slane %v999_v42, %v4475_v20  ;;  %v1061_v25 = vrot.slane %v1054_v32, %v4475_v20  ;;  %vm7169_vm2 = vmand %vm4931_vm5, %vm4558_vm0 }
 0x3c9   : > { %3263 = vrot.lane.b32.xlu0 %v4079_v29, %s7327_s6  ;;  %2917 = vrot.lane.b32.xlu1 %v4081_v30, %s7328_s7  ;;  %s5306_s7 = sld [smem:[#allocation6 + $0x1a]]  ;;  %v1116_v63 = vcombine.low %v1111_v22, %v1110_v5  ;;  %vm7175_vm7 = vcmp.lt.s32.totalorder %v4468_v11, 127  ;;  %vm7177_vm15 = vcmp.lt.s32.totalorder %v4468_v11, 126  ;;  %v977_v46 = vsel %vm7169_vm2, %v975_v13, 0.0  ;;  %vm7172_vm2 = vmand %vm4931_vm5, %vm4683_vm14 }
 0x3ca   : > { %v1037_v42 = vrot.slane %v1030_v18, %v4475_v20  ;;  %v1092_v32 = vrot.slane %v1085_v19, %v4475_v20  ;;  %v1147_v5 = vcombine.low %v1142_v10, %v1141_v50  ;;  %v948_v22 = vmul.f32 %v947_v40, %v946_v28 }
 0x3cb   : > { %v5311_v15 = vpop.permute.xlu0 %1749  ;;  %v5313_v38 = vpop.permute.xlu1 %1379  ;;  %v1133_v14 = vstv %s5276_s26  ;;  %v1068_v19 = vrot.slane %v1061_v25, %v4475_v20  ;;  %v1123_v50 = vrot.slane %v1116_v63, %v4475_v20  ;;  %v979_v28 = vmul.f32 %v978_v56, %v977_v46  ;;  %s7380_s26 = smov 94  }
 0x3cc   : > { %v1281_v18 = vstv %s5325_s12  ;;  %v1039_v25 = vsel %vm7174_vm12, %v1037_v42, 0.0  ;;  %v1099_v63 = vrot.slane %v1092_v32, %v4475_v20  ;;  %v1154_v13 = vrot.slane %v1147_v5, %v4475_v20  ;;  %s6362_s12 = sld [smem:[#allocation6 + $0x43]] }
 0x3cd   : > { %3292 = vrot.lane.b32.xlu0 %v4079_v29, %s7329_s27  ;;  %2946 = vrot.lane.b32.xlu1 %v4081_v30, %s7330_s14  ;;  %s5359_s14 = sld [smem:[#allocation6 + $0x1e]]  ;;  %v949_v56 = vadd.f32 %v948_v22, %v4994_v27  ;;  %v1196_v42 = vsel %vm7175_vm7, %v4819_v21, %v5056_v41  ;;  %v1197_v32 = vsel %vm7175_vm7, %v5056_v41, %v4819_v21  ;;  %vm7178_vm7 = vmand %vm5080_vm1, %vm4606_vm11  ;;  %v7367_v41 = vstv %s5234_s28 }
 0x3ce   : > { %v1130_v27 = vrot.slane %v1123_v50, %v4475_v20  ;;  %v1227_v50 = vsel %vm7177_vm15, %v4857_v2, %v5106_v59  ;;  %vm7372_vm12 = vcmp.lt.s32.totalorder %v4468_v11, 115  ;;  %s5550_s28 = sld [smem:[#allocation6 + $0x26]] }
 0x3cf   : > { %v5361_v12 = vpop.permute.xlu0 %1780  ;;  %v5363_v53 = vpop.permute.xlu1 %1410  ;;  %v980_v21 = vadd.f32 %v979_v28, %v949_v56  ;;  %v1101_v28 = vsel %vm7178_vm7, %v1099_v63, 0.0  ;;  %v1202_v56 = vcombine.low %v1196_v42, %v1197_v32  ;;  %v5495_v63 = vld [vmem:[%s6991_s4] ss:$2 sm:$0x3] }
 0x3d1   : > { %3321 = vrot.lane.b32.xlu0 %v4079_v29, %s7331_s0  ;;  %2975 = vrot.lane.b32.xlu1 %v4081_v30, %s7332_s1  ;;  %v1008_v29 = vsel %vm7172_vm2, %v1006_v45, 0.0  ;;  %s5401_s1 = sld [smem:[#allocation6 + $0x20]]  ;;  %vm7176_vm2 = vmand %vm4931_vm5, %vm4738_vm8 }
 0x3d2   : > { %v1010_v46 = vmul.f32 %v1009_v62, %v1008_v29  ;;  %v1070_v5 = vsel %vm7176_vm2, %v1068_v19, 0.0  ;;  %v1041_v19 = vmul.f32 %v7367_v41, %v1039_v25  ;;  %v1228_v62 = vsel %vm7177_vm15, %v5106_v59, %v4857_v2  ;;  %vm7180_vm2 = vmand %vm5080_vm1, %vm4593_vm6 }
 0x3d3   : > { %v5403_v40 = vpop.permute.xlu0 %1811  ;;  %v5405_v10 = vpop.permute.xlu1 %1441  ;;  %v1161_v25 = vrot.slane %v1154_v13, %v4475_v20  ;;  %v7368_v59 = vstv %s5250_s16  ;;  %vm7369_vm15 = vcmp.lt.s32.totalorder %v4468_v11, 125  ;;  %v1289_v41 = vsel %vm7372_vm12, %v4943_v61, %v5164_v55  ;;  %s7374_s16 = smov 95  }
 0x3d4   : > { %v1011_v2 = vadd.f32 %v1010_v46, %v980_v21  ;;  %v1072_v35 = vmul.f32 %v7368_v59, %v1070_v5  ;;  %v1258_v45 = vsel %vm7369_vm15, %v4898_v4, %v5128_v60  ;;  %vm7370_vm7 = vmmov %vm7369_vm15  ;;  %v7371_v21 = vstv %s5252_s9  ;;  %s5548_s9 = sld [smem:[#allocation6 + $0x25]] }
 0x3d5   : > { %3004 = vrot.lane.b32.xlu1 %v4081_v30, %s7334_s2  ;;  %s5450_s2 = sld [smem:[#allocation6 + $0x22]]  ;;  %v1259_v13 = vsel %vm7370_vm7, %v5128_v60, %v4898_v4  ;;  %vm7181_vm15 = vmand %vm5080_vm1, %vm4623_vm9  ;;  %v1132_v4 = vsel %vm7180_vm2, %v1130_v27, 0.0  ;;  %v1233_v60 = vcombine.low %v1227_v50, %v1228_v62  ;;  %v1103_v59 = vmul.f32 %v7371_v21, %v1101_v28 }
 0x3d6   : > { %v1042_v5 = vadd.f32 %v1041_v19, %v1011_v2  ;;  %vm7373_vm2 = vmmov %vm7372_vm12  ;;  %v1209_v62 = vrot.slane %v1202_v56, %v4475_v20  ;;  %v1264_v50 = vcombine.low %v1258_v45, %v1259_v13  ;;  %v1467_v46 = vstv %s5423_s23  ;;  %s6011_s23 = sld [smem:[#allocation6 + $0x2e]] }
 0x3d7   : > { %v5448_v22 = vpop.permute.xlu0 %1842  ;;  %v5452_v29 = vpop.permute.xlu1 %1472  ;;  %v1290_v27 = vsel %vm7373_vm2, %v5164_v55, %v4943_v61  ;;  %v1163_v19 = vsel %vm7181_vm15, %v1161_v25, 0.0  ;;  %v1134_v55 = vmul.f32 %v1133_v14, %v1132_v4  ;;  %vm7375_vm12 = vcmp.lt.s32.totalorder %v4468_v11, 114 }
 0x3d8   : > { %v1073_v61 = vadd.f32 %v1072_v35, %v1042_v5  ;;  %v1320_v45 = vsel %vm7375_vm12, %v4967_v0, %v5206_v49  ;;  %vm7376_vm2 = vmmov %vm7375_vm12  ;;  %v1240_v25 = vrot.slane %v1233_v60, %v4475_v20  ;;  %v1295_v56 = vcombine.low %v1289_v41, %v1290_v27 }
 0x3d9   : > { %3033 = vrot.lane.b32.xlu1 %v4081_v30, %s7336_s3  ;;  %s5499_s3 = sld [smem:[#allocation6 + $0x23]]  ;;  %v1321_v28 = vsel %vm7376_vm2, %v5206_v49, %v4967_v0  ;;  %vm7377_vm12 = vcmp.lt.s32.totalorder %v4468_v11, 113  ;;  %v7379_v41 = vstv %s5278_s21  ;;  %v1216_v60 = vrot.slane %v1209_v62, %v4475_v20  ;;  %s7390_s21 = smov 93  }
 0x3da   : > { %v1104_v13 = vadd.f32 %v1103_v59, %v1073_v61  ;;  %v1351_v0 = vsel %vm7377_vm12, %v4986_v37, %v5260_v39  ;;  %vm7378_vm2 = vmmov %vm7377_vm12  ;;  %v1165_v4 = vmul.f32 %v7379_v41, %v1163_v19  ;;  %v1271_v5 = vrot.slane %v1264_v50, %v4475_v20 }
 0x3db   : > { %v5512_v42 = vpop.permute.xlu0 %1873  ;;  %v5514_v32 = vpop.permute.xlu1 %1503  ;;  %v1498_v35 = vstv %s5450_s2  ;;  %v1352_v49 = vsel %vm7378_vm2, %v5260_v39, %v4986_v37  ;;  %v1326_v21 = vcombine.low %v1320_v45, %v1321_v28  ;;  %vm7182_vm12 = vmand %vm5080_vm1, %vm4683_vm14  ;;  %vm7381_vm2 = vcmp.lt.s32.totalorder %v4468_v11, 112  ;;  %s6405_s2 = sld [smem:[#allocation6 + $0x46]] }
 0x3dc   : > { %v1135_v59 = vadd.f32 %v1134_v55, %v1104_v13  ;;  %v1382_v37 = vsel %vm7381_vm2, %v4996_v58, %v5313_v38  ;;  %vm7382_vm7 = vmmov %vm7381_vm2  ;;  %v1247_v62 = vrot.slane %v1240_v25, %v4475_v20  ;;  %v1302_v50 = vrot.slane %v1295_v56, %v4475_v20 }
 0x3dd   : > { %3062 = vrot.lane.b32.xlu1 %v4081_v30, %s7374_s16  ;;  %v1383_v39 = vsel %vm7382_vm7, %v5313_v38, %v4996_v58  ;;  %v1357_v19 = vcombine.low %v1351_v0, %v1352_v49  ;;  %vm7383_vm7 = vcmp.lt.s32.totalorder %v4468_v11, 111  ;;  %v1218_v25 = vsel %vm7182_vm12, %v1216_v60, 0.0  ;;  %v7391_v0 = vld [vmem:[#allocation61_spill] sm:$0xff]  ;;  %s6452_s16 = sld [smem:[#allocation6 + $0x48]] }
 0x3de   : > { %v1413_v58 = vsel %vm7383_vm7, %v5004_v17, %v5363_v53  ;;  %vm7384_vm13 = vmmov %vm7383_vm7  ;;  %v1166_v28 = vadd.f32 %v1165_v4, %v1135_v59  ;;  %v1278_v56 = vrot.slane %v1271_v5, %v4475_v20  ;;  %vm7385_vm15 = vcmp.lt.s32.totalorder %v5495_v63, 15 }
 0x3df   : > { %v5555_v14 = vpop.permute.xlu0 %1904  ;;  %v5557_v2 = vpop.permute.xlu1 %1534  ;;  %v1414_v38 = vsel %vm7384_vm13, %v5363_v53, %v5004_v17  ;;  %vm7386_vm2 = vcmp.ge.s32.totalorder %v5495_v63, 4294967295  ;;  %v7387_v13 = vmov 0  ;;  %v1333_v17 = vrot.slane %v1326_v21, %v4475_v20  ;;  %vm7394_vm13 = vmand %vm5080_vm1, %vm4709_vm10 }
 0x3e0   : > { %vm5617_vm7 = vmand %vm7386_vm2, %vm7385_vm15  ;;  %v1388_v53 = vcombine.low %v1382_v37, %v1383_v39  ;;  %vm7392_vm15 = vcmp.lt.s32.totalorder %v4468_v11, 110  ;;  %v1249_v5 = vsel %vm7394_vm13, %v1247_v62, 0.0  ;;  %v1309_v21 = vrot.slane %v1302_v50, %v4475_v20 }
 0x3e1   : > { %3091 = vrot.lane.b32.xlu1 %v4081_v30, %s7380_s26  ;;  %v7388_v13 = vsel %vm5617_vm7, 4294967295, %v7387_v13  ;;  %v1444_v49 = vsel %vm7392_vm15, %v7391_v0, %v5405_v10  ;;  %vm7393_vm2 = vmmov %vm7392_vm15  ;;  %v1364_v59 = vrot.slane %v1357_v19, %v4475_v20  ;;  %v1419_v37 = vcombine.low %v1413_v58, %v1414_v38  ;;  %s6484_s26 = sld [smem:[#allocation6 + $0x4c]] }
 0x3e2   : > { %7389 = vst [vmem:[#allocation74_spill] sm:$0xff] %v7388_v13  ;;  %v1445_v41 = vsel %vm7393_vm2, %v5405_v10, %v7391_v0  ;;  %v7395_v45 = vstv %s5304_s20  ;;  %v7396_v10 = vld [vmem:[#allocation62_spill] sm:$0xff]  ;;  %vm7397_vm13 = vcmp.lt.s32.totalorder %v4468_v11, 109  ;;  %v1190_v19 = vadd.f32 %v5154_v24, %v1166_v28  ;;  %vm7399_vm2 = vmand %vm5080_vm1, %vm4738_vm8  ;;  %v7401_v24 = vld [vmem:[#allocation63_spill] sm:$0xff]  ;;  %s6075_s20 = sld [smem:[#allocation6 + $0x30]] }
 0x3e3   : > { %v5589_v61 = vpop.permute.xlu0 %2602  ;;  %v5592_v55 = vpop.permute.xlu1 %1565  ;;  %v1220_v27 = vmul.f32 %v7395_v45, %v1218_v25  ;;  %v1475_v62 = vsel %vm7397_vm13, %v7396_v10, %v5452_v29  ;;  %vm7398_vm12 = vmmov %vm7397_vm13  ;;  %v1280_v58 = vsel %vm7399_vm2, %v1278_v56, 0.0  ;;  %v1340_v38 = vrot.slane %v1333_v17, %v4475_v20 }
 0x3e4   : > { %v1476_v50 = vsel %vm7398_vm12, %v5452_v29, %v7396_v10  ;;  %v1395_v45 = vrot.slane %v1388_v53, %v4475_v20  ;;  %v1450_v25 = vcombine.low %v1444_v49, %v1445_v41  ;;  %v7400_v29 = vstv %s5306_s7  ;;  %vm7185_vm12 = vmand %vm5617_vm7, %vm4593_vm6  ;;  %s6168_s7 = sld [smem:[#allocation6 + $0x3f]] }
 0x3e5   : > { %3120 = vrot.lane.b32.xlu1 %v4081_v30, %s7390_s21  ;;  %v1251_v10 = vmul.f32 %v7400_v29, %v1249_v5  ;;  %vm7402_vm2 = vcmp.lt.s32.totalorder %v4468_v11, 99  ;;  %vm7404_vm15 = vmand %vm5617_vm7, %vm4606_vm11  ;;  %v1371_v53 = vrot.slane %v1364_v59, %v4475_v20  ;;  %v1426_v49 = vrot.slane %v1419_v37, %v4475_v20  ;;  %s6496_s21 = sld [smem:[#allocation6 + $0x4d]] }
 0x3e6   : > { %v1506_v28 = vsel %vm7402_vm2, %v7401_v24, %v5514_v32  ;;  %vm7403_vm13 = vmmov %vm7402_vm2  ;;  %v1311_v17 = vsel %vm7404_vm15, %v1309_v21, 0.0  ;;  %v1481_v41 = vcombine.low %v1475_v62, %v1476_v50  ;;  %v1282_v29 = vmul.f32 %v1281_v18, %v1280_v58 }
 0x3e7   : > { %v1597_v39 = vpop.permute.xlu1 %1596  ;;  %v5671_v0 = vpop.permute.xlu0 %2654  ;;  %v1507_v56 = vsel %vm7403_vm13, %v5514_v32, %v7401_v24  ;;  %vm7186_vm13 = vmand %vm5617_vm7, %vm4623_vm9  ;;  %v7405_v32 = vld [vmem:[#allocation64_spill] sm:$0xff]  ;;  %vm7406_vm15 = vcmp.lt.s32.totalorder %v4468_v11, 98  ;;  %v1221_v37 = vadd.f32 %v1220_v27, %v1190_v19  ;;  %v1342_v18 = vsel %vm7185_vm12, %v1340_v38, 0.0  ;;  %v7409_v27 = vld [vmem:[#allocation65_spill] sm:$0xff] }
 0x3e8   : > { %v1537_v21 = vsel %vm7406_vm15, %v7405_v32, %v5557_v2  ;;  %vm7407_vm5 = vmmov %vm7406_vm15  ;;  %v1402_v62 = vrot.slane %v1395_v45, %v4475_v20  ;;  %v1457_v50 = vrot.slane %v1450_v25, %v4475_v20  ;;  %v1512_v58 = vcombine.low %v1506_v28, %v1507_v56 }
 0x3e9   : > { %3149 = vrot.lane.b32.xlu1 %v4081_v30, %s7353_s22  ;;  %v1538_v59 = vsel %vm7407_vm5, %v5557_v2, %v7405_v32  ;;  %v7408_v24 = vstv %s5327_s8  ;;  %vm7187_vm5 = vmand %vm5617_vm7, %vm4558_vm0  ;;  %vm7410_vm12 = vcmp.lt.s32.totalorder %v4468_v11, 97  ;;  %v1252_v45 = vadd.f32 %v1251_v10, %v1221_v37  ;;  %s5773_s22 = sld [smem:[#allocation6 + $0x27]]  ;;  %s5866_s8 = sld [smem:[#allocation6 + $0x28]] }
 0x3ea   : > { %v1313_v2 = vmul.f32 %v7408_v24, %v1311_v17  ;;  %v1568_v19 = vsel %vm7410_vm12, %v7409_v27, %v5592_v55  ;;  %vm7411_vm2 = vmmov %vm7410_vm12  ;;  %v1373_v25 = vsel %vm7186_vm13, %v1371_v53, 0.0  ;;  %v1433_v28 = vrot.slane %v1426_v49, %v4475_v20 }
 0x3eb   : > { %v1628_v5 = vpop.permute.xlu1 %1627  ;;  %v1569_v38 = vsel %vm7411_vm2, %v5592_v55, %v7409_v27  ;;  %v1488_v56 = vrot.slane %v1481_v41, %v4475_v20  ;;  %v1543_v17 = vcombine.low %v1537_v21, %v1538_v59  ;;  %v5743_v32 = vpop.permute.xlu0 %2683  ;;  %v7412_v60 = vstv %s5332_s29  ;;  %vm7193_vm12 = vmand %vm5617_vm7, %vm4683_vm14  ;;  %v7413_v55 = vld [vmem:[#allocation67_spill] sm:$0xff]  ;;  %s7548_s29 = sld [smem:[#allocation70_spill]] }
 0x3ec   : > { %v1344_v4 = vmul.f32 %v7412_v60, %v1342_v18  ;;  %vm7414_vm2 = vcmp.lt.s32.totalorder %v4468_v11, 96  ;;  %v1283_v49 = vadd.f32 %v1282_v29, %v1252_v45  ;;  %v1404_v60 = vsel %vm7187_vm5, %v1402_v62, 0.0  ;;  %v7417_v29 = vld [vmem:[#allocation72_spill] sm:$0xff] }
 0x3ed   : > { %3178 = vrot.lane.b32.xlu1 %v4081_v30, %s7320_s10  ;;  %v1599_v10 = vsel %vm7414_vm2, %v7413_v55, %v1597_v39  ;;  %vm7415_vm13 = vmmov %vm7414_vm2  ;;  %v1464_v41 = vrot.slane %v1457_v50, %v4475_v20  ;;  %v1519_v21 = vrot.slane %v1512_v58, %v4475_v20  ;;  %v1574_v59 = vcombine.low %v1568_v19, %v1569_v38  ;;  %s5878_s10 = sld [smem:[#allocation6 + $0x29]] }
 0x3ee   : > { %v1600_v53 = vsel %vm7415_vm13, %v1597_v39, %v7413_v55  ;;  %v7416_v37 = vstv %s5359_s14  ;;  %vm7418_vm5 = vcmp.lt.s32.totalorder %v4468_v11, 95  ;;  %v1314_v50 = vadd.f32 %v1313_v2, %v1283_v49  ;;  %s6389_s14 = sld [smem:[#allocation6 + $0x44]] }
 0x3ef   : > { %v1659_v24 = vpop.permute.xlu1 %1658  ;;  %v1375_v39 = vmul.f32 %v7416_v37, %v1373_v25  ;;  %v1630_v18 = vsel %vm7418_vm5, %v7417_v29, %v1628_v5  ;;  %vm7419_vm15 = vmmov %vm7418_vm5  ;;  %v1435_v58 = vsel %vm7193_vm12, %v1433_v28, 0.0  ;;  %v1495_v27 = vrot.slane %v1488_v56, %v4475_v20 }
 0x3f0   : > { %v1631_v62 = vsel %vm7419_vm15, %v1628_v5, %v7417_v29  ;;  %vm7420_vm2 = vcmp.lt.s32.totalorder %v5495_v63, 14  ;;  %vm7421_vm13 = vcmp.ge.s32.totalorder %v5495_v63, 4294967294  ;;  %v7422_v19 = vmov 0  ;;  %vm7190_vm15 = vmand %vm5617_vm7, %vm4738_vm8 }
 0x3f1   : > { %3207 = vrot.lane.b32.xlu1 %v4081_v30, %s7322_s24  ;;  %vm5791_vm1 = vmand %vm7421_vm13, %vm7420_vm2  ;;  %v1550_v5 = vrot.slane %v1543_v17, %v4475_v20  ;;  %v1605_v2 = vcombine.low %v1599_v10, %v1600_v53  ;;  %v7425_v45 = vstv %s5380_s11  ;;  %vm7426_vm5 = vcmp.lt.s32.totalorder %v4468_v11, 94  ;;  %s5909_s24 = sld [smem:[#allocation6 + $0x2a]]  ;;  %s7557_s11 = sld [smem:[#allocation71_spill]] }
 0x3f2   : > { %v7423_v19 = vsel %vm5791_vm1, 4294967295, %v7422_v19  ;;  %v1406_v25 = vmul.f32 %v7425_v45, %v1404_v60  ;;  %v1661_v28 = vsel %vm7426_vm5, %v5162_v48, %v1659_v24  ;;  %vm7427_vm2 = vmmov %vm7426_vm5  ;;  %v1345_v55 = vadd.f32 %v1344_v4, %v1314_v50  ;;  %v5815_v60 = vpop.permute.xlu0 %2712 }
 0x3f3   : > { %7424 = vst [vmem:[#allocation61_spill] sm:$0xff] %v7423_v19  ;;  %v1690_v38 = vpop.permute.xlu1 %1689  ;;  %v1662_v56 = vsel %vm7427_vm2, %v1659_v24, %v5162_v48  ;;  %vm7428_vm13 = vmand %vm5617_vm7, %vm4709_vm10  ;;  %v1526_v10 = vrot.slane %v1519_v21, %v4475_v20  ;;  %v1581_v53 = vrot.slane %v1574_v59, %v4475_v20  ;;  %v1636_v49 = vcombine.low %v1630_v18, %v1631_v62 }
 0x3f4   : > { %v1466_v17 = vsel %vm7428_vm13, %v1464_v41, 0.0  ;;  %v7429_v37 = vstv %s5401_s1  ;;  %vm7191_vm5 = vmand %vm5791_vm1, %vm4606_vm11  ;;  %vm7430_vm2 = vcmp.lt.s32.totalorder %v4468_v11, 93  ;;  %v1376_v41 = vadd.f32 %v1375_v39, %v1345_v55  ;;  %s6403_s1 = sld [smem:[#allocation6 + $0x45]] }
 0x3f5   : > { %3236 = vrot.lane.b32.xlu1 %v4081_v30, %s7364_s15  ;;  %v1437_v48 = vmul.f32 %v7429_v37, %v1435_v58  ;;  %v1692_v4 = vsel %vm7430_vm2, %v5204_v44, %v1690_v38  ;;  %vm7431_vm13 = vmmov %vm7430_vm2  ;;  %v1497_v21 = vsel %vm7190_vm15, %v1495_v27, 0.0  ;;  %v1557_v59 = vrot.slane %v1550_v5, %v4475_v20  ;;  %s6030_s15 = sld [smem:[#allocation6 + $0x2f]] }
 0x3f6   : > { %v1693_v24 = vsel %vm7431_vm13, %v1690_v38, %v5204_v44  ;;  %v1612_v29 = vrot.slane %v1605_v2, %v4475_v20  ;;  %v1667_v18 = vcombine.low %v1661_v28, %v1662_v56  ;;  %v1468_v50 = vmul.f32 %v1467_v46, %v1466_v17  ;;  %vm7192_vm2 = vmand %vm5791_vm1, %vm4593_vm6  ;;  %v5876_v56 = vpop.permute.xlu0 %2741 }
 0x3f7   : > { %v1721_v62 = vpop.permute.xlu1 %1720  ;;  %vm7432_vm13 = vcmp.lt.s32.totalorder %v4468_v11, 83  ;;  %v1407_v58 = vadd.f32 %v1406_v25, %v1376_v41  ;;  %v1528_v46 = vsel %vm7191_vm5, %v1526_v10, 0.0  ;;  %v1588_v27 = vrot.slane %v1581_v53, %v4475_v20  ;;  %vm7195_vm5 = vmand %vm5791_vm1, %vm4558_vm0 }
 0x3f8   : > { %v1723_v44 = vsel %vm7432_vm13, %v5258_v57, %v1721_v62  ;;  %vm7433_vm15 = vmmov %vm7432_vm13  ;;  %v1643_v5 = vrot.slane %v1636_v49, %v4475_v20  ;;  %v1698_v2 = vcombine.low %v1692_v4, %v1693_v24  ;;  %v1499_v38 = vmul.f32 %v1498_v35, %v1497_v21 }
 0x3f9   : > { %v1724_v39 = vsel %vm7433_vm15, %v1721_v62, %v5258_v57  ;;  %3265 = vrot.lane.b32.xlu1 %v4081_v30, %s7327_s6  ;;  %vm7194_vm15 = vmand %vm5791_vm1, %vm4623_vm9  ;;  %v1653_v57 = vstv %s5773_s22  ;;  %vm7197_vm13 = vcmp.lt.s32.totalorder %v4468_v11, 81  ;;  %v1438_v45 = vadd.f32 %v1437_v48, %v1407_v58  ;;  %s5975_s6 = sld [smem:[#allocation6 + $0x2d]]  ;;  %s6511_s22 = sld [smem:[#allocation6 + $0x4e]] }
 0x3fa   : > { %v1559_v25 = vsel %vm7192_vm2, %v1557_v59, 0.0  ;;  %v1619_v28 = vrot.slane %v1612_v29, %v4475_v20  ;;  %v1674_v35 = vrot.slane %v1667_v18, %v4475_v20  ;;  %v1729_v55 = vcombine.low %v1723_v44, %v1724_v39 }
 0x3fb   : > { %v1752_v17 = vpop.permute.xlu1 %1751  ;;  %v7434_v10 = vstv %s5499_s3  ;;  %vm7435_vm2 = vcmp.lt.s32.totalorder %v4468_v11, 82  ;;  %v1469_v48 = vadd.f32 %v1468_v50, %v1438_v45  ;;  %v1590_v4 = vsel %vm7194_vm15, %v1588_v27, 0.0  ;;  %v5939_v45 = vpop.permute.xlu0 %2770  ;;  %s7559_s3 = sld [smem:[#allocation73_spill]] }
 0x3fc   : > { %v1530_v53 = vmul.f32 %v7434_v10, %v1528_v46  ;;  %v1754_v49 = vsel %vm7435_vm2, %v5311_v15, %v1752_v17  ;;  %vm7436_vm12 = vmmov %vm7435_vm2  ;;  %v1650_v24 = vrot.slane %v1643_v5, %v4475_v20  ;;  %v1705_v41 = vrot.slane %v1698_v2, %v4475_v20 }
 0x3fd   : > { %v1755_v37 = vsel %vm7436_vm12, %v1752_v17, %v5311_v15  ;;  %3294 = vrot.lane.b32.xlu1 %v4081_v30, %s7329_s27  ;;  %v7437_v59 = vstv %s5526_s13  ;;  %vm7196_vm12 = vmand %vm5791_vm1, %vm4683_vm14  ;;  %v1500_v15 = vadd.f32 %v1499_v38, %v1469_v48  ;;  %v1621_v18 = vsel %vm7195_vm5, %v1619_v28, 0.0  ;;  %s5918_s27 = sld [smem:[#allocation6 + $0x2b]]  ;;  %s6430_s13 = sld [smem:[#allocation6 + $0x47]] }
 0x3fe   : > { %v1760_v21 = vcombine.low %v1754_v49, %v1755_v37  ;;  %v1561_v29 = vmul.f32 %v7437_v59, %v1559_v25  ;;  %v1681_v62 = vrot.slane %v1674_v35, %v4475_v20  ;;  %v1736_v50 = vrot.slane %v1729_v55, %v4475_v20 }
 0x3ff   : > { %v1783_v44 = vpop.permute.xlu1 %1782  ;;  %v7438_v39 = vstv %s5548_s9  ;;  %v1531_v5 = vadd.f32 %v1530_v53, %v1500_v15  ;;  %v1652_v2 = vsel %vm7196_vm12, %v1650_v24, 0.0  ;;  %v1712_v38 = vrot.slane %v1705_v41, %v4475_v20  ;;  %s6466_s9 = sld [smem:[#allocation6 + $0x4a]] }
 0x400   : > { %v1592_v58 = vmul.f32 %v7438_v39, %v1590_v4  ;;  %v1785_v46 = vsel %vm7197_vm13, %v5361_v12, %v1783_v44  ;;  %v1786_v27 = vsel %vm7197_vm13, %v1783_v44, %v5361_v12  ;;  %vm7439_vm5 = vcmp.lt.s32.totalorder %v5495_v63, 13 }
 0x401   : > { %vm7440_vm2 = vcmp.ge.s32.totalorder %v5495_v63, 4294967293  ;;  %v7441_v25 = vmov 0  ;;  %v1767_v12 = vrot.slane %v1760_v21, %v4475_v20  ;;  %v1791_v28 = vcombine.low %v1785_v46, %v1786_v27  ;;  %3323 = vrot.lane.b32.xlu1 %v4081_v30, %s7331_s0  ;;  %s5972_s0 = sld [smem:[#allocation6 + $0x2c]] }
 0x402   : > { %vm5945_vm15 = vmand %vm7440_vm2, %vm7439_vm5  ;;  %vm7444_vm12 = vcmp.lt.s32.totalorder %v4468_v11, 47  ;;  %v7445_v55 = vstv %s5550_s28  ;;  %v1684_v10 = vstv %s5866_s8  ;;  %v1562_v63 = vadd.f32 %v1561_v29, %v1531_v5  ;;  %s6470_s28 = sld [smem:[#allocation6 + $0x4b]]  ;;  %s6519_s8 = sld [smem:[#allocation6 + $0x4f]] }
 0x403   : > { %v7442_v25 = vsel %vm5945_vm15, 4294967295, %v7441_v25  ;;  %v5956_v35 = vsel %vm7444_vm12, %v4241_v51, %v4243_v52  ;;  %v1623_v17 = vmul.f32 %v7445_v55, %v1621_v18  ;;  %vm7198_vm5 = vmand %vm5791_vm1, %vm4738_vm8  ;;  %v1715_v53 = vstv %s5878_s10  ;;  %v1814_v52 = vpop.permute.xlu1 %1813  ;;  %v7450_v55 = vld [vmem:[#allocation23_spill] sm:$0xff]  ;;  %s6521_s10 = sld [smem:[#allocation6 + $0x50]] }
 0x404   : > { %7443 = vst [vmem:[#allocation62_spill] sm:$0xff] %v7442_v25  ;;  %vm7446_vm2 = vmand %vm5791_vm1, %vm4709_vm10  ;;  %v1743_v49 = vrot.slane %v1736_v50, %v4475_v20  ;;  %v1798_v51 = vrot.slane %v1791_v28, %v4475_v20  ;;  %v1654_v37 = vmul.f32 %v1653_v57, %v1652_v2  ;;  %v1593_v24 = vadd.f32 %v1592_v58, %v1562_v63 }
 0x405   : > { %v1683_v30 = vsel %vm7446_vm2, %v1681_v62, 0.0  ;;  %vm7447_vm2 = vcmp.lt.s32.totalorder %v4468_v11, 80  ;;  %v1714_v57 = vsel %vm7198_vm5, %v1712_v38, 0.0  ;;  %v1774_v41 = vrot.slane %v1767_v12, %v4475_v20  ;;  %v6006_v62 = vpop.permute.xlu0 %2799 }
 0x406   : > { %v1816_v48 = vsel %vm7447_vm2, %v5403_v40, %v1814_v52  ;;  %vm7448_vm13 = vmmov %vm7447_vm2  ;;  %vm7199_vm12 = vcmp.lt.s32.totalorder %v4468_v11, 79  ;;  %v2060_v59 = vcombine.low %v5956_v35, %v5293_v7  ;;  %v1685_v29 = vmul.f32 %v1684_v10, %v1683_v30 }
 0x407   : > { %v1817_v4 = vsel %vm7448_vm13, %v1814_v52, %v5403_v40  ;;  %v1746_v15 = vstv %s5909_s24  ;;  %vm7200_vm13 = vmand %vm5945_vm15, %vm4593_vm6  ;;  %v1624_v40 = vadd.f32 %v1623_v17, %v1593_v24  ;;  %v1777_v50 = vstv %s5918_s27  ;;  %v1845_v58 = vpop.permute.xlu1 %1844  ;;  %v7451_v17 = vld [vmem:[#allocation24_spill] sm:$0xff]  ;;  %s6533_s24 = sld [smem:[#allocation6 + $0x51]]  ;;  %s6546_s27 = sld [smem:[#allocation6 + $0x52]] }
 0x408   : > { %v1822_v21 = vcombine.low %v1816_v48, %v1817_v4  ;;  %vm7449_vm2 = vmand %vm5945_vm15, %vm4606_vm11  ;;  %v1805_v44 = vrot.slane %v1798_v51, %v4475_v20  ;;  %v1716_v46 = vmul.f32 %v1715_v53, %v1714_v57  ;;  %v1847_v27 = vsel %vm7199_vm12, %v5448_v22, %v1845_v58 }
 0x409   : > { %v1745_v18 = vsel %vm7449_vm2, %v1743_v49, 0.0  ;;  %v1848_v5 = vsel %vm7199_vm12, %v1845_v58, %v5448_v22  ;;  %v1655_v2 = vadd.f32 %v1654_v37, %v1624_v40  ;;  %v1776_v38 = vsel %vm7200_vm13, %v1774_v41, 0.0  ;;  %vm7202_vm13 = vmand %vm5945_vm15, %vm4558_vm0  ;;  %v6066_v41 = vpop.permute.xlu0 %2828  ;;  %v7455_v40 = vld [vmem:[#allocation25_spill] sm:$0xff]  ;;  %v7459_v58 = vld [vmem:[#allocation27_spill] sm:$0xff] }
 0x40a   : > { %v1829_v39 = vrot.slane %v1822_v21, %v4475_v20  ;;  %v1853_v28 = vcombine.low %v1847_v27, %v1848_v5  ;;  %vm7201_vm2 = vcmp.lt.s32.totalorder %v4468_v11, 78  ;;  %vm7452_vm5 = vcmp.lt.s32.totalorder %v4468_v11, 46 }
 0x40b   : > { %v6036_v10 = vsel %vm7452_vm5, %v7451_v17, %v7450_v55  ;;  %vm7453_vm12 = vmmov %vm7452_vm5  ;;  %v1747_v63 = vmul.f32 %v1746_v15, %v1745_v18  ;;  %v1686_v30 = vadd.f32 %v1685_v29, %v1655_v2  ;;  %v1808_v53 = vstv %s5972_s0  ;;  %v1876_v37 = vpop.permute.xlu1 %1875  ;;  %v7456_v18 = vld [vmem:[#allocation26_spill] sm:$0xff]  ;;  %s6551_s0 = sld [smem:[#allocation6 + $0x53]] }
 0x40c   : > { %v1836_v12 = vrot.slane %v1829_v39, %v4475_v20  ;;  %v6042_v22 = vsel %vm7453_vm12, %v7450_v55, %v7451_v17  ;;  %vm7454_vm5 = vmand %vm5945_vm15, %vm4623_vm9  ;;  %v1839_v51 = vstv %s5975_s6  ;;  %v1860_v52 = vrot.slane %v1853_v28, %v4475_v20  ;;  %s6576_s6 = sld [smem:[#allocation6 + $0x54]] }
 0x40d   : > { %v1807_v49 = vsel %vm7454_vm5, %v1805_v44, 0.0  ;;  %v1778_v48 = vmul.f32 %v1777_v50, %v1776_v38  ;;  %v1878_v4 = vsel %vm7201_vm2, %v5512_v42, %v1876_v37  ;;  %v1879_v24 = vsel %vm7201_vm2, %v1876_v37, %v5512_v42  ;;  %vm7462_vm5 = vmand %vm5945_vm15, %vm4683_vm14  ;;  %v7467_v37 = vld [vmem:[#allocation30_spill] sm:$0xff] }
 0x40e   : > { %v1717_v57 = vadd.f32 %v1716_v46, %v1686_v30  ;;  %v1838_v21 = vsel %vm7202_vm13, %v1836_v12, 0.0  ;;  %v1867_v29 = vrot.slane %v1860_v52, %v4475_v20  ;;  %v1884_v15 = vcombine.low %v1878_v4, %v1879_v24  ;;  %v7460_v46 = vld [vmem:[#allocation28_spill] sm:$0xff]  ;;  %v7466_v52 = vld [vmem:[#allocation29_spill] sm:$0xff] }
 0x40f   : > { %vm7457_vm2 = vcmp.lt.s32.totalorder %v4468_v11, 45  ;;  %v1809_v44 = vmul.f32 %v1808_v53, %v1807_v49  ;;  %vm7461_vm13 = vcmp.lt.s32.totalorder %v4468_v11, 35  ;;  %v1870_v5 = vstv %s6011_s23  ;;  %v1907_v12 = vpop.permute.xlu1 %1906  ;;  %s6726_s23 = sld [smem:[#allocation6 + $0x55]] }
 0x410   : > { %v2113_v42 = vsel %vm7457_vm2, %v7456_v18, %v7455_v40  ;;  %vm7458_vm12 = vmmov %vm7457_vm2  ;;  %v1748_v39 = vadd.f32 %v1747_v63, %v1717_v57  ;;  %v2142_v27 = vsel %vm7461_vm13, %v7460_v46, %v7459_v58  ;;  %v1869_v2 = vsel %vm7462_vm5, %v1867_v29, 0.0  ;;  %v7470_v57 = vld [vmem:[#allocation31_spill] sm:$0xff] }
 0x411   : > { %v2114_v50 = vsel %vm7458_vm12, %v7455_v40, %v7456_v18  ;;  %v1891_v38 = vrot.slane %v1884_v15, %v4475_v20  ;;  %v1840_v28 = vmul.f32 %v1839_v51, %v1838_v21  ;;  %vm7463_vm12 = vcmp.lt.s32.totalorder %v4468_v11, 77  ;;  %v7471_v21 = vld [vmem:[#allocation32_spill] sm:$0xff]  ;;  %v6128_v40 = vpop.permute.xlu0 %2857 }
 0x412   : > { %v1909_v55 = vsel %vm7463_vm12, %v5555_v14, %v1907_v12  ;;  %vm7464_vm13 = vmmov %vm7463_vm12  ;;  %v1779_v63 = vadd.f32 %v1778_v48, %v1748_v39  ;;  %vm7465_vm5 = vcmp.lt.s32.totalorder %v4468_v11, 35  ;;  %v1901_v53 = vstv %s6030_s15  ;;  %s6728_s15 = sld [smem:[#allocation6 + $0x56]] }
 0x413   : > { %v1910_v17 = vsel %vm7464_vm13, %v1907_v12, %v5555_v14  ;;  %v2143_v30 = vsel %vm7465_vm5, %v7459_v58, %v7460_v46  ;;  %v1898_v49 = vrot.slane %v1891_v38, %v4475_v20  ;;  %vm7468_vm2 = vcmp.lt.s32.totalorder %v4468_v11, 34  ;;  %v6136_v39 = vpop.permute.xlu1 %2604 }
 0x414   : > { %v1915_v51 = vcombine.low %v1909_v55, %v1910_v17  ;;  %v2171_v4 = vsel %vm7468_vm2, %v7467_v37, %v7466_v52  ;;  %vm7469_vm12 = vmmov %vm7468_vm2  ;;  %v1871_v48 = vmul.f32 %v1870_v5, %v1869_v2  ;;  %v1810_v24 = vadd.f32 %v1809_v44, %v1779_v63 }
 0x415   : > { %v2172_v14 = vsel %vm7469_vm12, %v7466_v52, %v7467_v37  ;;  %vm7472_vm13 = vcmp.lt.s32.totalorder %v4468_v11, 33  ;;  %vm7474_vm2 = vmand %vm5945_vm15, %vm4709_vm10  ;;  %v2067_v58 = vrot.slane %v2060_v59, %v4475_v20  ;;  %v2089_v46 = vcombine.low %v6042_v22, %v6036_v10 }
 0x416   : > { %v2200_v29 = vsel %vm7472_vm13, %v7471_v21, %v7470_v57  ;;  %vm7473_vm5 = vmmov %vm7472_vm13  ;;  %v1900_v18 = vsel %vm7474_vm2, %v1898_v49, 0.0  ;;  %v1922_v44 = vrot.slane %v1915_v51, %v4475_v20  ;;  %v1841_v2 = vadd.f32 %v1840_v28, %v1810_v24 }
 0x417   : > { %v2201_v15 = vsel %vm7473_vm5, %v7470_v57, %v7471_v21  ;;  %v1902_v5 = vmul.f32 %v1901_v53, %v1900_v18  ;;  %vm7203_vm12 = vmand %vm5945_vm15, %vm4738_vm8  ;;  %v2118_v38 = vcombine.low %v2114_v50, %v2113_v42  ;;  %v2147_v12 = vcombine.low %v2143_v30, %v2142_v27  ;;  %v7477_v42 = vld [vmem:[#allocation33_spill] sm:$0xff]  ;;  %v7478_v50 = vld [vmem:[#allocation34_spill] sm:$0xff]  ;;  %v6189_v57 = vpop.permute.xlu0 %2886 }
 0x418   : > { %v1932_v55 = vstv %s6075_s20  ;;  %v1929_v17 = vrot.slane %v1922_v44, %v4475_v20  ;;  %v7475_v63 = vrot.slane %v5214_v16, %v4475_v20  ;;  %vm7476_vm13 = vmand %vm4573_vm3, %vm4623_vm9  ;;  %v2176_v35 = vcombine.low %v2172_v14, %v2171_v4  ;;  %v7481_v30 = vld [vmem:[#allocation35_spill] sm:$0xff]  ;;  %v7482_v53 = vld [vmem:[#allocation36_spill] sm:$0xff]  ;;  %s6760_s20 = sld [smem:[#allocation6 + $0x57]] }
 0x419   : > { %v2205_v59 = vcombine.low %v2201_v15, %v2200_v29  ;;  %v1872_v10 = vadd.f32 %v1871_v48, %v1841_v2  ;;  %v2045_v22 = vrot.slane %v5281_v47, %v4475_v20  ;;  %vm7479_vm5 = vcmp.lt.s32.totalorder %v4468_v11, 32  ;;  %v6175_v47 = vpop.permute.xlu1 %2656 }
 0x41a   : > { %v2018_v7 = vsel %vm7476_vm13, %v7475_v63, 0.0  ;;  %v2229_v27 = vsel %vm7479_vm5, %v7478_v50, %v7477_v42  ;;  %vm7480_vm2 = vmmov %vm7479_vm5  ;;  %v1931_v28 = vsel %vm7203_vm12, %v1929_v17, 0.0  ;;  %vm7483_vm13 = vcmp.lt.s32.totalorder %v4468_v11, 31  ;;  %v7491_v63 = vld [vmem:[#allocation39_spill] sm:$0xff] }
 0x41b   : > { %v2230_v16 = vsel %vm7480_vm2, %v7477_v42, %v7478_v50  ;;  %v2258_v49 = vsel %vm7483_vm13, %v7482_v53, %v7481_v30  ;;  %vm7484_vm5 = vmmov %vm7483_vm13  ;;  %v1933_v52 = vmul.f32 %v1932_v55, %v1931_v28  ;;  %v1903_v37 = vadd.f32 %v1902_v5, %v1872_v10  ;;  %v7487_v5 = vld [vmem:[#allocation37_spill] sm:$0xff] }
 0x41c   : > { %v2259_v51 = vsel %vm7484_vm5, %v7481_v30, %v7482_v53  ;;  %v2074_v4 = vrot.slane %v2067_v58, %v4475_v20  ;;  %v2096_v14 = vrot.slane %v2089_v46, %v4475_v20  ;;  %v2125_v48 = vrot.slane %v2118_v38, %v4475_v20  ;;  %vm7486_vm2 = vmand %vm4573_vm3, %vm4558_vm0  ;;  %v7488_v38 = vld [vmem:[#allocation38_spill] sm:$0xff] }
 0x41d   : > { %v2154_v24 = vrot.slane %v2147_v12, %v4475_v20  ;;  %v2183_v21 = vrot.slane %v2176_v35, %v4475_v20  ;;  %v2212_v29 = vrot.slane %v2205_v59, %v4475_v20  ;;  %v2234_v15 = vcombine.low %v2230_v16, %v2229_v27  ;;  %v6204_v55 = vpop.permute.xlu1 %2685 }
 0x41e   : > { %v1934_v18 = vadd.f32 %v1933_v52, %v1903_v37  ;;  %v7485_v44 = vstv %s5064_s17  ;;  %v2047_v58 = vsel %vm7486_vm2, %v2045_v22, 0.0  ;;  %v2263_v46 = vcombine.low %v2259_v51, %v2258_v49  ;;  %v6233_v37 = vpop.permute.xlu0 %2915  ;;  %s6360_s17 = sld [smem:[#allocation6 + $0x42]] }
 0x41f   : > { %v2020_v2 = vmul.f32 %v7485_v44, %v2018_v7  ;;  %vm7489_vm13 = vcmp.lt.s32.totalorder %v4468_v11, 30  ;;  %v7492_v7 = vld [vmem:[#allocation40_spill] sm:$0xff]  ;;  %vm7493_vm12 = vcmp.lt.s32.totalorder %v4468_v11, 29  ;;  %v2103_v42 = vrot.slane %v2096_v14, %v4475_v20  ;;  %7496 = vst [vmem:[#allocation63_spill] sm:$0xff] %v6233_v37 }
 0x420   : > { %v2287_v12 = vsel %vm7489_vm13, %v7488_v38, %v7487_v5  ;;  %vm7490_vm5 = vmmov %vm7489_vm13  ;;  %v2316_v35 = vsel %vm7493_vm12, %v7492_v7, %v7491_v63  ;;  %v1963_v10 = vadd.f32 %v5254_v43, %v1934_v18  ;;  %v2132_v50 = vrot.slane %v2125_v48, %v4475_v20  ;;  %v7499_v18 = vld [vmem:[#allocation42_spill] sm:$0xff] }
 0x421   : > { %v2288_v17 = vsel %vm7490_vm5, %v7487_v5, %v7488_v38  ;;  %vm7494_vm2 = vmmov %vm7493_vm12  ;;  %v2161_v27 = vrot.slane %v2154_v24, %v4475_v20  ;;  %v2190_v16 = vrot.slane %v2183_v21, %v4475_v20  ;;  %v2219_v28 = vrot.slane %v2212_v29, %v4475_v20  ;;  %v7498_v24 = vld [vmem:[#allocation41_spill] sm:$0xff] }
 0x422   : > { %v2317_v59 = vsel %vm7494_vm2, %v7491_v63, %v7492_v7  ;;  %vm7495_vm13 = vmand %vm4573_vm3, %vm4683_vm14  ;;  %v2241_v30 = vrot.slane %v2234_v15, %v4475_v20  ;;  %v1992_v43 = vadd.f32 %v5264_v54, %v1963_v10  ;;  %v2270_v53 = vrot.slane %v2263_v46, %v4475_v20 }
 0x423   : > { %v2076_v22 = vsel %vm7495_vm13, %v2074_v4, 0.0  ;;  %v2292_v49 = vcombine.low %v2288_v17, %v2287_v12  ;;  %v2321_v51 = vcombine.low %v2317_v59, %v2316_v35  ;;  %v6235_v4 = vpop.permute.xlu1 %2714  ;;  %v7497_v14 = vstv %s5074_s19  ;;  %vm7503_vm2 = vmand %vm4573_vm3, %vm4709_vm10  ;;  %s7505_s19 = sld [smem:[#allocation66_spill]] }
 0x424   : > { %v2049_v48 = vmul.f32 %v7497_v14, %v2047_v58  ;;  %vm7500_vm12 = vcmp.lt.s32.totalorder %v4468_v11, 19  ;;  %v2021_v29 = vadd.f32 %v2020_v2, %v1992_v43  ;;  %v7502_v15 = vstv %s5076_s30  ;;  %vm7504_vm13 = vmand %vm4573_vm3, %vm4738_vm8  ;;  %s7508_s30 = sld [smem:[#allocation68_spill]] }
 0x425   : > { %v2345_v21 = vsel %vm7500_vm12, %v7499_v18, %v7498_v24  ;;  %vm7501_vm5 = vmmov %vm7500_vm12  ;;  %v2078_v44 = vmul.f32 %v7502_v15, %v2076_v22  ;;  %v2105_v58 = vsel %vm7503_vm2, %v2103_v42, 0.0  ;;  %v2134_v46 = vsel %vm7504_vm13, %v2132_v50, 0.0  ;;  %v7523_v15 = vld [vmem:[#allocation46_spill] sm:$0xff] }
 0x426   : > { %v2346_v54 = vsel %vm7501_vm5, %v7498_v24, %v7499_v18  ;;  %vm7507_vm12 = vmand %vm4765_vm4, %vm4606_vm11  ;;  %v2248_v12 = vrot.slane %v2241_v30, %v4475_v20  ;;  %v2050_v17 = vadd.f32 %v2049_v48, %v2021_v29  ;;  %v2277_v63 = vrot.slane %v2270_v53, %v4475_v20  ;;  %v7516_v18 = vld [vmem:[#allocation43_spill] sm:$0xff]  ;;  %v7517_v53 = vld [vmem:[#allocation44_spill] sm:$0xff] }
 0x427   : > { %v2163_v2 = vsel %vm7507_vm12, %v2161_v27, 0.0  ;;  %vm7509_vm5 = vmand %vm4765_vm4, %vm4593_vm6  ;;  %v2299_v7 = vrot.slane %v2292_v49, %v4475_v20  ;;  %v2328_v35 = vrot.slane %v2321_v51, %v4475_v20  ;;  %v2350_v59 = vcombine.low %v2346_v54, %v2345_v21  ;;  %v6278_v10 = vpop.permute.xlu1 %2743  ;;  %v6298_v21 = vpop.permute.xlu0 %2944  ;;  %v7522_v29 = vld [vmem:[#allocation45_spill] sm:$0xff] }
 0x428   : > { %v2192_v38 = vsel %vm7509_vm5, %v2190_v16, 0.0  ;;  %vm7510_vm3 = vmand %vm4765_vm4, %vm4623_vm9  ;;  %v7511_v22 = vstv %s5096_s25  ;;  %v7512_v50 = vstv %s5098_s18  ;;  %v7513_v16 = vstv %s5100_s5  ;;  %7520 = vst [vmem:[#allocation64_spill] sm:$0xff] %v6298_v21  ;;  %s6305_s5 = sld [smem:[#allocation6 + $0x40]]  ;;  %s6345_s18 = sld [smem:[#allocation6 + $0x41]] }
 0x429   : > { %v2221_v9 = vsel %vm7510_vm3, %v2219_v28, 0.0  ;;  %v2107_v42 = vmul.f32 %v7511_v22, %v2105_v58  ;;  %v2136_v27 = vmul.f32 %v7512_v50, %v2134_v46  ;;  %v2165_v43 = vmul.f32 %v7513_v16, %v2163_v2  ;;  %vm7521_vm12 = vmand %vm4765_vm4, %vm4558_vm0  ;;  %v7527_v50 = vld [vmem:[#allocation47_spill] sm:$0xff]  ;;  %v7528_v16 = vld [vmem:[#allocation48_spill] sm:$0xff]  ;;  %s7543_s25 = sld [smem:[#allocation69_spill]] }
 0x42a   : > { %v2079_v14 = vadd.f32 %v2078_v44, %v2050_v17  ;;  %v7514_v28 = vstv %s7505_s19  ;;  %v7515_v30 = vstv %s7508_s30  ;;  %vm7518_vm2 = vcmp.lt.s32.totalorder %v4468_v11, 18  ;;  %s6802_s19 = sld [smem:[#allocation6 + $0x59]]  ;;  %s6817_s30 = sld [smem:[#allocation6 + $0x5a]] }
 0x42b   : > { %v2194_v24 = vmul.f32 %v7514_v28, %v2192_v38  ;;  %v2223_v48 = vmul.f32 %v7515_v30, %v2221_v9  ;;  %v2374_v49 = vsel %vm7518_vm2, %v7517_v53, %v7516_v18  ;;  %vm7519_vm13 = vmmov %vm7518_vm2  ;;  %v2250_v54 = vsel %vm7521_vm12, %v2248_v12, 0.0  ;;  %v6323_v17 = vpop.permute.xlu1 %2772  ;;  %v7532_v30 = vld [vmem:[#allocation50_spill] sm:$0xff] }
 0x42c   : > { %v2375_v51 = vsel %vm7519_vm13, %v7516_v18, %v7517_v53  ;;  %vm7524_vm5 = vcmp.lt.s32.totalorder %v4468_v11, 17  ;;  %v2108_v46 = vadd.f32 %v2107_v42, %v2079_v14  ;;  %vm7526_vm2 = vmand %vm4765_vm4, %vm4683_vm14  ;;  %v2306_v38 = vrot.slane %v2299_v7, %v4475_v20  ;;  %v7531_v7 = vld [vmem:[#allocation49_spill] sm:$0xff]  ;;  %v7535_v18 = vld [vmem:[#allocation51_spill] sm:$0xff] }
 0x42d   : > { %v2403_v44 = vsel %vm7524_vm5, %v7523_v15, %v7522_v29  ;;  %vm7525_vm3 = vmmov %vm7524_vm5  ;;  %v2279_v2 = vsel %vm7526_vm2, %v2277_v63, 0.0  ;;  %v2335_v9 = vrot.slane %v2328_v35, %v4475_v20  ;;  %v2357_v12 = vrot.slane %v2350_v59, %v4475_v20  ;;  %v7536_v53 = vld [vmem:[#allocation52_spill] sm:$0xff] }
 0x42e   : > { %v2404_v58 = vsel %vm7525_vm3, %v7522_v29, %v7523_v15  ;;  %v2379_v22 = vcombine.low %v2375_v51, %v2374_v49  ;;  %vm7529_vm13 = vcmp.lt.s32.totalorder %v4468_v11, 16  ;;  %v2137_v63 = vadd.f32 %v2136_v27, %v2108_v46  ;;  %v7539_v51 = vld [vmem:[#allocation53_spill] sm:$0xff]  ;;  %v7540_v29 = vld [vmem:[#allocation54_spill] sm:$0xff] }
 0x42f   : > { %v2432_v42 = vsel %vm7529_vm13, %v7528_v16, %v7527_v50  ;;  %vm7530_vm12 = vmmov %vm7529_vm13  ;;  %v2408_v28 = vcombine.low %v2404_v58, %v2403_v44  ;;  %vm7533_vm5 = vcmp.lt.s32.totalorder %v4468_v11, 15  ;;  %vm7537_vm2 = vcmp.lt.s32.totalorder %v4468_v11, 14 }
 0x430   : > { %v2433_v14 = vsel %vm7530_vm12, %v7527_v50, %v7528_v16  ;;  %v2461_v35 = vsel %vm7533_vm5, %v7532_v30, %v7531_v7  ;;  %vm7534_vm3 = vmmov %vm7533_vm5  ;;  %v2490_v49 = vsel %vm7537_vm2, %v7536_v53, %v7535_v18  ;;  %vm7541_vm12 = vcmp.lt.s32.totalorder %v4468_v11, 13  ;;  %v7544_v16 = vld [vmem:[#allocation55_spill] sm:$0xff] }
 0x431   : > { %v2462_v59 = vsel %vm7534_vm3, %v7531_v7, %v7532_v30  ;;  %vm7538_vm13 = vmmov %vm7537_vm2  ;;  %v2519_v15 = vsel %vm7541_vm12, %v7540_v29, %v7539_v51  ;;  %v2166_v58 = vadd.f32 %v2165_v43, %v2137_v63  ;;  %v2364_v46 = vrot.slane %v2357_v12, %v4475_v20  ;;  %v7545_v7 = vld [vmem:[#allocation56_spill] sm:$0xff]  ;;  %v6372_v43 = vpop.permute.xlu0 %2973  ;;  %v6374_v12 = vpop.permute.xlu1 %2801 }
 0x432   : > { %v2491_v27 = vsel %vm7538_vm13, %v7535_v18, %v7536_v53  ;;  %vm7542_vm5 = vmmov %vm7541_vm12  ;;  %v2437_v50 = vcombine.low %v2433_v14, %v2432_v42  ;;  %vm7546_vm3 = vcmp.lt.s32.totalorder %v4468_v11, 3  ;;  %7549 = vst [vmem:[#allocation65_spill] sm:$0xff] %v6372_v43  ;;  %v2466_v63 = vcombine.low %v2462_v59, %v2461_v35  ;;  %v7550_v53 = vld [vmem:[#allocation57_spill] sm:$0xff]  ;;  %v7551_v42 = vld [vmem:[#allocation58_spill] sm:$0xff] }
 0x433   : > { %v2520_v44 = vsel %vm7542_vm5, %v7539_v51, %v7540_v29  ;;  %v2548_v30 = vsel %vm7546_vm3, %v7545_v7, %v7544_v16  ;;  %vm7547_vm2 = vmmov %vm7546_vm3  ;;  %vm7552_vm13 = vcmp.lt.s32.totalorder %v4468_v11, 2  ;;  %v2195_v29 = vadd.f32 %v2194_v24, %v2166_v58 }
 0x434   : > { %v2549_v18 = vsel %vm7547_vm2, %v7544_v16, %v7545_v7  ;;  %v2577_v14 = vsel %vm7552_vm13, %v7551_v42, %v7550_v53  ;;  %vm7553_vm12 = vmmov %vm7552_vm13  ;;  %v2386_v52 = vrot.slane %v2379_v22, %v4475_v20  ;;  %v2415_v16 = vrot.slane %v2408_v28, %v4475_v20 }
 0x435   : > { %v2578_v51 = vsel %vm7553_vm12, %v7550_v53, %v7551_v42  ;;  %v2495_v7 = vcombine.low %v2491_v27, %v2490_v49  ;;  %v2524_v25 = vcombine.low %v2520_v44, %v2519_v15  ;;  %v7554_v19 = vstv %s7543_s25  ;;  %vm7556_vm5 = vmand %vm4765_vm4, %vm4709_vm10  ;;  %v6420_v27 = vpop.permute.xlu0 %3002  ;;  %s6851_s25 = sld [smem:[#allocation6 + $0x5d]] }
 0x436   : > { %v2252_v43 = vmul.f32 %v7554_v19, %v2250_v54  ;;  %v2396_v35 = vstv %s6305_s5  ;;  %v2553_v59 = vcombine.low %v2549_v18, %v2548_v30  ;;  %v2224_v13 = vadd.f32 %v2223_v48, %v2195_v29  ;;  %vm7558_vm3 = vmand %vm4765_vm4, %vm4738_vm8  ;;  %s6828_s5 = sld [smem:[#allocation6 + $0x5b]] }
 0x437   : > { %v7555_v21 = vstv %s7548_s29  ;;  %v2308_v24 = vsel %vm7556_vm5, %v2306_v38, 0.0  ;;  %v2337_v19 = vsel %vm7558_vm3, %v2335_v9, 0.0  ;;  %v2582_v48 = vcombine.low %v2578_v51, %v2577_v14  ;;  %s6888_s29 = sld [smem:[#allocation6 + $0x60]] }
 0x438   : > { %v2281_v37 = vmul.f32 %v7555_v21, %v2279_v2  ;;  %v6407_v21 = vpop.permute.xlu1 %2830  ;;  %vm7560_vm2 = vnez %v7324_v33  ;;  %v2444_v54 = vrot.slane %v2437_v50, %v4475_v20  ;;  %v2473_v2 = vrot.slane %v2466_v63, %v4475_v20 }
 0x439   : > { %vm7561_vm13 = vmand %vm7560_vm2, %vm4606_vm11  ;;  %v2253_v38 = vadd.f32 %v2252_v43, %v2224_v13  ;;  %v2393_v9 = vrot.slane %v2386_v52, %v4475_v20  ;;  %v2422_v22 = vrot.slane %v2415_v16, %v4475_v20  ;;  %v2502_v28 = vrot.slane %v2495_v7, %v4475_v20 }
 0x43a   : > { %v2366_v5 = vsel %vm7561_vm13, %v2364_v46, 0.0  ;;  %v2531_v49 = vrot.slane %v2524_v25, %v4475_v20  ;;  %v7562_v15 = vstv %s7557_s11  ;;  %v2425_v58 = vstv %s6345_s18  ;;  %vm7565_vm4 = vmand %vm7560_vm2, %vm4593_vm6  ;;  %s6841_s18 = sld [smem:[#allocation6 + $0x5c]]  ;;  %s7654_s11 = sld [smem:[#allocation15_spill]] }
 0x43b   : > { %v2310_v44 = vmul.f32 %v7562_v15, %v2308_v24  ;;  %v2560_v46 = vrot.slane %v2553_v59, %v4475_v20  ;;  %v2282_v50 = vadd.f32 %v2281_v37, %v2253_v38  ;;  %v7563_v30 = vstv %s7559_s3  ;;  %vm7566_vm12 = vmand %vm7560_vm2, %vm4623_vm9 }
 0x43c   : > { %v2339_v18 = vmul.f32 %v7563_v30, %v2337_v19  ;;  %v2454_v13 = vstv %s6360_s17  ;;  %v2483_v43 = vstv %s6362_s12  ;;  %v2589_v52 = vrot.slane %v2582_v48, %v4475_v20  ;;  %v6433_v63 = vpop.permute.xlu1 %2859  ;;  %vm7569_vm13 = vmand %vm7560_vm2, %vm4558_vm0  ;;  %s6865_s17 = sld [smem:[#allocation6 + $0x5e]]  ;;  %s6875_s12 = sld [smem:[#allocation6 + $0x5f]] }
 0x43d   : > { %v7564_v25 = vstv %s6168_s7  ;;  %v2451_v42 = vrot.slane %v2444_v54, %v4475_v20  ;;  %v2480_v14 = vrot.slane %v2473_v2, %v4475_v20  ;;  %v2311_v37 = vadd.f32 %v2310_v44, %v2282_v50  ;;  %s6775_s7 = sld [smem:[#allocation6 + $0x58]] }
 0x43e   : > { %v2368_v53 = vmul.f32 %v7564_v25, %v2366_v5  ;;  %v2395_v51 = vsel %vm7565_vm4, %v2393_v9, 0.0  ;;  %v2424_v29 = vsel %vm7566_vm12, %v2422_v22, 0.0  ;;  %v2509_v16 = vrot.slane %v2502_v28, %v4475_v20  ;;  %v6468_v9 = vpop.permute.xlu0 %3031  ;;  %vm7570_vm4 = vmand %vm7560_vm2, %vm4683_vm14 }
 0x43f   : > { %v2538_v7 = vrot.slane %v2531_v49, %v4475_v20  ;;  %v2567_v59 = vrot.slane %v2560_v46, %v4475_v20  ;;  %v2340_v24 = vadd.f32 %v2339_v18, %v2311_v37  ;;  %vm7567_vm5 = vcmp.lt.s32.totalorder %v4468_v11, 1  ;;  %vm7571_vm12 = vmand %vm7560_vm2, %vm4709_vm10 }
 0x440   : > { %v2606_v19 = vsel %vm7567_vm5, %v5589_v61, %v6136_v39  ;;  %vm7568_vm3 = vmmov %vm7567_vm5  ;;  %v2512_v5 = vstv %s6389_s14  ;;  %v2541_v54 = vstv %s6403_s1  ;;  %v2570_v2 = vstv %s6405_s2  ;;  %v6472_v22 = vpop.permute.xlu1 %2888  ;;  %s3578_s14 = sld [smem:[#allocation6 + $0x61]]  ;;  %s7658_s2 = sld [smem:[#allocation19_spill]] }
 0x441   : > { %v2607_v48 = vsel %vm7568_vm3, %v6136_v39, %v5589_v61  ;;  %v2596_v38 = vrot.slane %v2589_v52, %v4475_v20  ;;  %v2397_v28 = vmul.f32 %v2396_v35, %v2395_v51  ;;  %v2453_v61 = vsel %vm7569_vm13, %v2451_v42, 0.0  ;;  %vm7572_vm5 = vmand %vm7560_vm2, %vm4738_vm8  ;;  %s7655_s1 = sld [smem:[#allocation20_spill]]  ;;  %s3586_s3 = sshll.u32 %s7654_s11, 8 }
 0x442   : > { %v2482_v39 = vsel %vm7570_vm4, %v2480_v14, 0.0  ;;  %v2369_v49 = vadd.f32 %v2368_v53, %v2340_v24  ;;  %v2426_v15 = vmul.f32 %v2425_v58, %v2424_v29  ;;  %v2511_v35 = vsel %vm7571_vm12, %v2509_v16, 0.0  ;;  %v6536_v16 = vpop.permute.xlu0 %3060 }
 0x443   : > { %v2540_v44 = vsel %vm7572_vm5, %v2538_v7, 0.0  ;;  %v2611_v46 = vcombine.low %v2607_v48, %v2606_v19  ;;  %vm7573_vm3 = vnez %v7345_v31  ;;  %vm7575_vm4 = vcmp.lt.s32.totalorder %v4468_v11, 127 }
 0x444   : > { %vm7574_vm13 = vmand %vm7573_vm3, %vm4606_vm11  ;;  %v2398_v50 = vadd.f32 %v2397_v28, %v2369_v49  ;;  %v2658_v30 = vsel %vm7575_vm4, %v5671_v0, %v6175_v47  ;;  %v2455_v18 = vmul.f32 %v2454_v13, %v2453_v61  ;;  %v2484_v52 = vmul.f32 %v2483_v43, %v2482_v39  ;;  %v6523_v42 = vpop.permute.xlu1 %2917 }
 0x445   : > { %v2569_v58 = vsel %vm7574_vm13, %v2567_v59, 0.0  ;;  %vm7576_vm2 = vmmov %vm7575_vm4  ;;  %v2599_v25 = vstv %s6430_s13  ;;  %v2513_v14 = vmul.f32 %v2512_v5, %v2511_v35  ;;  %vm7578_vm5 = vcmp.lt.s32.totalorder %v4468_v11, 126 }
 0x446   : > { %v2659_v33 = vsel %vm7576_vm2, %v6175_v47, %v5671_v0  ;;  %vm7577_vm12 = vmand %vm7573_vm3, %vm4593_vm6  ;;  %v2427_v0 = vadd.f32 %v2426_v15, %v2398_v50  ;;  %v2687_v47 = vsel %vm7578_vm5, %v5743_v32, %v6204_v55  ;;  %v2542_v43 = vmul.f32 %v2541_v54, %v2540_v44  ;;  %p7664_p11 = scmp.ne.s32.totalorder %s7658_s2, 0 }
 0x447   : > { %v2598_v53 = vsel %vm7577_vm12, %v2596_v38, 0.0  ;;  %vm7579_vm13 = vmmov %vm7578_vm5  ;;  %v2571_v37 = vmul.f32 %v2570_v2, %v2569_v58  ;;  %v2618_v51 = vrot.slane %v2611_v46, %v4475_v20  ;;  %v2663_v29 = vcombine.low %v2658_v30, %v2659_v33  ;;  %s7659_s13 = sshll.u32 %s7655_s1, 4 }
 0x448   : > { %v2688_v13 = vsel %vm7579_vm13, %v6204_v55, %v5743_v32  ;;  %v2600_v7 = vmul.f32 %v2599_v25, %v2598_v53  ;;  %v2456_v59 = vadd.f32 %v2455_v18, %v2427_v0  ;;  %vm7580_vm4 = vcmp.lt.s32.totalorder %v4468_v11, 125  ;;  %v6553_v54 = vpop.permute.xlu1 %2946 }
 0x449   : > { %v2716_v24 = vsel %vm7580_vm4, %v5815_v60, %v6235_v4  ;;  %vm7581_vm2 = vmmov %vm7580_vm4  ;;  %v2628_v55 = vstv %s6452_s16  ;;  %v2680_v19 = vstv %s6466_s9  ;;  %v2709_v48 = vstv %s6470_s28  ;;  %s254_s16 = scalar_lea.vmem [#allocation7], %s7659_s13 }
 0x44a   : > { %v2717_v32 = vsel %vm7581_vm2, %v6235_v4, %v5815_v60  ;;  %v2692_v5 = vcombine.low %v2687_v47, %v2688_v13  ;;  %v2485_v2 = vadd.f32 %v2484_v52, %v2456_v59  ;;  %v2738_v38 = vstv %s6484_s26  ;;  %s3386_s9 = sshll.u32 %s254_s16, 4  ;;  %s6945_s9 = int_to_ptr.vmem [resolvable:$true] %s3386_s9 }
 0x44b   : > { %vm7582_vm12 = vcmp.lt.s32.totalorder %v4468_v11, 115  ;;  %v2625_v28 = vrot.slane %v2618_v51, %v4475_v20  ;;  %v2670_v61 = vrot.slane %v2663_v29, %v4475_v20  ;;  %v2721_v39 = vcombine.low %v2716_v24, %v2717_v32 }
 0x44c   : > { %v2745_v60 = vsel %vm7582_vm12, %v5876_v56, %v6278_v10  ;;  %vm7583_vm5 = vmmov %vm7582_vm12  ;;  %v2767_v49 = vstv %s6496_s21  ;;  %v2514_v15 = vadd.f32 %v2513_v14, %v2485_v2  ;;  %v2796_v35 = vstv %s6511_s22  ;;  %v2976_v33 = vpop.permute.xlu1 %2975  ;;  %s7662_s21 = sld [smem:[#allocation79_spill]] }
 0x44d   : > { %v2746_v4 = vsel %vm7583_vm5, %v6278_v10, %v5876_v56  ;;  %vm7584_vm13 = vcmp.lt.s32.totalorder %v4468_v11, 114  ;;  %v2699_v56 = vrot.slane %v2692_v5, %v4475_v20  ;;  %v6579_v10 = vpop.permute.xlu0 %3089  ;;  %v2825_v50 = vstv %s6519_s8  ;;  %vm7588_vm5 = vmand %vm7573_vm3, %vm4623_vm9 }
 0x44e   : > { %v2774_v44 = vsel %vm7584_vm13, %v5939_v45, %v6323_v17  ;;  %vm7585_vm4 = vmmov %vm7584_vm13  ;;  %v2750_v58 = vcombine.low %v2745_v60, %v2746_v4  ;;  %v2854_v30 = vstv %s6521_s10  ;;  %v2543_v18 = vadd.f32 %v2542_v43, %v2514_v15  ;;  %s3372_s10 = scalar_lea.sflag [#allocation4], %s7655_s1 }
 0x44f   : > { %v2775_v46 = vsel %vm7585_vm4, %v6323_v17, %v5939_v45  ;;  %vm7586_vm2 = vcmp.lt.s32.totalorder %v4468_v11, 113  ;;  %v2883_v17 = vstv %s6533_s24  ;;  %v2627_v25 = vsel %vm7588_vm5, %v2625_v28, 0.0  ;;  %vm7593_vm5 = vmand %vm7573_vm3, %vm4683_vm14  ;;  %s3758_s24 = scalar_lea.vmem %s6945_s9, 256 }
 0x450   : > { %v2803_v52 = vsel %vm7586_vm2, %v6006_v62, %v6374_v12  ;;  %vm7587_vm12 = vmmov %vm7586_vm2  ;;  %v2677_v53 = vrot.slane %v2670_v61, %v4475_v20  ;;  %v2728_v14 = vrot.slane %v2721_v39, %v4475_v20  ;;  %v2779_v0 = vcombine.low %v2774_v44, %v2775_v46  ;;  %v3005_v24 = vpop.permute.xlu1 %3004  ;;  %p3759_p9 = scmp.ne.s32.totalorder %s6945_s9, %s3758_s24 }
 0x451   : > { %v2804_v45 = vsel %vm7587_vm12, %v6374_v12, %v6006_v62  ;;  %v2572_v47 = vadd.f32 %v2571_v37, %v2543_v18  ;;  %vm7589_vm13 = vcmp.lt.s32.totalorder %v4468_v11, 112  ;;  %v2912_v12 = vstv %s6546_s27  ;;  %v7597_v18 = vld [vmem:[#allocation63_spill] sm:$0xff]  ;;  %s3884_s27 = smov [#allocation7]  }
 0x452   : > { %v2832_v13 = vsel %vm7589_vm13, %v6066_v41, %v6407_v21  ;;  %vm7590_vm4 = vmmov %vm7589_vm13  ;;  %v2706_v43 = vrot.slane %v2699_v56, %v4475_v20  ;;  %v2757_v51 = vrot.slane %v2750_v58, %v4475_v20  ;;  %v2808_v29 = vcombine.low %v2803_v52, %v2804_v45  ;;  %s7663_s22 = smov %s7662_s21  ;;  %s6943_s8 = scalar_lea.hbm %s7662_s21, %s3586_s3 }
 0x453   : > { %v2833_v62 = vsel %vm7590_vm4, %v6407_v21, %v6066_v41  ;;  %v2941_v59 = vstv %s6551_s0  ;;  %v2601_v37 = vadd.f32 %v2600_v7, %v2572_v47  ;;  %v2629_v32 = vmul.f32 %v2628_v55, %v2627_v25  ;;  %v6625_v7 = vpop.permute.xlu0 %3118  ;;  %p3760_p13 = pnand %p3759_p9, %p7664_p11  ;;  %s3762_s0 = sshll.u32 %s3884_s27, 4  ;;  %s3763_s0 = int_to_ptr.vmem [resolvable:$false] %s3762_s0 }
 0x454   : > { %vm7591_vm2 = vcmp.lt.s32.totalorder %v4468_v11, 111  ;;  %v2679_v21 = vsel %vm7593_vm5, %v2677_v53, 0.0  ;;  %v2735_v2 = vrot.slane %v2728_v14, %v4475_v20  ;;  %v2786_v55 = vrot.slane %v2779_v0, %v4475_v20  ;;  %v3034_v46 = vpop.permute.xlu1 %3033  ;;  %v7601_v14 = vld [vmem:[#allocation64_spill] sm:$0xff]  ;;  %p3765_p0 = scmp.lt.s32.totalorder %s6945_s9, %s3763_s0 }
 0x455   : > { %v2861_v5 = vsel %vm7591_vm2, %v6128_v40, %v6433_v63  ;;  %vm7592_vm12 = vmmov %vm7591_vm2  ;;  %v2837_v60 = vcombine.low %v2832_v13, %v2833_v62  ;;  %v2630_v4 = vadd.f32 %v2629_v32, %v2601_v37  ;;  %vm7594_vm13 = vcmp.lt.s32.totalorder %v4468_v11, 110  ;;  %v7606_v32 = vld [vmem:[#allocation65_spill] sm:$0xff]  ;;  %p3761_p7 = pneg %p3760_p13 }
 0x456   : > { %v2862_v41 = vsel %vm7592_vm12, %v6433_v63, %v6128_v40  ;;  %v2890_v28 = vsel %vm7594_vm13, %v6189_v57, %v6472_v22  ;;  %vm7595_vm4 = vmmov %vm7594_vm13  ;;  %v2970_v63 = vstv %s6576_s6  ;;  %v2764_v39 = vrot.slane %v2757_v51, %v4475_v20  ;;  %s3764_s6 = scalar_lea.vmem %s3763_s0, 512 }
 0x457   : > { %v2891_v40 = vsel %vm7595_vm4, %v6472_v22, %v6189_v57  ;;  %vm7596_vm2 = vmand %vm7573_vm3, %vm4709_vm10  ;;  %v2815_v15 = vrot.slane %v2808_v29, %v4475_v20  ;;  %v2866_v44 = vcombine.low %v2861_v5, %v2862_v41  ;;  %v2653_v56 = vadd.f32 %v5156_v26, %v2630_v4  ;;  %v6675_v13 = vpop.permute.xlu0 %3147  ;;  %p3766_p3 = scmp.lt.s32.totalorder %s3764_s6, %s3758_s24 }
 0x458   : > { %v2708_v61 = vsel %vm7596_vm2, %v2706_v43, 0.0  ;;  %v2681_v58 = vmul.f32 %v2680_v19, %v2679_v21  ;;  %vm7598_vm12 = vcmp.lt.s32.totalorder %v4468_v11, 109  ;;  %vm7600_vm13 = vmand %vm7573_vm3, %vm4738_vm8  ;;  %v2793_v26 = vrot.slane %v2786_v55, %v4475_v20  ;;  %v3063_v51 = vpop.permute.xlu1 %3062 }
 0x459   : > { %v2919_v57 = vsel %vm7598_vm12, %v7597_v18, %v6523_v42  ;;  %vm7599_vm5 = vmmov %vm7598_vm12  ;;  %v2737_v52 = vsel %vm7600_vm13, %v2735_v2, 0.0  ;;  %v2844_v19 = vrot.slane %v2837_v60, %v4475_v20  ;;  %v2895_v45 = vcombine.low %v2890_v28, %v2891_v40  ;;  %p3767_p12 = por %p3766_p3, %p3765_p0 }
 0x45a   : > { %v2920_v22 = vsel %vm7599_vm5, %v6523_v42, %v7597_v18  ;;  %v2682_v25 = vadd.f32 %v2681_v58, %v2653_v56  ;;  %v2710_v53 = vmul.f32 %v2709_v48, %v2708_v61  ;;  %vm7602_vm4 = vcmp.lt.s32.totalorder %v4468_v11, 99  ;;  %vm7605_vm3 = vmand %vm5617_vm7, %vm4606_vm11 }
 0x45b   : > { %v2948_v42 = vsel %vm7602_vm4, %v7601_v14, %v6553_v54  ;;  %vm7603_vm2 = vmmov %vm7602_vm4  ;;  %v2766_v47 = vsel %vm7605_vm3, %v2764_v39, 0.0  ;;  %v2822_v48 = vrot.slane %v2815_v15, %v4475_v20  ;;  %v2873_v62 = vrot.slane %v2866_v44, %v4475_v20  ;;  %v3177_v56 = vpop.permute.xlu0 %3176  ;;  %p3768_p5 = pnand %p3767_p12, %p3761_p7 }
 0x45c   : > { %v2949_v31 = vsel %vm7603_vm2, %v6553_v54, %v7601_v14  ;;  %v2924_v43 = vcombine.low %v2919_v57, %v2920_v22  ;;  %v2711_v29 = vadd.f32 %v2710_v53, %v2682_v25  ;;  %v2739_v37 = vmul.f32 %v2738_v38, %v2737_v52  ;;  %vm7609_vm13 = vmand %vm5617_vm7, %vm4593_vm6  ;;  %v3092_v39 = vpop.permute.xlu1 %3091 }
 0x45d   : > { %vm7607_vm12 = vcmp.lt.s32.totalorder %v4468_v11, 98  ;;  %v2795_v41 = vsel %vm7609_vm13, %v2793_v26, 0.0  ;;  %v2851_v21 = vrot.slane %v2844_v19, %v4475_v20  ;;  %v2902_v2 = vrot.slane %v2895_v45, %v4475_v20  ;;  %vm7612_vm3 = vmand %vm5617_vm7, %vm4623_vm9 }
 0x45e   : > { %v2977_v54 = vsel %vm7607_vm12, %v7606_v32, %v2976_v33  ;;  %vm7608_vm5 = vmmov %vm7607_vm12  ;;  %v2953_v38 = vcombine.low %v2948_v42, %v2949_v31  ;;  %v2740_v55 = vadd.f32 %v2739_v37, %v2711_v29  ;;  %v2768_v60 = vmul.f32 %v2767_v49, %v2766_v47 }
 0x45f   : > { %v2978_v5 = vsel %vm7608_vm5, %v2976_v33, %v7606_v32  ;;  %vm7610_vm4 = vcmp.lt.s32.totalorder %v4468_v11, 97  ;;  %v2824_v28 = vsel %vm7612_vm3, %v2822_v48, 0.0  ;;  %v2880_v40 = vrot.slane %v2873_v62, %v4475_v20  ;;  %vm7615_vm13 = vmand %vm5617_vm7, %vm4558_vm0  ;;  %v3206_v29 = vpop.permute.xlu0 %3205 }
 0x460   : > { %v3006_v4 = vsel %vm7610_vm4, %v6420_v27, %v3005_v24  ;;  %vm7611_vm2 = vmmov %vm7610_vm4  ;;  %v2931_v61 = vrot.slane %v2924_v43, %v4475_v20  ;;  %v2982_v49 = vcombine.low %v2977_v54, %v2978_v5  ;;  %v2769_v15 = vadd.f32 %v2768_v60, %v2740_v55  ;;  %v3121_v25 = vpop.permute.xlu1 %3120 }
 0x461   : > { %v3007_v33 = vsel %vm7611_vm2, %v3005_v24, %v6420_v27  ;;  %v2797_v44 = vmul.f32 %v2796_v35, %v2795_v41  ;;  %vm7613_vm12 = vcmp.lt.s32.totalorder %v4468_v11, 96  ;;  %v2853_v58 = vsel %vm7615_vm13, %v2851_v21, 0.0  ;;  %vm7618_vm3 = vmand %vm5617_vm7, %vm4683_vm14 }
 0x462   : > { %v3035_v27 = vsel %vm7613_vm12, %v6468_v9, %v3034_v46  ;;  %vm7614_vm5 = vmmov %vm7613_vm12  ;;  %v2909_v18 = vrot.slane %v2902_v2, %v4475_v20  ;;  %v2960_v35 = vrot.slane %v2953_v38, %v4475_v20  ;;  %v3011_v57 = vcombine.low %v3006_v4, %v3007_v33 }
 0x463   : > { %v3036_v24 = vsel %vm7614_vm5, %v3034_v46, %v6468_v9  ;;  %v2798_v22 = vadd.f32 %v2797_v44, %v2769_v15  ;;  %v2826_v52 = vmul.f32 %v2825_v50, %v2824_v28  ;;  %vm7616_vm4 = vcmp.lt.s32.totalorder %v4468_v11, 95  ;;  %vm7621_vm13 = vmand %vm5617_vm7, %vm4709_vm10 }
 0x464   : > { %v3064_v9 = vsel %vm7616_vm4, %v6536_v16, %v3063_v51  ;;  %vm7617_vm2 = vmmov %vm7616_vm4  ;;  %v2882_v26 = vsel %vm7618_vm3, %v2880_v40, 0.0  ;;  %v2938_v50 = vrot.slane %v2931_v61, %v4475_v20  ;;  %v2989_v19 = vrot.slane %v2982_v49, %v4475_v20  ;;  %v3150_v5 = vpop.permute.xlu1 %3149 }
 0x465   : > { %v3065_v46 = vsel %vm7617_vm2, %v3063_v51, %v6536_v16  ;;  %v3040_v45 = vcombine.low %v3035_v27, %v3036_v24  ;;  %v2827_v53 = vadd.f32 %v2826_v52, %v2798_v22  ;;  %v2855_v14 = vmul.f32 %v2854_v30, %v2853_v58  ;;  %vm7624_vm3 = vmand %vm5617_vm7, %vm4738_vm8  ;;  %v3235_v58 = vpop.permute.xlu0 %3234 }
 0x466   : > { %vm7619_vm12 = vcmp.lt.s32.totalorder %v4468_v11, 94  ;;  %v2911_v31 = vsel %vm7621_vm13, %v2909_v18, 0.0  ;;  %v2967_v47 = vrot.slane %v2960_v35, %v4475_v20  ;;  %v3018_v48 = vrot.slane %v3011_v57, %v4475_v20  ;;  %vm7629_vm13 = vmand %vm5791_vm1, %vm4593_vm6 }
 0x467   : > { %v3093_v42 = vsel %vm7619_vm12, %v6579_v10, %v3092_v39  ;;  %vm7620_vm5 = vmmov %vm7619_vm12  ;;  %v3069_v30 = vcombine.low %v3064_v9, %v3065_v46  ;;  %v2856_v62 = vadd.f32 %v2855_v14, %v2827_v53  ;;  %v2884_v43 = vmul.f32 %v2883_v17, %v2882_v26 }
 0x468   : > { %v3094_v16 = vsel %vm7620_vm5, %v3092_v39, %v6579_v10  ;;  %vm7622_vm4 = vcmp.lt.s32.totalorder %v4468_v11, 93  ;;  %v2940_v37 = vsel %vm7624_vm3, %v2938_v50, 0.0  ;;  %v2996_v17 = vrot.slane %v2989_v19, %v4475_v20  ;;  %vm7628_vm5 = vmand %vm5791_vm1, %vm4606_vm11  ;;  %v3179_v15 = vpop.permute.xlu1 %3178 }
 0x469   : > { %v3122_v10 = vsel %vm7622_vm4, %v6625_v7, %v3121_v25  ;;  %vm7623_vm2 = vmmov %vm7622_vm4  ;;  %v3047_v32 = vrot.slane %v3040_v45, %v4475_v20  ;;  %v3098_v54 = vcombine.low %v3093_v42, %v3094_v16  ;;  %v2885_v41 = vadd.f32 %v2884_v43, %v2856_v62  ;;  %v3264_v62 = vpop.permute.xlu0 %3263 }
 0x46a   : > { %v3123_v51 = vsel %vm7623_vm2, %v3121_v25, %v6625_v7  ;;  %v2913_v7 = vmul.f32 %v2912_v12, %v2911_v31  ;;  %vm7625_vm12 = vcmp.lt.s32.totalorder %v4468_v11, 83  ;;  %v2969_v38 = vsel %vm7628_vm5, %v2967_v47, 0.0  ;;  %vm7632_vm3 = vmand %vm5791_vm1, %vm4623_vm9 }
 0x46b   : > { %v3151_v0 = vsel %vm7625_vm12, %v6675_v13, %v3150_v5  ;;  %vm7626_vm7 = vmmov %vm7625_vm12  ;;  %v3025_v55 = vrot.slane %v3018_v48, %v4475_v20  ;;  %v3076_v60 = vrot.slane %v3069_v30, %v4475_v20  ;;  %v3127_v12 = vcombine.low %v3122_v10, %v3123_v51 }
 0x46c   : > { %v3152_v21 = vsel %vm7626_vm7, %v3150_v5, %v6675_v13  ;;  %v2914_v4 = vadd.f32 %v2913_v7, %v2885_v41  ;;  %v2942_v33 = vmul.f32 %v2941_v59, %v2940_v37  ;;  %v2999_v28 = vstv %s6726_s23  ;;  %vm7633_vm12 = vmand %vm5791_vm1, %vm4558_vm0  ;;  %v3208_v19 = vpop.permute.xlu1 %3207 }
 0x46d   : > { %v3028_v40 = vstv %s6728_s15  ;;  %v2998_v13 = vsel %vm7629_vm13, %v2996_v17, 0.0  ;;  %v3054_v61 = vrot.slane %v3047_v32, %v4475_v20  ;;  %v3105_v49 = vrot.slane %v3098_v54, %v4475_v20  ;;  %vm7636_vm13 = vmand %vm5791_vm1, %vm4683_vm14 }
 0x46e   : > { %v3156_v39 = vcombine.low %v3151_v0, %v3152_v21  ;;  %v2943_v44 = vadd.f32 %v2942_v33, %v2914_v4  ;;  %v2971_v59 = vmul.f32 %v2970_v63, %v2969_v38  ;;  %vm7630_vm4 = vcmp.lt.s32.totalorder %v4468_v11, 82 }
 0x46f   : > { %v3180_v27 = vsel %vm7630_vm4, %v3177_v56, %v3179_v15  ;;  %vm7631_vm2 = vmmov %vm7630_vm4  ;;  %v3027_v18 = vsel %vm7632_vm3, %v3025_v55, 0.0  ;;  %v3083_v35 = vrot.slane %v3076_v60, %v4475_v20  ;;  %v3134_v57 = vrot.slane %v3127_v12, %v4475_v20 }
 0x470   : > { %v3181_v24 = vsel %vm7631_vm2, %v3179_v15, %v3177_v56  ;;  %v2972_v22 = vadd.f32 %v2971_v59, %v2943_v44  ;;  %v3000_v52 = vmul.f32 %v2999_v28, %v2998_v13  ;;  %v3057_v9 = vstv %s6760_s20  ;;  %vm7637_vm4 = vmand %vm5791_vm1, %vm4709_vm10  ;;  %v3237_v37 = vpop.permute.xlu1 %3236 }
 0x471   : > { %v3185_v63 = vcombine.low %v3180_v27, %v3181_v24  ;;  %v3056_v56 = vsel %vm7633_vm12, %v3054_v61, 0.0  ;;  %v3086_v46 = vstv %s6775_s7  ;;  %v3112_v26 = vrot.slane %v3105_v49, %v4475_v20  ;;  %vm7640_vm12 = vmand %vm5791_vm1, %vm4738_vm8 }
 0x472   : > { %v3163_v50 = vrot.slane %v3156_v39, %v4475_v20  ;;  %v3001_v45 = vadd.f32 %v3000_v52, %v2972_v22  ;;  %v3029_v25 = vmul.f32 %v3028_v40, %v3027_v18  ;;  %vm7634_vm7 = vcmp.lt.s32.totalorder %v4468_v11, 81  ;;  %v3293_v39 = vpop.permute.xlu0 %3292 }
 0x473   : > { %v3209_v53 = vsel %vm7634_vm7, %v3206_v29, %v3208_v19  ;;  %vm7635_vm5 = vmmov %vm7634_vm7  ;;  %v3085_v42 = vsel %vm7636_vm13, %v3083_v35, 0.0  ;;  %v3141_v16 = vrot.slane %v3134_v57, %v4475_v20  ;;  %v3192_v31 = vrot.slane %v3185_v63, %v4475_v20 }
 0x474   : > { %v3210_v14 = vsel %vm7635_vm5, %v3208_v19, %v3206_v29  ;;  %v3030_v48 = vadd.f32 %v3029_v25, %v3001_v45  ;;  %v3058_v30 = vmul.f32 %v3057_v9, %v3056_v56  ;;  %v3115_v43 = vstv %s6802_s19  ;;  %vm7642_vm7 = vmand %vm5945_vm15, %vm4606_vm11  ;;  %v3266_v28 = vpop.permute.xlu1 %3265 }
 0x475   : > { %v3214_v47 = vcombine.low %v3209_v53, %v3210_v14  ;;  %v3114_v10 = vsel %vm7637_vm4, %v3112_v26, 0.0  ;;  %v3170_v51 = vrot.slane %v3163_v50, %v4475_v20  ;;  %v3087_v32 = vmul.f32 %v3086_v46, %v3085_v42  ;;  %vm7645_vm11 = vmand %vm5945_vm15, %vm4593_vm6 }
 0x476   : > { %v3059_v17 = vadd.f32 %v3058_v30, %v3030_v48  ;;  %vm7638_vm2 = vcmp.lt.s32.totalorder %v4468_v11, 80  ;;  %v3144_v41 = vstv %s6817_s30  ;;  %v3143_v7 = vsel %vm7640_vm12, %v3141_v16, 0.0  ;;  %vm7646_vm13 = vmand %vm5945_vm15, %vm4623_vm9  ;;  %v3322_v19 = vpop.permute.xlu0 %3321 }
 0x477   : > { %v3221_v29 = vrot.slane %v3214_v47, %v4475_v20  ;;  %v3238_v54 = vsel %vm7638_vm2, %v3235_v58, %v3237_v37  ;;  %vm7639_vm3 = vmmov %vm7638_vm2  ;;  %v3199_v0 = vrot.slane %v3192_v31, %v4475_v20  ;;  %v3116_v55 = vmul.f32 %v3115_v43, %v3114_v10 }
 0x478   : > { %v3239_v5 = vsel %vm7639_vm3, %v3237_v37, %v3235_v58  ;;  %v3088_v38 = vadd.f32 %v3087_v32, %v3059_v17  ;;  %v3173_v60 = vstv %s6828_s5  ;;  %v3172_v4 = vsel %vm7642_vm7, %v3170_v51, 0.0  ;;  %v3295_v36 = vpop.permute.xlu1 %3294  ;;  %vm7649_vm2 = vmand %vm5945_vm15, %vm4558_vm0 }
 0x479   : > { %v3243_v21 = vcombine.low %v3238_v54, %v3239_v5  ;;  %v3228_v2 = vrot.slane %v3221_v29, %v4475_v20  ;;  %v3145_v13 = vmul.f32 %v3144_v41, %v3143_v7  ;;  %vm7643_vm1 = vcmp.lt.s32.totalorder %v4468_v11, 79  ;;  %vm7650_vm9 = vmand %vm5945_vm15, %vm4683_vm14 }
 0x47a   : > { %v3117_v40 = vadd.f32 %v3116_v55, %v3088_v38  ;;  %v3267_v61 = vsel %vm7643_vm1, %v3264_v62, %v3266_v28  ;;  %vm7644_vm5 = vmmov %vm7643_vm1  ;;  %v3202_v6 = vstv %s6841_s18  ;;  %v3201_v15 = vsel %vm7645_vm11, %v3199_v0, 0.0  ;;  %v7657_v0 = vld [vmem:[#allocation59_spill] sm:$0xff] }
 0x47b   : > { %v3250_v33 = vrot.slane %v3243_v21, %v4475_v20  ;;  %v3268_v49 = vsel %vm7644_vm5, %v3266_v28, %v3264_v62  ;;  %v3174_v24 = vmul.f32 %v3173_v60, %v3172_v4  ;;  %v3231_v58 = vstv %s6851_s25  ;;  %vm7653_vm14 = vmand %vm5945_vm15, %vm4709_vm10  ;;  %v7660_v60 = vld [vmem:[#allocation21_spill] sm:$0xff]  ;;  %v7661_v4 = vld [vmem:[#allocation22_spill] sm:$0xff] }
 0x47c   : > { %v3272_v59 = vcombine.low %v3267_v61, %v3268_v49  ;;  %v3146_v27 = vadd.f32 %v3145_v13, %v3117_v40  ;;  %v3230_v18 = vsel %vm7646_vm13, %v3228_v2, 0.0  ;;  %v3203_v63 = vmul.f32 %v3202_v6, %v3201_v15  ;;  %v3324_v3 = vpop.permute.xlu1 %3323  ;;  %vm7656_vm12 = vmand %vm5945_vm15, %vm4738_vm8 }
 0x47d   : > { %v3257_v44 = vrot.slane %v3250_v33, %v4475_v20  ;;  %vm7647_vm6 = vcmp.lt.s32.totalorder %v4468_v11, 78  ;;  %v3260_v9 = vstv %s6865_s17  ;;  %v3232_v50 = vmul.f32 %v3231_v58, %v3230_v18 }
 0x47e   : > { %v3279_v35 = vrot.slane %v3272_v59, %v4475_v20  ;;  %v3175_v57 = vadd.f32 %v3174_v24, %v3146_v27  ;;  %v3296_v22 = vsel %vm7647_vm6, %v3293_v39, %v3295_v36  ;;  %vm7648_vm4 = vmmov %vm7647_vm6  ;;  %v3289_v45 = vstv %s6875_s12 }
 0x47f   : > { %v3297_v52 = vsel %vm7648_vm4, %v3295_v36, %v3293_v39  ;;  %v3259_v34 = vsel %vm7649_vm2, %v3257_v44, 0.0  ;;  %vm7651_vm0 = vcmp.lt.s32.totalorder %v4468_v11, 77  ;;  %v3318_v47 = vstv %s6888_s29 }
 0x480   : > { %v3286_v56 = vrot.slane %v3279_v35, %v4475_v20  ;;  %v3301_v46 = vcombine.low %v3296_v22, %v3297_v52  ;;  %v3204_v26 = vadd.f32 %v3203_v63, %v3175_v57  ;;  %v3261_v42 = vmul.f32 %v3260_v9, %v3259_v34  ;;  %vm7652_vm3 = vmmov %vm7651_vm0 }
 0x481   : > { %v3325_v16 = vsel %vm7651_vm0, %v3322_v19, %v3324_v3  ;;  %v3326_v31 = vsel %vm7652_vm3, %v3324_v3, %v3322_v19  ;;  %v3347_v11 = vstv %s3578_s14  ;;  %v3359_v21 = vsub.s32 0, %v7657_v0 }
 0x482   : > { %v3288_v25 = vsel %vm7650_vm9, %v3286_v56, 0.0  ;;  %v3308_v53 = vrot.slane %v3301_v46, %v4475_v20  ;;  %v3233_v14 = vadd.f32 %v3232_v50, %v3204_v26  ;;  %v3330_v30 = vcombine.low %v3325_v16, %v3326_v31 }
 0x483   : > { %v3290_v43 = vmul.f32 %v3289_v45, %v3288_v25  ;;  %v3363_v38 = vsub.s32 1, %v7657_v0 }
 0x484   : > { %v3315_v48 = vrot.slane %v3308_v53, %v4475_v20  ;;  %v3262_v62 = vadd.f32 %v3261_v42, %v3233_v14  ;;  %v3337_v10 = vrot.slane %v3330_v30, %v4475_v20 }
 0x486   : > { %v3317_v8 = vsel %vm7653_vm14, %v3315_v48, 0.0  ;;  %v3291_v51 = vadd.f32 %v3290_v43, %v3262_v62  ;;  %v3344_v37 = vrot.slane %v3337_v10, %v4475_v20 }
 0x487   : > { %v3319_v29 = vmul.f32 %v3318_v47, %v3317_v8 }
 0x488   : > { %v3346_v17 = vsel %vm7656_vm12, %v3344_v37, 0.0 }
 0x489   : > { %v3320_v32 = vadd.f32 %v3319_v29, %v3291_v51  ;;  %v3348_v54 = vmul.f32 %v3347_v11, %v3346_v17 }
 0x48b   : > { %v3349_v1 = vadd.f32 %v3348_v54, %v3320_v32 }
 0x48d   : > { %v3579_v5 = vmul.f32 -1.442695, %v3349_v1 }
 0x48f   : > { %3708 = vpow2.f32 %v3579_v5 }
 0x499   : > { %v3709_v41 = vpop.eup %3708 }
 0x49a   : > { %v3353_v7 = vadd.f32 1.0, %v3709_v41 }
 0x49c   : > { %3710 = vrcp.f32 %v3353_v7 }
 0x4a6   : > { %v3711_v20 = vpop.eup %3710 }
 0x4a7   : > { %v3360_v23 = vrot.slane %v3711_v20, %v3359_v21  ;;  %v3364_v55 = vrot.slane %v3711_v20, %v3363_v38 }
 0x4a9   : > { %v3367_v12 = vmul.f32 %v3360_v23, %v7660_v60  ;;  %v3368_v2 = vmul.f32 %v3364_v55, %v7661_v4 }
 0x4ab   : > { %3369 = vst [vmem:[%s254_s16] sm:$0xff] %v3367_v12  ;;  %3370 = vst [vmem:[%s254_s16 + $0x8] sm:$0xff] %v3368_v2 }
 0x4ac   : > { %3771 = shalt.err (!%p3768_p5)
}
 0x4ad   : > { %s3772_s23 = scalar_lea.hbm %s6943_s8, 256  ;;  %s3776_s7 = scalar_lea.hbm %s7663_s22, 512 }
 0x4ae   : > { %p3773_p10 = scmp.ne.s32.totalorder %s6943_s8, %s3772_s23  ;;  %p3777_p4 = scmp.lt.u32.totalorder %s6943_s8, %s7663_s22 }
 0x4af   : > { %p3778_p6 = scmp.lt.u32.totalorder %s3776_s7, %s3772_s23  ;;  %p3780_p9 = scmp.lt.u32.totalorder %s3772_s23, %s6943_s8 }
 0x4b0   : > { %p3774_p2 = pnand %p3773_p10, %p7664_p11 }
 0x4b1   : > { %p3779_p8 = por %p3778_p6, %p3777_p4 }
 0x4b2   : > { %p3775_p1 = pneg %p3774_p2 }
 0x4b3   : > { %p3781_p13 = por %p3780_p9, %p3779_p8 }
 0x4b5   : > { %p3782_p7 = pnand %p3781_p13, %p3775_p1 }
 0x4b7   : > { %3785 = shalt.err (!%p3782_p7)
}
 0x4b8   : > { %3600 = dma.vmem_to_hbm [thread:$0]  (%p7664_p11), %s6945_s9, 256, %s6943_s8, %s3372_s10  }
 0x4b9 PF: > { %s7665_s5 = sld [smem:[#allocation11_spill]]  ;;  %s7666_s18 = sld [smem:[#allocation16_spill]] }
 0x4ba   : > { %s7667_s25 = sld [smem:[#allocation14_spill]] }
 0x4bf   : > { %s3398_s17 = sand.u32 1, %s7665_s5   ;;  %p7668_p0 = scmp.ne.s32.totalorder %s7666_s18, 0 }
 0x4c0   : > { %p7669_p3 = scmp.ge.s32.totalorder %s7667_s25, 2  ;;  %s3399_s12 = scalar_lea.sflag [#allocation4], %s3398_s17 }
 0x4c2   : > { %p3611_p12 = pnand %p7669_p3, %p7668_p0 }
 0x4c4   : > { %3811 = dma.done.wait (!%p3611_p12), %s3399_s12, 256  }
 0x4c5   : > { %3813 = vsyncadd (!%p3611_p12), %s3399_s12, 4294967040  ;;  %s7670_s21 = sld [smem:[#allocation17_spill]]  ;;  %s7671_s18 = sld [smem:[#allocation12_spill]] }
 0x4c6   : > { %s7672_s19 = sld [smem:[#allocation13_spill]]  ;;  %s7673_s20 = sld [smem:[#allocation18_spill]] }
 0x4cb   : > { %p19_p5 = scmp.ge.s32.totalorder %s7670_s21, 4  }
 0x4cd   :  { %21 = sbr.rel (!%p19_p5) target bundleno = 12 (0xc), region = 91 }
 0x4d4   :  { %3404 = vsyncpa [#allocation3], 1 }
 0x4d5   :  { %3406 = vsyncpa [#allocation3 + $0x1], 1 }
 0x4d6   :  { %3407 = vsyncpa [#allocation4], 1 }
 0x4d7   :  { %3409 = vsyncpa [#allocation4 + $0x1], 1 }
 0x4d8   :  { %3410 = vsyncpa [#allocation5], 1 }
 0x4d9   :  { %3412 = vsyncpa [#allocation5 + $0x1], 1 }

</bundles_post_ra>
